<compile_context>
chip_gen: v5e
topology: v5e:2x2
jax: 0.10.0
libtpu: 0.0.40
codegen_flags: <defaults>
</compile_context>

<pallas_src>
import functools

import jax
import jax.numpy as jnp
from jax.experimental import pallas as pl
from jax.experimental.pallas import tpu as pltpu


VEC_PAD = 16    # vector_dims (11) padded per latent group -> lat*16 lanes (dense)
OUT_PAD = 384   # out_channels 176*2 = 352 padded to 3*128 lanes


# ------------------------------ Pallas kernel --------------------------------

def _fused_kernel(patches_ref, u_ref,
                  encw_ref, encb_ref, dw_ref, db_ref, segm_ref,
                  distw_ref, distb_ref, backw_ref, backb_ref,
                  estw_ref, estb_ref,
                  logits_ref, qy_ref, zs_ref, rz_ref, pt_ref, best_ref,
                  *, num_sample, vec, vec_pad, tau, eps):
    """Whole CQVAE chain for one batch tile, fully VMEM-resident.

    encoder (block-diag im2col matmul) -> discrete linear + sigmoid -> logits
    -> per-latent softmax (qy) -> num_sample gumbel-softmax draws (all samples
    folded into the matmul M dimension) -> dist -> backloop, plus est(logits).
    """
    tb = patches_ref.shape[0]
    lvp = dw_ref.shape[1]                    # lat * vec_pad (lane-dense)
    s = num_sample
    neg = jnp.float32(-1e30)

    # ---- encoder stand-in + discrete linear + sigmoid -> logits (M = TB) ----
    enc = jnp.dot(patches_ref[...].astype(jnp.bfloat16), encw_ref[...],
                  preferred_element_type=jnp.float32) + encb_ref[...]   # (TB, flat)
    y = jnp.dot(enc.astype(jnp.bfloat16), dw_ref[...],
                preferred_element_type=jnp.float32) + db_ref[...]       # (TB, lvp)
    logits = 1.0 / (1.0 + jnp.exp(-y))                                  # exact sigmoid
    logits_ref[...] = logits

    segm = segm_ref[...]                                                # (lvp, lvp)

    # Lane mask: inside each vec_pad-wide group only the first `vec` lanes are real.
    lane_b = jax.lax.broadcasted_iota(jnp.int32, (tb, lvp), 1)
    valid_b = (lane_b % vec_pad) < vec

    # ---- qy = softmax(logits) per latent group (group sums via segsum matmul) ----
    pq = jnp.where(valid_b, logits, neg)
    mq = jnp.max(pq, axis=-1, keepdims=True)
    eq = jnp.where(valid_b, jnp.exp(pq - mq), 0.0)
    sq = jnp.dot(eq, segm, preferred_element_type=jnp.float32)
    qy_ref[...] = eq / sq

    # ---- gumbel-softmax draws: batch and sample rows folded into M = TB*S ----
    u = u_ref[...]                                                      # (TB, S, lvp)
    g = -jnp.log(-jnp.log(u + eps) + eps)                               # Gumbel(0,1)
    pi = ((logits[:, None, :] + g) * (1.0 / tau)).reshape(tb * s, lvp)
    lane_s = jax.lax.broadcasted_iota(jnp.int32, (tb * s, lvp), 1)
    valid_s = (lane_s % vec_pad) < vec
    pi = jnp.where(valid_s, pi, neg)
    mz = jnp.max(pi, axis=-1, keepdims=True)
    ez = jnp.where(valid_s, jnp.exp(pi - mz), 0.0)
    sz = jnp.dot(ez, segm, preferred_element_type=jnp.float32)
    z = ez / sz                                                         # (TB*S, lvp)
    zs_ref[...] = z

    # ---- shape_dist: dist + backloop over all batch rows & samples at once ----
    pt = jnp.dot(z.astype(jnp.bfloat16), distw_ref[...],
                 preferred_element_type=jnp.float32) + distb_ref[...]   # (TB*S, OUT_PAD)
    pt_ref[...] = pt
    rz_ref[...] = jnp.dot(pt.astype(jnp.bfloat16), backw_ref[...],
                          preferred_element_type=jnp.float32) + backb_ref[...]

    # ---- shape_est on the raw logits (M = TB) ----
    best_ref[...] = jnp.dot(logits.astype(jnp.bfloat16), estw_ref[...],
                            preferred_element_type=jnp.float32) + estb_ref[...]


# ------------------------------ pallas_call wrapper ---------------------------

def _fused_call(patches, noise, p, *, batch_tile, num_sample, vec, vec_pad,
                tau, eps, out_pad):
    B, flat_in = patches.shape
    S = num_sample
    TB = batch_tile
    lvp = p["disc_w"].shape[1]
    assert B % TB == 0, "batch must be a multiple of the batch tile"

    kernel = functools.partial(_fused_kernel, num_sample=S, vec=vec,
                               vec_pad=vec_pad, tau=float(tau), eps=float(eps))

    def const(a):  # weights/biases: same block every grid step
        r, c = a.shape
        return pl.BlockSpec((r, c), lambda i: (0, 0))

    in_specs = [
        pl.BlockSpec((TB, flat_in), lambda i: (i, 0)),        # im2col patches
        pl.BlockSpec((TB, S, lvp), lambda i: (i, 0, 0)),      # gumbel uniforms
        const(p["enc_w"]), const(p["enc_b"]),
        const(p["disc_w"]), const(p["disc_b"]), const(p["segsum"]),
        const(p["dist_w"]), const(p["dist_b"]),
        const(p["back_w"]), const(p["back_b"]),
        const(p["est_w"]), const(p["est_b"]),
    ]
    out_specs = (
        pl.BlockSpec((TB, lvp), lambda i: (i, 0)),            # logits (padded)
        pl.BlockSpec((TB, lvp), lambda i: (i, 0)),            # qy
        pl.BlockSpec((TB * S, lvp), lambda i: (i, 0)),        # zs
        pl.BlockSpec((TB * S, lvp), lambda i: (i, 0)),        # rz
        pl.BlockSpec((TB * S, out_pad), lambda i: (i, 0)),    # pt
        pl.BlockSpec((TB, out_pad), lambda i: (i, 0)),        # best
    )
    out_shape = (
        jax.ShapeDtypeStruct((B, lvp), jnp.float32),
        jax.ShapeDtypeStruct((B, lvp), jnp.float32),
        jax.ShapeDtypeStruct((B * S, lvp), jnp.float32),
        jax.ShapeDtypeStruct((B * S, lvp), jnp.float32),
        jax.ShapeDtypeStruct((B * S, out_pad), jnp.float32),
        jax.ShapeDtypeStruct((B, out_pad), jnp.float32),
    )
    return pl.pallas_call(
        kernel,
        grid=(B // TB,),
        in_specs=in_specs,
        out_specs=out_specs,
        out_shape=out_shape,
        compiler_params=pltpu.CompilerParams(dimension_semantics=("parallel",)),
    )(patches, noise, p["enc_w"], p["enc_b"], p["disc_w"], p["disc_b"],
      p["segsum"], p["dist_w"], p["dist_b"], p["back_w"], p["back_b"],
      p["est_w"], p["est_b"])


# ------------------------------ parameter setup -------------------------------

def _uniform_init(key, shape, fan_in):
    bound = float(fan_in) ** -0.5
    return jax.random.uniform(key, shape, jnp.float32, -bound, bound)


def _pad_last(a, new):
    pad = [(0, 0)] * (a.ndim - 1) + [(0, new - a.shape[-1])]
    return jnp.pad(a, pad)


def _pad_axis(a, axis, new):
    pad = [(0, 0)] * a.ndim
    pad[axis] = (0, new - a.shape[axis])
    return jnp.pad(a, pad)


def _pad_lv(a, axis, lat, vec, vec_pad):
    """Pad a lat*vec sized axis to lat*vec_pad with zeros interleaved per group."""
    shape = a.shape
    a = a.reshape(shape[:axis] + (lat, vec) + shape[axis + 1:])
    pad = [(0, 0)] * a.ndim
    pad[axis + 1] = (0, vec_pad - vec)
    a = jnp.pad(a, pad)
    return a.reshape(shape[:axis] + (lat * vec_pad,) + shape[axis + 1:])


def init_params(key, *, in_ch, enc_ch, patch, p2, lat, vec, out_ch,
                vec_pad=VEC_PAD, out_pad=OUT_PAD):
    ks = jax.random.split(key, 10)
    k_in = in_ch * patch * patch
    flat = p2 * enc_ch                 # mirrors "512 * 4 * 4" flatten (scaled down)
    lv = lat * vec
    lvp = lat * vec_pad
    p = {}

    # Patchify-conv encoder stand-in, fused into one block-diagonal matmul:
    # every spatial position shares enc_w, so kron(I_p2, enc_w) maps the
    # spatial-major im2col row (p2*k_in) straight to the spatial-major flat
    # feature (p2*enc_ch) with no transpose/slice between encoder and discrete.
    enc_w = _uniform_init(ks[0], (k_in, enc_ch), k_in)
    enc_b = _uniform_init(ks[1], (1, enc_ch), k_in)
    p["enc_w"] = jnp.kron(jnp.eye(p2, dtype=jnp.float32), enc_w).astype(jnp.bfloat16)
    p["enc_b"] = jnp.tile(enc_b, (1, p2))

    # discrete: flat -> lat*vec.  Rows are indexed spatial-major (pos, channel);
    # a real torch checkpoint (channel-major flatten) needs a one-time row
    # permutation at load.  Output columns are zero-padded per latent group.
    p["disc_w"] = _pad_lv(_uniform_init(ks[2], (flat, lv), flat),
                          1, lat, vec, vec_pad).astype(jnp.bfloat16)
    p["disc_b"] = _pad_lv(_uniform_init(ks[3], (1, lv), flat), 1, lat, vec, vec_pad)

    # dist: lat*vec -> out_ch   (input rows group-padded, output padded to 384)
    p["dist_w"] = _pad_last(_pad_lv(_uniform_init(ks[4], (lv, out_ch), lv),
                                    0, lat, vec, vec_pad),
                            out_pad).astype(jnp.bfloat16)
    p["dist_b"] = _pad_last(_uniform_init(ks[5], (1, out_ch), lv), out_pad)

    # backloop: out_ch -> lat*vec
    p["back_w"] = _pad_lv(_pad_axis(_uniform_init(ks[6], (out_ch, lv), out_ch),
                                    0, out_pad),
                          1, lat, vec, vec_pad).astype(jnp.bfloat16)
    p["back_b"] = _pad_lv(_uniform_init(ks[7], (1, lv), out_ch), 1, lat, vec, vec_pad)

    # est: lat*vec -> out_ch
    p["est_w"] = _pad_last(_pad_lv(_uniform_init(ks[8], (lv, out_ch), lv),
                                   0, lat, vec, vec_pad),
                           out_pad).astype(jnp.bfloat16)
    p["est_b"] = _pad_last(_uniform_init(ks[9], (1, out_ch), lv), out_pad)

    # block-diagonal ones matrix: per-latent-group softmax sums via one matmul
    gid = jnp.arange(lvp) // vec_pad
    p["segsum"] = (gid[:, None] == gid[None, :]).astype(jnp.float32)
    return p


# ------------------------------ forward pass ----------------------------------

def cqvae_forward(params, x, noise_key, *, lat, vec, patch, tau, num_sample,
                  batch_tile, vec_pad=VEC_PAD, out_pad=OUT_PAD, eps=1e-20):
    B, C, H, W = x.shape
    Ho, Wo = H // patch, W // patch
    S = num_sample
    lvp = lat * vec_pad

    # im2col for the kernel==stride patchify conv, flattened spatial-major.
    patches = x.reshape(B, C, Ho, patch, Wo, patch)
    patches = patches.transpose(0, 2, 4, 1, 3, 5)
    patches = patches.reshape(B, Ho * Wo * C * patch * patch)

    # Gumbel uniforms in plain JAX (on-chip PRNG primitives are unavailable in
    # interpret mode); the Gumbel transform itself runs inside the kernel.
    u = jax.random.uniform(noise_key, (B, S, lvp), jnp.float32)

    logits_p, qy_p, zs_p, rz_p, pt_p, best_p = _fused_call(
        patches, u, params, batch_tile=batch_tile, num_sample=S, vec=vec,
        vec_pad=vec_pad, tau=tau, eps=eps, out_pad=out_pad)

    # Strip lane padding (wrapper-side slices; kernel stores stay lane-dense).
    out_ch = 176 * 2
    logits = logits_p.reshape(B, lat, vec_pad)[..., :vec]
    qy = qy_p.reshape(B, lat, vec_pad)[..., :vec]
    zs = zs_p.reshape(B, S, lat, vec_pad)[..., :vec]
    rzs = rz_p.reshape(B, S, lat, vec_pad)[..., :vec]
    pts = pt_p[:, :out_ch].reshape(B, S, 176, 2)
    best = best_p[:, :out_ch].reshape(B, 176, 2)
    return (zs, rzs, pts, best), (logits, qy)


# ----------------------------------- main --------------------------------------

if __name__ == "__main__":
    B = 16           # batch
    TB = 8           # batch tile: grid of 2 steps (keeps both v7x TCs busy)
    IN_CH = 1        # in_channels
    H = W = 32       # small image; patchify conv -> 4x4 spatial grid
    PATCH = 8        # kernel == stride
    ENC_CH = 32      # stand-in encoder channels -> flat feature 32*16 = 512
    LAT = 8          # latent_dims (scaled down; LAT*VEC_PAD = 128 lanes)
    VEC = 11         # vector_dims
    OUT_CH = 176 * 2 # out_channels (keeps the hard-coded view(-1, 176, 2))
    TAU = 1.0
    NUM_SAMPLE = 8   # scaled-down num_sample, multiple of 8 (sublane dense)

    root = jax.random.PRNGKey(0)
    k_param, k_x, k_noise = jax.random.split(root, 3)
    p2 = (H // PATCH) * (W // PATCH)

    params = init_params(k_param, in_ch=IN_CH, enc_ch=ENC_CH, patch=PATCH,
                         p2=p2, lat=LAT, vec=VEC, out_ch=OUT_CH)
    x = jax.random.normal(k_x, (B, IN_CH, H, W), jnp.float32)

    fwd = jax.jit(functools.partial(cqvae_forward, lat=LAT, vec=VEC, patch=PATCH,
                                    tau=TAU, num_sample=NUM_SAMPLE,
                                    batch_tile=TB))
    (zs, rzs, pts, best), (logits, qy) = fwd(params, x, k_noise)
    jax.block_until_ready((zs, rzs, pts, best, logits, qy))

    assert zs.shape == (B, NUM_SAMPLE, LAT, VEC)
    assert rzs.shape == (B, NUM_SAMPLE, LAT, VEC)
    assert pts.shape == (B, NUM_SAMPLE, 176, 2)
    assert best.shape == (B, 176, 2)
    assert logits.shape == (B, LAT, VEC)
    assert qy.shape == (B, LAT, VEC)
    # light numeric sanity: softmax rows sum to 1, everything finite
    assert bool(jnp.all(jnp.isfinite(zs))) and bool(jnp.all(jnp.isfinite(pts)))
    assert bool(jnp.allclose(qy.sum(-1), 1.0, atol=1e-3))
    assert bool(jnp.allclose(zs.sum(-1), 1.0, atol=1e-3))
    print("KERNEL_OK")
</pallas_src>

<mosaic_0001>
module attributes {stable_mosaic.version = 11 : i64} {
  func.func @_fused_kernel(%arg0: i32, %arg1: memref<8x1024xf32, #tpu.memory_space<vmem>>, %arg2: memref<8x8x128xf32, #tpu.memory_space<vmem>>, %arg3: memref<1024x512xbf16, #tpu.memory_space<vmem>>, %arg4: memref<1x512xf32, #tpu.memory_space<vmem>>, %arg5: memref<512x128xbf16, #tpu.memory_space<vmem>>, %arg6: memref<1x128xf32, #tpu.memory_space<vmem>>, %arg7: memref<128x128xf32, #tpu.memory_space<vmem>>, %arg8: memref<128x384xbf16, #tpu.memory_space<vmem>>, %arg9: memref<1x384xf32, #tpu.memory_space<vmem>>, %arg10: memref<384x128xbf16, #tpu.memory_space<vmem>>, %arg11: memref<1x128xf32, #tpu.memory_space<vmem>>, %arg12: memref<128x384xbf16, #tpu.memory_space<vmem>>, %arg13: memref<1x384xf32, #tpu.memory_space<vmem>>, %arg14: memref<8x128xf32, #tpu.memory_space<vmem>>, %arg15: memref<8x128xf32, #tpu.memory_space<vmem>>, %arg16: memref<64x128xf32, #tpu.memory_space<vmem>>, %arg17: memref<64x128xf32, #tpu.memory_space<vmem>>, %arg18: memref<64x384xf32, #tpu.memory_space<vmem>>, %arg19: memref<8x384xf32, #tpu.memory_space<vmem>>) attributes {dimension_semantics = [#tpu.dimension_semantics<parallel>], iteration_bounds = array<i64: 2>, scalar_prefetch = 0 : i64, scratch_operands = 0 : i64, tpu.core_type = #tpu.core_type<tc>, window_params = [{transform_indices = @transform_0, window_bounds = array<i64: 8, 1024>}, {transform_indices = @transform_1, window_bounds = array<i64: 8, 8, 128>}, {pipeline_mode = #tpu.pipeline_mode<synchronous>, transform_indices = @transform_2, window_bounds = array<i64: 1024, 512>}, {pipeline_mode = #tpu.pipeline_mode<synchronous>, transform_indices = @transform_3, window_bounds = array<i64: 1, 512>}, {pipeline_mode = #tpu.pipeline_mode<synchronous>, transform_indices = @transform_4, window_bounds = array<i64: 512, 128>}, {pipeline_mode = #tpu.pipeline_mode<synchronous>, transform_indices = @transform_5, window_bounds = array<i64: 1, 128>}, {pipeline_mode = #tpu.pipeline_mode<synchronous>, transform_indices = @transform_6, window_bounds = array<i64: 128, 128>}, {pipeline_mode = #tpu.pipeline_mode<synchronous>, transform_indices = @transform_7, window_bounds = array<i64: 128, 384>}, {pipeline_mode = #tpu.pipeline_mode<synchronous>, transform_indices = @transform_8, window_bounds = array<i64: 1, 384>}, {pipeline_mode = #tpu.pipeline_mode<synchronous>, transform_indices = @transform_9, window_bounds = array<i64: 384, 128>}, {pipeline_mode = #tpu.pipeline_mode<synchronous>, transform_indices = @transform_10, window_bounds = array<i64: 1, 128>}, {pipeline_mode = #tpu.pipeline_mode<synchronous>, transform_indices = @transform_11, window_bounds = array<i64: 128, 384>}, {pipeline_mode = #tpu.pipeline_mode<synchronous>, transform_indices = @transform_12, window_bounds = array<i64: 1, 384>}, {transform_indices = @transform_13, window_bounds = array<i64: 8, 128>}, {transform_indices = @transform_14, window_bounds = array<i64: 8, 128>}, {transform_indices = @transform_15, window_bounds = array<i64: 64, 128>}, {transform_indices = @transform_16, window_bounds = array<i64: 64, 128>}, {transform_indices = @transform_17, window_bounds = array<i64: 64, 384>}, {transform_indices = @transform_18, window_bounds = array<i64: 8, 384>}]} {
    %c0 = arith.constant 0 : index
    %c0_0 = arith.constant 0 : index
    %0 = vector.load %arg1[%c0, %c0_0] : memref<8x1024xf32, #tpu.memory_space<vmem>>, vector<8x1024xf32>
    %1 = arith.truncf %0 : vector<8x1024xf32> to vector<8x1024xbf16>
    %c0_1 = arith.constant 0 : index
    %c0_2 = arith.constant 0 : index
    %2 = vector.load %arg3[%c0_1, %c0_2] : memref<1024x512xbf16, #tpu.memory_space<vmem>>, vector<1024x512xbf16>
    %cst = arith.constant dense<0.000000e+00> : vector<8x512xf32>
    %3 = tpu.matmul %1, %2, %cst {dimension_numbers = #tpu.dot_dimension_numbers<[1], [0], [0], [1], [0, 0, 1, 1], [], []>} : vector<8x1024xbf16>, vector<1024x512xbf16>, vector<8x512xf32> -> vector<8x512xf32>
    %c0_3 = arith.constant 0 : index
    %c0_4 = arith.constant 0 : index
    %4 = vector.load %arg4[%c0_3, %c0_4] : memref<1x512xf32, #tpu.memory_space<vmem>>, vector<1x512xf32>
    %5 = vector.broadcast %4 : vector<1x512xf32> to vector<8x512xf32>
    %6 = arith.addf %3, %5 : vector<8x512xf32>
    %7 = arith.truncf %6 : vector<8x512xf32> to vector<8x512xbf16>
    %c0_5 = arith.constant 0 : index
    %c0_6 = arith.constant 0 : index
    %8 = vector.load %arg5[%c0_5, %c0_6] : memref<512x128xbf16, #tpu.memory_space<vmem>>, vector<512x128xbf16>
    %cst_7 = arith.constant dense<0.000000e+00> : vector<8x128xf32>
    %9 = tpu.matmul %7, %8, %cst_7 {dimension_numbers = #tpu.dot_dimension_numbers<[1], [0], [0], [1], [0, 0, 1, 1], [], []>} : vector<8x512xbf16>, vector<512x128xbf16>, vector<8x128xf32> -> vector<8x128xf32>
    %c0_8 = arith.constant 0 : index
    %c0_9 = arith.constant 0 : index
    %10 = vector.load %arg6[%c0_8, %c0_9] : memref<1x128xf32, #tpu.memory_space<vmem>>, vector<1x128xf32>
    %11 = vector.broadcast %10 : vector<1x128xf32> to vector<8x128xf32>
    %12 = arith.addf %9, %11 : vector<8x128xf32>
    %cst_10 = arith.constant 0.000000e+00 : f32
    %13 = vector.broadcast %cst_10 : f32 to vector<8x128xf32>
    %14 = arith.subf %13, %12 : vector<8x128xf32>
    %15 = math.exp %14 : vector<8x128xf32>
    %cst_11 = arith.constant 1.000000e+00 : f32
    %16 = vector.broadcast %cst_11 : f32 to vector<8x128xf32>
    %17 = arith.addf %16, %15 : vector<8x128xf32>
    %cst_12 = arith.constant 1.000000e+00 : f32
    %18 = vector.broadcast %cst_12 : f32 to vector<8x128xf32>
    %19 = arith.divf %18, %17 : vector<8x128xf32>
    %c0_13 = arith.constant 0 : index
    %c0_14 = arith.constant 0 : index
    %20 = vector.load %arg14[%c0_13, %c0_14] : memref<8x128xf32, #tpu.memory_space<vmem>>, vector<8x128xf32>
    tpu.vector_store %arg14[%c0_13, %c0_14], %19 {strides = array<i32>} : memref<8x128xf32, #tpu.memory_space<vmem>>, vector<8x128xf32>,
    %c0_15 = arith.constant 0 : index
    %c0_16 = arith.constant 0 : index
    %21 = vector.load %arg7[%c0_15, %c0_16] : memref<128x128xf32, #tpu.memory_space<vmem>>, vector<128x128xf32>
    %22 = tpu.iota {dimensions = array<i32: 1>} : vector<8x128xi32>
    %c16_i32 = arith.constant 16 : i32
    %c0_i32 = arith.constant 0 : i32
    %23 = arith.cmpi eq, %c16_i32, %c0_i32 : i32
    %c1_i32 = arith.constant 1 : i32
    %24 = arith.select %23, %c1_i32, %c16_i32 : i32
    %25 = vector.broadcast %24 : i32 to vector<8x128xi32>
    %26 = arith.remsi %22, %25 : vector<8x128xi32>
    %c0_i32_17 = arith.constant 0 : i32
    %27 = vector.broadcast %c0_i32_17 : i32 to vector<8x128xi32>
    %28 = arith.cmpi ne, %26, %27 : vector<8x128xi32>
    %c0_i32_18 = arith.constant 0 : i32
    %29 = vector.broadcast %c0_i32_18 : i32 to vector<8x128xi32>
    %30 = arith.cmpi slt, %26, %29 : vector<8x128xi32>
    %c0_i32_19 = arith.constant 0 : i32
    %31 = arith.cmpi slt, %24, %c0_i32_19 : i32
    %32 = vector.broadcast %31 : i1 to vector<8x128xi1>
    %33 = vector.broadcast %32 : vector<8x128xi1> to vector<8x128xi1>
    %34 = arith.xori %30, %33 : vector<8x128xi1>
    %35 = arith.andi %34, %28 : vector<8x128xi1>
    %36 = vector.broadcast %24 : i32 to vector<8x128xi32>
    %37 = arith.addi %26, %36 : vector<8x128xi32>
    %38 = arith.select %35, %37, %26 : vector<8x128xi1>, vector<8x128xi32>
    %c11_i32 = arith.constant 11 : i32
    %39 = vector.broadcast %c11_i32 : i32 to vector<8x128xi32>
    %40 = arith.cmpi slt, %38, %39 : vector<8x128xi32>
    %cst_20 = arith.constant -1.000000e+30 : f32
    %41 = vector.broadcast %cst_20 : f32 to vector<8x128xf32>
    %42 = arith.select %40, %19, %41 : vector<8x128xi1>, vector<8x128xf32>
    %cst_21 = arith.constant dense<0xFF800000> : vector<8xf32>
    %43 = vector.multi_reduction <maximumf>, %42, %cst_21 [1] : vector<8x128xf32> to vector<8xf32>
    %44 = vector.shape_cast %43 : vector<8xf32> to vector<8x1xf32>
    %45 = vector.broadcast %44 : vector<8x1xf32> to vector<8x128xf32>
    %46 = arith.subf %42, %45 : vector<8x128xf32>
    %47 = math.exp %46 : vector<8x128xf32>
    %cst_22 = arith.constant 0.000000e+00 : f32
    %48 = vector.broadcast %cst_22 : f32 to vector<8x128xf32>
    %49 = arith.select %40, %47, %48 : vector<8x128xi1>, vector<8x128xf32>
    %cst_23 = arith.constant dense<0.000000e+00> : vector<8x128xf32>
    %50 = tpu.matmul %49, %21, %cst_23 {dimension_numbers = #tpu.dot_dimension_numbers<[1], [0], [0], [1], [0, 0, 1, 1], [], []>} : vector<8x128xf32>, vector<128x128xf32>, vector<8x128xf32> -> vector<8x128xf32>
    %51 = arith.divf %49, %50 : vector<8x128xf32>
    %c0_24 = arith.constant 0 : index
    %c0_25 = arith.constant 0 : index
    %52 = vector.load %arg15[%c0_24, %c0_25] : memref<8x128xf32, #tpu.memory_space<vmem>>, vector<8x128xf32>
    tpu.vector_store %arg15[%c0_24, %c0_25], %51 {strides = array<i32>} : memref<8x128xf32, #tpu.memory_space<vmem>>, vector<8x128xf32>,
    %c0_26 = arith.constant 0 : index
    %c0_27 = arith.constant 0 : index
    %c0_28 = arith.constant 0 : index
    %53 = vector.load %arg2[%c0_26, %c0_27, %c0_28] : memref<8x8x128xf32, #tpu.memory_space<vmem>>, vector<8x8x128xf32>
    %cst_29 = arith.constant 9.99999968E-21 : f32
    %54 = vector.broadcast %cst_29 : f32 to vector<8x8x128xf32>
    %55 = arith.addf %53, %54 : vector<8x8x128xf32>
    %56 = math.log %55 : vector<8x8x128xf32>
    %cst_30 = arith.constant 0.000000e+00 : f32
    %57 = vector.broadcast %cst_30 : f32 to vector<8x8x128xf32>
    %58 = arith.subf %57, %56 : vector<8x8x128xf32>
    %cst_31 = arith.constant 9.99999968E-21 : f32
    %59 = vector.broadcast %cst_31 : f32 to vector<8x8x128xf32>
    %60 = arith.addf %58, %59 : vector<8x8x128xf32>
    %61 = math.log %60 : vector<8x8x128xf32>
    %cst_32 = arith.constant 0.000000e+00 : f32
    %62 = vector.broadcast %cst_32 : f32 to vector<8x8x128xf32>
    %63 = arith.subf %62, %61 : vector<8x8x128xf32>
    %64 = vector.shape_cast %19 : vector<8x128xf32> to vector<8x1x128xf32>
    %65 = vector.broadcast %64 : vector<8x1x128xf32> to vector<8x8x128xf32>
    %66 = arith.addf %65, %63 : vector<8x8x128xf32>
    %cst_33 = arith.constant 1.000000e+00 : f32
    %67 = vector.broadcast %cst_33 : f32 to vector<8x8x128xf32>
    %68 = arith.mulf %66, %67 : vector<8x8x128xf32>
    %69 = vector.shape_cast %68 : vector<8x8x128xf32> to vector<64x128xf32>
    %70 = tpu.iota {dimensions = array<i32: 1>} : vector<64x128xi32>
    %c16_i32_34 = arith.constant 16 : i32
    %c0_i32_35 = arith.constant 0 : i32
    %71 = arith.cmpi eq, %c16_i32_34, %c0_i32_35 : i32
    %c1_i32_36 = arith.constant 1 : i32
    %72 = arith.select %71, %c1_i32_36, %c16_i32_34 : i32
    %73 = vector.broadcast %72 : i32 to vector<64x128xi32>
    %74 = arith.remsi %70, %73 : vector<64x128xi32>
    %c0_i32_37 = arith.constant 0 : i32
    %75 = vector.broadcast %c0_i32_37 : i32 to vector<64x128xi32>
    %76 = arith.cmpi ne, %74, %75 : vector<64x128xi32>
    %c0_i32_38 = arith.constant 0 : i32
    %77 = vector.broadcast %c0_i32_38 : i32 to vector<64x128xi32>
    %78 = arith.cmpi slt, %74, %77 : vector<64x128xi32>
    %c0_i32_39 = arith.constant 0 : i32
    %79 = arith.cmpi slt, %72, %c0_i32_39 : i32
    %80 = vector.broadcast %79 : i1 to vector<64x128xi1>
    %81 = vector.broadcast %80 : vector<64x128xi1> to vector<64x128xi1>
    %82 = arith.xori %78, %81 : vector<64x128xi1>
    %83 = arith.andi %82, %76 : vector<64x128xi1>
    %84 = vector.broadcast %72 : i32 to vector<64x128xi32>
    %85 = arith.addi %74, %84 : vector<64x128xi32>
    %86 = arith.select %83, %85, %74 : vector<64x128xi1>, vector<64x128xi32>
    %c11_i32_40 = arith.constant 11 : i32
    %87 = vector.broadcast %c11_i32_40 : i32 to vector<64x128xi32>
    %88 = arith.cmpi slt, %86, %87 : vector<64x128xi32>
    %cst_41 = arith.constant -1.000000e+30 : f32
    %89 = vector.broadcast %cst_41 : f32 to vector<64x128xf32>
    %90 = arith.select %88, %69, %89 : vector<64x128xi1>, vector<64x128xf32>
    %cst_42 = arith.constant dense<0xFF800000> : vector<64xf32>
    %91 = vector.multi_reduction <maximumf>, %90, %cst_42 [1] : vector<64x128xf32> to vector<64xf32>
    %92 = vector.shape_cast %91 : vector<64xf32> to vector<64x1xf32>
    %93 = vector.broadcast %92 : vector<64x1xf32> to vector<64x128xf32>
    %94 = arith.subf %90, %93 : vector<64x128xf32>
    %95 = math.exp %94 : vector<64x128xf32>
    %cst_43 = arith.constant 0.000000e+00 : f32
    %96 = vector.broadcast %cst_43 : f32 to vector<64x128xf32>
    %97 = arith.select %88, %95, %96 : vector<64x128xi1>, vector<64x128xf32>
    %cst_44 = arith.constant dense<0.000000e+00> : vector<64x128xf32>
    %98 = tpu.matmul %97, %21, %cst_44 {dimension_numbers = #tpu.dot_dimension_numbers<[1], [0], [0], [1], [0, 0, 1, 1], [], []>} : vector<64x128xf32>, vector<128x128xf32>, vector<64x128xf32> -> vector<64x128xf32>
    %99 = arith.divf %97, %98 : vector<64x128xf32>
    %c0_45 = arith.constant 0 : index
    %c0_46 = arith.constant 0 : index
    %100 = vector.load %arg16[%c0_45, %c0_46] : memref<64x128xf32, #tpu.memory_space<vmem>>, vector<64x128xf32>
    tpu.vector_store %arg16[%c0_45, %c0_46], %99 {strides = array<i32>} : memref<64x128xf32, #tpu.memory_space<vmem>>, vector<64x128xf32>,
    %101 = arith.truncf %99 : vector<64x128xf32> to vector<64x128xbf16>
    %c0_47 = arith.constant 0 : index
    %c0_48 = arith.constant 0 : index
    %102 = vector.load %arg8[%c0_47, %c0_48] : memref<128x384xbf16, #tpu.memory_space<vmem>>, vector<128x384xbf16>
    %cst_49 = arith.constant dense<0.000000e+00> : vector<64x384xf32>
    %103 = tpu.matmul %101, %102, %cst_49 {dimension_numbers = #tpu.dot_dimension_numbers<[1], [0], [0], [1], [0, 0, 1, 1], [], []>} : vector<64x128xbf16>, vector<128x384xbf16>, vector<64x384xf32> -> vector<64x384xf32>
    %c0_50 = arith.constant 0 : index
    %c0_51 = arith.constant 0 : index
    %104 = vector.load %arg9[%c0_50, %c0_51] : memref<1x384xf32, #tpu.memory_space<vmem>>, vector<1x384xf32>
    %105 = vector.broadcast %104 : vector<1x384xf32> to vector<64x384xf32>
    %106 = arith.addf %103, %105 : vector<64x384xf32>
    %c0_52 = arith.constant 0 : index
    %c0_53 = arith.constant 0 : index
    %107 = vector.load %arg18[%c0_52, %c0_53] : memref<64x384xf32, #tpu.memory_space<vmem>>, vector<64x384xf32>
    tpu.vector_store %arg18[%c0_52, %c0_53], %106 {strides = array<i32>} : memref<64x384xf32, #tpu.memory_space<vmem>>, vector<64x384xf32>,
    %108 = arith.truncf %106 : vector<64x384xf32> to vector<64x384xbf16>
    %c0_54 = arith.constant 0 : index
    %c0_55 = arith.constant 0 : index
    %109 = vector.load %arg10[%c0_54, %c0_55] : memref<384x128xbf16, #tpu.memory_space<vmem>>, vector<384x128xbf16>
    %cst_56 = arith.constant dense<0.000000e+00> : vector<64x128xf32>
    %110 = tpu.matmul %108, %109, %cst_56 {dimension_numbers = #tpu.dot_dimension_numbers<[1], [0], [0], [1], [0, 0, 1, 1], [], []>} : vector<64x384xbf16>, vector<384x128xbf16>, vector<64x128xf32> -> vector<64x128xf32>
    %c0_57 = arith.constant 0 : index
    %c0_58 = arith.constant 0 : index
    %111 = vector.load %arg11[%c0_57, %c0_58] : memref<1x128xf32, #tpu.memory_space<vmem>>, vector<1x128xf32>
    %112 = vector.broadcast %111 : vector<1x128xf32> to vector<64x128xf32>
    %113 = arith.addf %110, %112 : vector<64x128xf32>
    %c0_59 = arith.constant 0 : index
    %c0_60 = arith.constant 0 : index
    %114 = vector.load %arg17[%c0_59, %c0_60] : memref<64x128xf32, #tpu.memory_space<vmem>>, vector<64x128xf32>
    tpu.vector_store %arg17[%c0_59, %c0_60], %113 {strides = array<i32>} : memref<64x128xf32, #tpu.memory_space<vmem>>, vector<64x128xf32>,
    %115 = arith.truncf %19 : vector<8x128xf32> to vector<8x128xbf16>
    %c0_61 = arith.constant 0 : index
    %c0_62 = arith.constant 0 : index
    %116 = vector.load %arg12[%c0_61, %c0_62] : memref<128x384xbf16, #tpu.memory_space<vmem>>, vector<128x384xbf16>
    %cst_63 = arith.constant dense<0.000000e+00> : vector<8x384xf32>
    %117 = tpu.matmul %115, %116, %cst_63 {dimension_numbers = #tpu.dot_dimension_numbers<[1], [0], [0], [1], [0, 0, 1, 1], [], []>} : vector<8x128xbf16>, vector<128x384xbf16>, vector<8x384xf32> -> vector<8x384xf32>
    %c0_64 = arith.constant 0 : index
    %c0_65 = arith.constant 0 : index
    %118 = vector.load %arg13[%c0_64, %c0_65] : memref<1x384xf32, #tpu.memory_space<vmem>>, vector<1x384xf32>
    %119 = vector.broadcast %118 : vector<1x384xf32> to vector<8x384xf32>
    %120 = arith.addf %117, %119 : vector<8x384xf32>
    %c0_66 = arith.constant 0 : index
    %c0_67 = arith.constant 0 : index
    %121 = vector.load %arg19[%c0_66, %c0_67] : memref<8x384xf32, #tpu.memory_space<vmem>>, vector<8x384xf32>
    tpu.vector_store %arg19[%c0_66, %c0_67], %120 {strides = array<i32>} : memref<8x384xf32, #tpu.memory_space<vmem>>, vector<8x384xf32>,
    return
  }
  func.func @transform_0(%arg0: i32) -> (i32, i32) {
    %c0_i32 = arith.constant 0 : i32
    %c0_i32_0 = arith.constant 0 : i32
    return %arg0, %c0_i32 : i32, i32
  }
  func.func @transform_1(%arg0: i32) -> (i32, i32, i32) {
    %c0_i32 = arith.constant 0 : i32
    %c0_i32_0 = arith.constant 0 : i32
    %c0_i32_1 = arith.constant 0 : i32
    return %arg0, %c0_i32, %c0_i32_0 : i32, i32, i32
  }
  func.func @transform_2(%arg0: i32) -> (i32, i32) {
    %c0_i32 = arith.constant 0 : i32
    %c0_i32_0 = arith.constant 0 : i32
    %c0_i32_1 = arith.constant 0 : i32
    return %c0_i32, %c0_i32_0 : i32, i32
  }
  func.func @transform_3(%arg0: i32) -> (i32, i32) {
    %c0_i32 = arith.constant 0 : i32
    %c0_i32_0 = arith.constant 0 : i32
    %c0_i32_1 = arith.constant 0 : i32
    return %c0_i32, %c0_i32_0 : i32, i32
  }
  func.func @transform_4(%arg0: i32) -> (i32, i32) {
    %c0_i32 = arith.constant 0 : i32
    %c0_i32_0 = arith.constant 0 : i32
    %c0_i32_1 = arith.constant 0 : i32
    return %c0_i32, %c0_i32_0 : i32, i32
  }
  func.func @transform_5(%arg0: i32) -> (i32, i32) {
    %c0_i32 = arith.constant 0 : i32
    %c0_i32_0 = arith.constant 0 : i32
    %c0_i32_1 = arith.constant 0 : i32
    return %c0_i32, %c0_i32_0 : i32, i32
  }
  func.func @transform_6(%arg0: i32) -> (i32, i32) {
    %c0_i32 = arith.constant 0 : i32
    %c0_i32_0 = arith.constant 0 : i32
    %c0_i32_1 = arith.constant 0 : i32
    return %c0_i32, %c0_i32_0 : i32, i32
  }
  func.func @transform_7(%arg0: i32) -> (i32, i32) {
    %c0_i32 = arith.constant 0 : i32
    %c0_i32_0 = arith.constant 0 : i32
    %c0_i32_1 = arith.constant 0 : i32
    return %c0_i32, %c0_i32_0 : i32, i32
  }
  func.func @transform_8(%arg0: i32) -> (i32, i32) {
    %c0_i32 = arith.constant 0 : i32
    %c0_i32_0 = arith.constant 0 : i32
    %c0_i32_1 = arith.constant 0 : i32
    return %c0_i32, %c0_i32_0 : i32, i32
  }
  func.func @transform_9(%arg0: i32) -> (i32, i32) {
    %c0_i32 = arith.constant 0 : i32
    %c0_i32_0 = arith.constant 0 : i32
    %c0_i32_1 = arith.constant 0 : i32
    return %c0_i32, %c0_i32_0 : i32, i32
  }
  func.func @transform_10(%arg0: i32) -> (i32, i32) {
    %c0_i32 = arith.constant 0 : i32
    %c0_i32_0 = arith.constant 0 : i32
    %c0_i32_1 = arith.constant 0 : i32
    return %c0_i32, %c0_i32_0 : i32, i32
  }
  func.func @transform_11(%arg0: i32) -> (i32, i32) {
    %c0_i32 = arith.constant 0 : i32
    %c0_i32_0 = arith.constant 0 : i32
    %c0_i32_1 = arith.constant 0 : i32
    return %c0_i32, %c0_i32_0 : i32, i32
  }
  func.func @transform_12(%arg0: i32) -> (i32, i32) {
    %c0_i32 = arith.constant 0 : i32
    %c0_i32_0 = arith.constant 0 : i32
    %c0_i32_1 = arith.constant 0 : i32
    return %c0_i32, %c0_i32_0 : i32, i32
  }
  func.func @transform_13(%arg0: i32) -> (i32, i32) {
    %c0_i32 = arith.constant 0 : i32
    %c0_i32_0 = arith.constant 0 : i32
    return %arg0, %c0_i32 : i32, i32
  }
  func.func @transform_14(%arg0: i32) -> (i32, i32) {
    %c0_i32 = arith.constant 0 : i32
    %c0_i32_0 = arith.constant 0 : i32
    return %arg0, %c0_i32 : i32, i32
  }
  func.func @transform_15(%arg0: i32) -> (i32, i32) {
    %c0_i32 = arith.constant 0 : i32
    %c0_i32_0 = arith.constant 0 : i32
    return %arg0, %c0_i32 : i32, i32
  }
  func.func @transform_16(%arg0: i32) -> (i32, i32) {
    %c0_i32 = arith.constant 0 : i32
    %c0_i32_0 = arith.constant 0 : i32
    return %arg0, %c0_i32 : i32, i32
  }
  func.func @transform_17(%arg0: i32) -> (i32, i32) {
    %c0_i32 = arith.constant 0 : i32
    %c0_i32_0 = arith.constant 0 : i32
    return %arg0, %c0_i32 : i32, i32
  }
  func.func @transform_18(%arg0: i32) -> (i32, i32) {
    %c0_i32 = arith.constant 0 : i32
    %c0_i32_0 = arith.constant 0 : i32
    return %arg0, %c0_i32 : i32, i32
  }
}

</mosaic_0001>

<bundles_post_ra>
// kernel: cqvae_forward.1
= control target key start
LH: loop header
LB: loop body
LE: loop exit
PB: predicated region body
PF: predicated region fallthrough
CT: control target
= control target key end

     0   :  { %s7730_s0 = inlined_call_operand.vmem [shape: f32[16,1024], index: 0, kind: input, shape index: {}]   ;;  %s7731_s1 = inlined_call_operand.vmem [shape: f32[16,8,128], index: 1, kind: input, shape index: {}]   ;;  %s7732_s2 = inlined_call_operand.hbm [shape: bf16[1024,512], index: 2, kind: input, shape index: {}]   ;;  %s7733_s3 = inlined_call_operand.hbm [shape: f32[1,512], index: 3, kind: input, shape index: {}]   ;;  %s7734_s4 = inlined_call_operand.hbm [shape: bf16[512,128], index: 4, kind: input, shape index: {}]   ;;  %s7735_s5 = inlined_call_operand.hbm [shape: f32[1,128], index: 5, kind: input, shape index: {}]   ;;  %s7736_s6 = inlined_call_operand.hbm [shape: f32[128,128], index: 6, kind: input, shape index: {}]   ;;  %s7737_s7 = inlined_call_operand.hbm [shape: bf16[128,384], index: 7, kind: input, shape index: {}]   ;;  %s7738_s8 = inlined_call_operand.hbm [shape: f32[1,384], index: 8, kind: input, shape index: {}]   ;;  %s7739_s9 = inlined_call_operand.hbm [shape: bf16[384,128], index: 9, kind: input, shape index: {}]   ;;  %s7740_s10 = inlined_call_operand.hbm [shape: f32[1,128], index: 10, kind: input, shape index: {}]   ;;  %s7741_s11 = inlined_call_operand.hbm [shape: bf16[128,384], index: 11, kind: input, shape index: {}]   ;;  %s7742_s12 = inlined_call_operand.hbm [shape: f32[1,384], index: 12, kind: input, shape index: {}]   ;;  %s7743_s13 = inlined_call_operand.vmem [shape: f32[16,128], index: 13, kind: output, shape index: {0}]   ;;  %s7744_s14 = inlined_call_operand.vmem [shape: f32[16,128], index: 14, kind: output, shape index: {1}]   ;;  %s7745_s15 = inlined_call_operand.vmem [shape: f32[128,128], index: 15, kind: output, shape index: {2}]   ;;  %s7746_s16 = inlined_call_operand.vmem [shape: f32[128,128], index: 16, kind: output, shape index: {3}]   ;;  %s7747_s17 = inlined_call_operand.vmem [shape: f32[128,384], index: 17, kind: output, shape index: {4}]   ;;  %s7748_s18 = inlined_call_operand.vmem [shape: f32[16,384], index: 18, kind: output, shape index: {5}]  }
   0x1   :  { %7750 = sst [smem:[#allocation26_spill]] %s7730_s0 }
   0x2   :  { %7751 = sst [smem:[#allocation27_spill]] %s7731_s1 }
   0x3   :  { %7752 = sst [smem:[#allocation28_spill]] %s7732_s2 }
   0x4   :  { %7753 = sst [smem:[#allocation29_spill]] %s7733_s3 }
   0x5   :  { %7754 = sst [smem:[#allocation30_spill]] %s7735_s5 }
   0x6   :  { %7755 = sst [smem:[#allocation31_spill]] %s7737_s7 }
   0x7   :  { %7756 = sst [smem:[#allocation32_spill]] %s7739_s9 }
   0x8   :  { %7757 = sst [smem:[#allocation33_spill]] %s7741_s11 }
   0x9   :  { %7758 = sst [smem:[#allocation34_spill]] %s7746_s16 }
   0xa   :  { %7759 = sst [smem:[#allocation35_spill]] %s7748_s18 }
   0xb   :  { %24 = vsyncpa [#allocation3], 0 }
   0xc   :  { %25 = vsyncpa [#allocation5], 0 }
   0xd   :  { %26 = vsyncpa [#allocation8], 0 }
   0xe   :  { %27 = vsyncpa [#allocation11], 0 }
   0xf   :  { %28 = vsyncpa [#allocation14], 0 }
  0x10   :  { %29 = vsyncpa [#allocation17], 0  ;;  %s7217_s27 = smov 0  }
  0x11 LB: > { %7760 = sst [smem:[#allocation25_spill]] %s7101_s27  ;;  %s7226_s0 = sadd.s32 4294967295, %s7101_s27   ;;  %s7101_s27 = sphi %s7217_s27, %s35_s27  }
  0x12   : > { %s7761_s3 = sld [smem:[#allocation29_spill]]  ;;  %p4688_p0 = scmp.ge.s32.totalorder %s7101_s27, 1 }
  0x13   : > { %p479_p1 = scmp.lt.s32.totalorder %s7101_s27, 3  ;;  %p6618_p2 = scmp.eq.s32.totalorder %s7226_s0, 0 }
  0x14   : > { %s7103_s1 = smov [#allocation4]   ;;  %s7763_s5 = sld [smem:[#allocation30_spill]] }
  0x15   : > { %p7231_p3 = pnand %p4688_p0, %p479_p1  ;;  %s507_s20 = sshll.u32 %s7103_s1, 4  ;;  %s508_s20 = int_to_ptr.vmem [resolvable:$true] %s507_s20 }
  0x16   : > { %s7764_s7 = sld [smem:[#allocation31_spill]]  ;;  %s7104_s28 = smov [#allocation7]  }
  0x17   : > { %p6584_p4 = pneg %p7231_p3  ;;  %s533_s29 = sshll.u32 %s7104_s28, 4  ;;  %s534_s29 = int_to_ptr.vmem [resolvable:$true] %s533_s29 }
  0x18   : > { %s505_s30 = sshll.u32 %s7761_s3, 4  ;;  %s7105_s1 = smov [#allocation10]   ;;  %s506_s30 = int_to_ptr.hbm [resolvable:$true] %s505_s30 }
  0x19   : > { %p7245_p5 = pnand %p6618_p2, %p6584_p4  ;;  %s558_s21 = sshll.u32 %s7105_s1, 4  ;;  %s559_s21 = int_to_ptr.vmem [resolvable:$true] %s558_s21 }
  0x1a   : > { %s531_s2 = sshll.u32 %s7763_s5, 4  ;;  %s7106_s22 = smov 192   ;;  %s532_s2 = int_to_ptr.hbm [resolvable:$true] %s531_s2 }
  0x1b   : > { %6590 = dma.hbm_to_vmem [thread:$0]  (!%p7245_p5), %s506_s30, 64, %s508_s20, [#allocation5]  }
  0x1c   : > { %s556_s25 = sshll.u32 %s7764_s7, 4  ;;  %s7107_s23 = smov 12   ;;  %s557_s25 = int_to_ptr.hbm [resolvable:$true] %s556_s25 }
  0x1d   : > { %6596 = dma.hbm_to_vmem [thread:$0]  (!%p7245_p5), %s532_s2, 16, %s534_s29, [#allocation8]  }
  0x1e   : > { %6602 = dma.hbm_to_vmem [thread:$0]  (!%p7245_p5), %s557_s25, 3072, %s559_s21, [#allocation11], %s7106_s22, %s7106_s22, %s7107_s23  }
  0x1f   : > { %s7766_s9 = sld [smem:[#allocation32_spill]]  ;;  %s7108_s28 = smov [#allocation13]  }
  0x20   : > { %s584_s7 = sshll.u32 %s7108_s28, 4  ;;  %s7767_s11 = sld [smem:[#allocation33_spill]]  ;;  %s585_s7 = int_to_ptr.vmem [resolvable:$true] %s584_s7 }
  0x21   : > { %s7109_s29 = smov 64   ;;  %s7110_s1 = smov 4  }
  0x22   : > { %s7111_s25 = smov [#allocation16]   ;;  %s7768_s24 = sld [smem:[#allocation28_spill]] }
  0x23   : > { %s610_s21 = sshll.u32 %s7111_s25, 4  ;;  %s7112_s28 = smov [#allocation2]   ;;  %s611_s21 = int_to_ptr.vmem [resolvable:$true] %s610_s21 }
  0x24   : > { %s492_s30 = sshll.u32 %s7112_s28, 4  ;;  %s516_s16 = sshll.u32 %s7734_s4, 4  ;;  %s493_s30 = int_to_ptr.vmem [resolvable:$true] %s492_s30  ;;  %s517_s16 = int_to_ptr.hbm [resolvable:$true] %s516_s16 }
  0x25   : > { %s582_s5 = sshll.u32 %s7766_s9, 4  ;;  %s7115_s27 = smov [#allocation6]   ;;  %s583_s5 = int_to_ptr.hbm [resolvable:$true] %s582_s5 }
  0x26   : > { %s608_s2 = sshll.u32 %s7767_s11, 4  ;;  %s518_s25 = sshll.u32 %s7115_s27, 4  ;;  %s609_s2 = int_to_ptr.hbm [resolvable:$true] %s608_s2  ;;  %s519_s25 = int_to_ptr.vmem [resolvable:$true] %s518_s25 }
  0x27   : > { %6608 = dma.hbm_to_vmem [thread:$0]  (!%p7245_p5), %s583_s5, 3072, %s585_s7, [#allocation14], %s7109_s29, %s7109_s29, %s7110_s1  }
  0x28   : > { %s490_s9 = sshll.u32 %s7768_s24, 4  ;;  %s7113_s5 = smov 256   ;;  %s491_s9 = int_to_ptr.hbm [resolvable:$true] %s490_s9 }
  0x29   : > { %6614 = dma.hbm_to_vmem [thread:$0]  (!%p7245_p5), %s609_s2, 3072, %s611_s21, [#allocation17], %s7106_s22, %s7106_s22, %s7107_s23  }
  0x2a   : > { %s7114_s7 = smov 16   ;;  %s542_s18 = sshll.u32 %s7736_s6, 4  ;;  %s543_s18 = int_to_ptr.hbm [resolvable:$true] %s542_s18 }
  0x2b   : > { %6587 = dma.hbm_to_vmem [thread:$0]  (!%p7245_p5), %s491_s9, 32768, %s493_s30, [#allocation3], %s7113_s5, %s7113_s5, %s7114_s7  }
  0x2c   : > { %6593 = dma.hbm_to_vmem [thread:$0]  (!%p7245_p5), %s517_s16, 4096, %s519_s25, [#allocation5], %s7109_s29, %s7109_s29, %s7110_s1  }
  0x2d   : > { %s7116_s22 = smov [#allocation9]   ;;  %s571_s21 = sshll.u32 %s7738_s8, 4  ;;  %s572_s21 = int_to_ptr.hbm [resolvable:$true] %s571_s21 }
  0x2e   : > { %s544_s11 = sshll.u32 %s7116_s22, 4  ;;  %s7117_s9 = smov 128   ;;  %s545_s11 = int_to_ptr.vmem [resolvable:$true] %s544_s11 }
  0x2f   : > { %s7118_s28 = smov 8   ;;  %s7119_s30 = smov [#allocation12]  }
  0x30   : > { %6599 = dma.hbm_to_vmem [thread:$0]  (!%p7245_p5), %s543_s18, 2048, %s545_s11, [#allocation8], %s7117_s9, %s7117_s9, %s7118_s28  }
  0x31   : > { %s573_s20 = sshll.u32 %s7119_s30, 4  ;;  %s597_s16 = sshll.u32 %s7740_s10, 4  ;;  %s574_s20 = int_to_ptr.vmem [resolvable:$true] %s573_s20  ;;  %s598_s16 = int_to_ptr.hbm [resolvable:$true] %s597_s16 }
  0x32   : > { %6605 = dma.hbm_to_vmem [thread:$0]  (!%p7245_p5), %s572_s21, 48, %s574_s20, [#allocation11]  }
  0x33   : > { %s623_s27 = sshll.u32 %s7742_s12, 4  ;;  %s7120_s25 = smov [#allocation15]   ;;  %s624_s27 = int_to_ptr.hbm [resolvable:$true] %s623_s27 }
  0x34   : > { %s599_s3 = sshll.u32 %s7120_s25, 4  ;;  %s7121_s18 = smov [#allocation18]   ;;  %s600_s3 = int_to_ptr.vmem [resolvable:$true] %s599_s3 }
  0x35   : > { %6611 = dma.hbm_to_vmem [thread:$0]  (!%p7245_p5), %s598_s16, 16, %s600_s3, [#allocation14]  }
  0x36   : > { %s625_s24 = sshll.u32 %s7121_s18, 4  ;;  %655 = sbr.rel (%p7231_p3) target bundleno = 1263 (0x4ef), region = 72  ;;  %s626_s24 = int_to_ptr.vmem [resolvable:$true] %s625_s24 }
  0x37   : > { %6617 = dma.hbm_to_vmem [thread:$0]  (!%p7245_p5), %s624_s27, 48, %s626_s24, [#allocation17]  }
  0x3b   : > { %7076 = dma.done.wait (%p6618_p2), [#allocation3], 32768  }
  0x3c   : > { %7078 = vsyncadd (%p6618_p2), [#allocation3], 4294934528 }
  0x3d   : > { %7080 = dma.done.wait (%p6618_p2), [#allocation5], 4160  }
  0x3e   : > { %7082 = vsyncadd (%p6618_p2), [#allocation5], 4294963136 }
  0x3f   : > { %7084 = dma.done.wait (%p6618_p2), [#allocation8], 2064  }
  0x40   : > { %7086 = vsyncadd (%p6618_p2), [#allocation8], 4294965232 }
  0x41   : > { %7088 = dma.done.wait (%p6618_p2), [#allocation11], 3120  }
  0x42   : > { %7090 = vsyncadd (%p6618_p2), [#allocation11], 4294964176 }
  0x43   : > { %7092 = dma.done.wait (%p6618_p2), [#allocation14], 3088  }
  0x44   : > { %7094 = vsyncadd (%p6618_p2), [#allocation14], 4294964208 }
  0x45   : > { %7096 = dma.done.wait (%p6618_p2), [#allocation17], 3120  }
  0x46   : > { %7098 = vsyncadd (%p6618_p2), [#allocation17], 4294964176  ;;  %v4840_v0 = vld [vmem:[#allocation2 + $0xe0] sm:$0xf]  ;;  %v6208_v1 = vld [vmem:[#allocation2 + $0xec] sm:$0xf0] }
  0x47   : > { %v4968_v2 = vld [vmem:[#allocation2 + $0x1e0] sm:$0xf]  ;;  %v4841_v3 = vor.u32 %v6208_v1, %v4840_v0  ;;  %v6240_v4 = vld [vmem:[#allocation2 + $0x1ec] sm:$0xf0]  ;;  %p789_p6 = scmp.lt.s32.totalorder %s7226_s0, 1  ;;  %s7769_s23 = sld [smem:[#allocation26_spill]] }
  0x48   : > { %v5096_v5 = vld [vmem:[#allocation2 + $0x2e0] sm:$0xf]  ;;  %v6272_v6 = vld [vmem:[#allocation2 + $0x2ec] sm:$0xf0]  ;;  %v4969_v7 = vor.u32 %v6240_v4, %v4968_v2  ;;  %s4715_s21 = sshll.u32 %s7226_s0, 3  ;;  %s7770_s20 = sld [smem:[#allocation27_spill]] }
  0x49   : > { %v5097_v8 = vor.u32 %v6272_v6, %v5096_v5  ;;  %v5224_v9 = vld [vmem:[#allocation2 + $0x3e0] sm:$0xf]  ;;  %v6304_v10 = vld [vmem:[#allocation2 + $0x3ec] sm:$0xf0]  ;;  %2394 = vmatpush.bf16.msra.mxu0 %v4841_v3  ;;  %s7325_s19 = scalar_select %p789_p6, %s7226_s0, 1 }
  0x4a   : > { %v4824_v11 = vld [vmem:[#allocation2 + $0xc0] sm:$0xf]  ;;  %v5225_v12 = vor.u32 %v6304_v10, %v5224_v9  ;;  %v6204_v13 = vld [vmem:[#allocation2 + $0xcc] sm:$0xf0]  ;;  %2407 = vmatpush.bf16.msra.mxu1 %v4969_v7  ;;  %p795_p7 = scmp.lt.s32.totalorder %s4715_s21, 15  ;;  %s7775_s30 = sld [smem:[#allocation35_spill]] }
  0x4b   : > { %v4952_v14 = vld [vmem:[#allocation2 + $0x1c0] sm:$0xf]  ;;  %v6236_v15 = vld [vmem:[#allocation2 + $0x1cc] sm:$0xf0]  ;;  %2420 = vmatpush.bf16.msra.mxu2 %v5097_v8  ;;  %v4825_v16 = vor.u32 %v6204_v13, %v4824_v11  ;;  %s6177_s26 = sshll.u32 %s7325_s19, 6  ;;  %s4717_s0 = sshll.u32 %s7325_s19, 3 }
  0x4c   : > { %v4953_v17 = vor.u32 %v6236_v15, %v4952_v14  ;;  %v5080_v18 = vld [vmem:[#allocation2 + $0x2c0] sm:$0xf]  ;;  %v6268_v19 = vld [vmem:[#allocation2 + $0x2cc] sm:$0xf0]  ;;  %2433 = vmatpush.bf16.msra.mxu3 %v5225_v12  ;;  %s7779_s21 = smov (!%p795_p7, %s4715_s21), 15  ;;  %s803_s29 = scalar_lea.vmem %s7743_s13, %s4717_s0 }
  0x4d   : > { %v5208_v20 = vld [vmem:[#allocation2 + $0x3c0] sm:$0xf]  ;;  %v5081_v21 = vor.u32 %v6268_v19, %v5080_v18  ;;  %v6300_v22 = vld [vmem:[#allocation2 + $0x3cc] sm:$0xf0]  ;;  %2395 = vmatpush.bf16.msra.mxu0 %v4825_v16  ;;  %s7331_s2 = scalar_lea.vmem %s7769_s23, %s6177_s26  ;;  %s7418_s9 = sshll.u32 %s7779_s21, 3 }
  0x4e   : > { %v4808_v23 = vld [vmem:[#allocation2 + $0xa0] sm:$0xf]  ;;  %v6200_v24 = vld [vmem:[#allocation2 + $0xac] sm:$0xf0]  ;;  %v5209_v25 = vor.u32 %v6300_v22, %v5208_v20  ;;  %2408 = vmatpush.bf16.msra.mxu1 %v4953_v17  ;;  %s7424_s5 = scalar_lea.vmem %s7770_s20, %s7418_s9  ;;  %s7554_s25 = scalar_lea.vmem %s7745_s15, %s7418_s9 }
  0x4f   : > { %v4936_v26 = vld [vmem:[#allocation2 + $0x1a0] sm:$0xf]  ;;  %v6232_v27 = vld [vmem:[#allocation2 + $0x1ac] sm:$0xf0]  ;;  %v4809_v29 = vor.u32 %v6200_v24, %v4808_v23  ;;  %2421 = vmatpush.bf16.msra.mxu2 %v5081_v21  ;;  %s807_s24 = scalar_lea.vmem %s7744_s14, %s4717_s0  ;;  %s6538_s26 = smul.u32 24, %s7779_s21 }
  0x50   : > { %v5064_v28 = vld [vmem:[#allocation2 + $0x2a0] sm:$0xf]  ;;  %v6264_v30 = vld [vmem:[#allocation2 + $0x2ac] sm:$0xf0]  ;;  %v4937_v33 = vor.u32 %v6232_v27, %v4936_v26  ;;  %2434 = vmatpush.bf16.msra.mxu3 %v5209_v25  ;;  %s7776_s0 = sld [smem:[#allocation34_spill]] }
  0x51   : > { %v5192_v31 = vld [vmem:[#allocation2 + $0x3a0] sm:$0xf]  ;;  %v6296_v32 = vld [vmem:[#allocation2 + $0x3ac] sm:$0xf0]  ;;  %v5065_v34 = vor.u32 %v6264_v30, %v5064_v28  ;;  %2396 = vmatpush.bf16.msra.mxu0 %v4809_v29  ;;  %s7644_s23 = scalar_lea.vmem %s7747_s17, %s6538_s26 }
  0x52   : > { %v4792_v35 = vld [vmem:[#allocation2 + $0x80] sm:$0xf]  ;;  %v6196_v36 = vld [vmem:[#allocation2 + $0x8c] sm:$0xf0]  ;;  %v5193_v38 = vor.u32 %v6296_v32, %v5192_v31  ;;  %2409 = vmatpush.bf16.msra.mxu1 %v4937_v33 }
  0x53   : > { %v4920_v37 = vld [vmem:[#allocation2 + $0x180] sm:$0xf]  ;;  %v6228_v39 = vld [vmem:[#allocation2 + $0x18c] sm:$0xf0]  ;;  %v4793_v44 = vor.u32 %v6196_v36, %v4792_v35  ;;  %2422 = vmatpush.bf16.msra.mxu2 %v5065_v34 }
  0x54   : > { %v5048_v40 = vld [vmem:[#allocation2 + $0x280] sm:$0xf]  ;;  %v6260_v41 = vld [vmem:[#allocation2 + $0x28c] sm:$0xf0]  ;;  %v4921_v45 = vor.u32 %v6228_v39, %v4920_v37  ;;  %2435 = vmatpush.bf16.msra.mxu3 %v5193_v38 }
  0x55   : > { %v5176_v42 = vld [vmem:[#allocation2 + $0x380] sm:$0xf]  ;;  %v6292_v43 = vld [vmem:[#allocation2 + $0x38c] sm:$0xf0]  ;;  %v5049_v46 = vor.u32 %v6260_v41, %v5048_v40  ;;  %2397 = vmatpush.bf16.msra.mxu0 %v4793_v44 }
  0x56   : > { %v4776_v47 = vld [vmem:[#allocation2 + $0x60] sm:$0xf]  ;;  %v6192_v48 = vld [vmem:[#allocation2 + $0x6c] sm:$0xf0]  ;;  %v5177_v50 = vor.u32 %v6292_v43, %v5176_v42  ;;  %2410 = vmatpush.bf16.msra.mxu1 %v4921_v45  ;;  %s7715_s7 = scalar_lea.vmem %s7776_s0, %s7418_s9 }
  0x57   : > { %v4904_v49 = vld [vmem:[#allocation2 + $0x160] sm:$0xf]  ;;  %v6224_v51 = vld [vmem:[#allocation2 + $0x16c] sm:$0xf0]  ;;  %v4777_v56 = vor.u32 %v6192_v48, %v4776_v47  ;;  %2423 = vmatpush.bf16.msra.mxu2 %v5049_v46 }
  0x58   : > { %v5032_v52 = vld [vmem:[#allocation2 + $0x260] sm:$0xf]  ;;  %v6256_v53 = vld [vmem:[#allocation2 + $0x26c] sm:$0xf0]  ;;  %v4905_v57 = vor.u32 %v6224_v51, %v4904_v49  ;;  %2436 = vmatpush.bf16.msra.mxu3 %v5177_v50 }
  0x59   : > { %v5160_v54 = vld [vmem:[#allocation2 + $0x360] sm:$0xf]  ;;  %v6288_v55 = vld [vmem:[#allocation2 + $0x36c] sm:$0xf0]  ;;  %v5033_v58 = vor.u32 %v6256_v53, %v5032_v52  ;;  %2398 = vmatpush.bf16.msra.mxu0 %v4777_v56 }
  0x5a   : > { %v4760_v59 = vld [vmem:[#allocation2 + $0x40] sm:$0xf]  ;;  %v6188_v60 = vld [vmem:[#allocation2 + $0x4c] sm:$0xf0]  ;;  %v5161_v62 = vor.u32 %v6288_v55, %v5160_v54  ;;  %2411 = vmatpush.bf16.msra.mxu1 %v4905_v57 }
  0x5b   : > { %v4888_v61 = vld [vmem:[#allocation2 + $0x140] sm:$0xf]  ;;  %v6220_v63 = vld [vmem:[#allocation2 + $0x14c] sm:$0xf0]  ;;  %v4761_v4 = vor.u32 %v6188_v60, %v4760_v59  ;;  %2424 = vmatpush.bf16.msra.mxu2 %v5033_v58 }
  0x5c   : > { %v5016_v0 = vld [vmem:[#allocation2 + $0x240] sm:$0xf]  ;;  %v6252_v1 = vld [vmem:[#allocation2 + $0x24c] sm:$0xf0]  ;;  %v4889_v5 = vor.u32 %v6220_v63, %v4888_v61  ;;  %2437 = vmatpush.bf16.msra.mxu3 %v5161_v62 }
  0x5d   : > { %v5144_v2 = vld [vmem:[#allocation2 + $0x340] sm:$0xf]  ;;  %v6284_v3 = vld [vmem:[#allocation2 + $0x34c] sm:$0xf0]  ;;  %v5017_v6 = vor.u32 %v6252_v1, %v5016_v0  ;;  %2399 = vmatpush.bf16.msra.mxu0 %v4761_v4 }
  0x5e   : > { %v4744_v7 = vld [vmem:[#allocation2 + $0x20] sm:$0xf]  ;;  %v6184_v8 = vld [vmem:[#allocation2 + $0x2c] sm:$0xf0]  ;;  %v5145_v10 = vor.u32 %v6284_v3, %v5144_v2  ;;  %2412 = vmatpush.bf16.msra.mxu1 %v4889_v5 }
  0x5f   : > { %v4872_v9 = vld [vmem:[#allocation2 + $0x120] sm:$0xf]  ;;  %v6216_v11 = vld [vmem:[#allocation2 + $0x12c] sm:$0xf0]  ;;  %v4745_v16 = vor.u32 %v6184_v8, %v4744_v7  ;;  %2425 = vmatpush.bf16.msra.mxu2 %v5017_v6 }
  0x60   : > { %v5000_v12 = vld [vmem:[#allocation2 + $0x220] sm:$0xf]  ;;  %v6248_v13 = vld [vmem:[#allocation2 + $0x22c] sm:$0xf0]  ;;  %v4873_v19 = vor.u32 %v6216_v11, %v4872_v9  ;;  %2438 = vmatpush.bf16.msra.mxu3 %v5145_v10  ;;  %v835_v10 = vld [vmem:[%s7331_s2 + $0x18] sm:$0xff] }
  0x61   : > { %v5128_v14 = vld [vmem:[#allocation2 + $0x320] sm:$0xf]  ;;  %v6280_v15 = vld [vmem:[#allocation2 + $0x32c] sm:$0xf0]  ;;  %v5001_v20 = vor.u32 %v6248_v13, %v5000_v12  ;;  %2400 = vmatpush.bf16.msra.mxu0 %v4745_v16 }
  0x62   : > { %v4728_v17 = vld [vmem:[#allocation2] sm:$0xf]  ;;  %v6180_v18 = vld [vmem:[#allocation2 + $0xc] sm:$0xf0]  ;;  %v5129_v24 = vor.u32 %v6280_v15, %v5128_v14  ;;  %2413 = vmatpush.bf16.msra.mxu1 %v4873_v19  ;;  %v7340_v15 = vpack.c.bf16 %v835_v10, %v835_v10  ;;  %v833_v19 = vld [vmem:[%s7331_s2 + $0x8] sm:$0xff] }
  0x63   : > { %v4856_v21 = vld [vmem:[#allocation2 + $0x100] sm:$0xf]  ;;  %v6212_v22 = vld [vmem:[#allocation2 + $0x10c] sm:$0xf0]  ;;  %v4729_v31 = vor.u32 %v6180_v18, %v4728_v17  ;;  %2426 = vmatpush.bf16.msra.mxu2 %v5001_v20  ;;  %v4970_v10 = vld [vmem:[#allocation2 + $0x1f0] sm:$0xf0] }
  0x64   : > { %v4984_v23 = vld [vmem:[#allocation2 + $0x200] sm:$0xf]  ;;  %v6244_v25 = vld [vmem:[#allocation2 + $0x20c] sm:$0xf0]  ;;  %v4857_v35 = vor.u32 %v6212_v22, %v4856_v21  ;;  %2439 = vmatpush.bf16.msra.mxu3 %v5129_v24 }
  0x65   : > { %v5112_v26 = vld [vmem:[#allocation2 + $0x300] sm:$0xf]  ;;  %v6276_v27 = vld [vmem:[#allocation2 + $0x30c] sm:$0xf0]  ;;  %v4985_v36 = vor.u32 %v6244_v25, %v4984_v23  ;;  %2401 = vmatpush.bf16.msra.mxu0 %v4729_v31  ;;  %v7346_v25 = vpack.c.bf16 %v833_v19, %v833_v19 }
  0x66   : > { %v5352_v28 = vld [vmem:[#allocation2 + $0x4e0] sm:$0xf]  ;;  %v6336_v29 = vld [vmem:[#allocation2 + $0x4ec] sm:$0xf0]  ;;  %v5113_v39 = vor.u32 %v6276_v27, %v5112_v26  ;;  %2414 = vmatpush.bf16.msra.mxu1 %v4857_v35 }
  0x67   : > { %v5480_v30 = vld [vmem:[#allocation2 + $0x5e0] sm:$0xf]  ;;  %v6368_v32 = vld [vmem:[#allocation2 + $0x5ec] sm:$0xf0]  ;;  %v5353_v40 = vor.u32 %v6336_v29, %v5352_v28  ;;  %2427 = vmatpush.bf16.msra.mxu2 %v4985_v36 }
  0x68   : > { %v5608_v33 = vld [vmem:[#allocation2 + $0x6e0] sm:$0xf]  ;;  %v6400_v34 = vld [vmem:[#allocation2 + $0x6ec] sm:$0xf0]  ;;  %v5481_v41 = vor.u32 %v6368_v32, %v5480_v30  ;;  %2440 = vmatpush.bf16.msra.mxu3 %v5113_v39 }
  0x69   : > { %v5736_v37 = vld [vmem:[#allocation2 + $0x7e0] sm:$0xf]  ;;  %v6432_v38 = vld [vmem:[#allocation2 + $0x7ec] sm:$0xf0]  ;;  %v5609_v42 = vor.u32 %v6400_v34, %v5608_v33  ;;  %2446 = vmatpush.bf16.msrb.mxu0 %v5353_v40  ;;  %2415 = vmatmul.bf16.vlgmr.msra.gmra.mxu1 %v7346_v25 }
  0x6a   : > { %v5336_v43 = vld [vmem:[#allocation2 + $0x4c0] sm:$0xf]  ;;  %v6332_v44 = vld [vmem:[#allocation2 + $0x4cc] sm:$0xf0]  ;;  %v5737_v46 = vor.u32 %v6432_v38, %v5736_v37  ;;  %2459 = vmatpush.bf16.msrb.mxu1 %v5481_v41 }
  0x6b   : > { %v5464_v45 = vld [vmem:[#allocation2 + $0x5c0] sm:$0xf]  ;;  %v6364_v47 = vld [vmem:[#allocation2 + $0x5cc] sm:$0xf0]  ;;  %v5337_v52 = vor.u32 %v6332_v44, %v5336_v43  ;;  %2472 = vmatpush.bf16.msrb.mxu2 %v5609_v42  ;;  %2441 = vmatmul.bf16.vlgmr.msra.gmra.mxu3 %v7340_v15 }
  0x6c   : > { %v5592_v48 = vld [vmem:[#allocation2 + $0x6c0] sm:$0xf]  ;;  %v6396_v49 = vld [vmem:[#allocation2 + $0x6cc] sm:$0xf0]  ;;  %v5465_v54 = vor.u32 %v6364_v47, %v5464_v45  ;;  %2485 = vmatpush.bf16.msrb.mxu3 %v5737_v46 }
  0x6d   : > { %v5720_v50 = vld [vmem:[#allocation2 + $0x7c0] sm:$0xf]  ;;  %v6428_v51 = vld [vmem:[#allocation2 + $0x7cc] sm:$0xf0]  ;;  %v5593_v55 = vor.u32 %v6396_v49, %v5592_v48  ;;  %2447 = vmatpush.bf16.msrb.mxu0 %v5337_v52 }
  0x6e   : > { %v5320_v53 = vld [vmem:[#allocation2 + $0x4a0] sm:$0xf]  ;;  %v6328_v56 = vld [vmem:[#allocation2 + $0x4ac] sm:$0xf0]  ;;  %v5721_v59 = vor.u32 %v6428_v51, %v5720_v50  ;;  %2460 = vmatpush.bf16.msrb.mxu1 %v5465_v54 }
  0x6f   : > { %v5448_v57 = vld [vmem:[#allocation2 + $0x5a0] sm:$0xf]  ;;  %v6360_v58 = vld [vmem:[#allocation2 + $0x5ac] sm:$0xf0]  ;;  %v5321_v0 = vor.u32 %v6328_v56, %v5320_v53  ;;  %2473 = vmatpush.bf16.msrb.mxu2 %v5593_v55 }
  0x70   : > { %v5576_v60 = vld [vmem:[#allocation2 + $0x6a0] sm:$0xf]  ;;  %v6392_v61 = vld [vmem:[#allocation2 + $0x6ac] sm:$0xf0]  ;;  %v5449_v1 = vor.u32 %v6360_v58, %v5448_v57  ;;  %2486 = vmatpush.bf16.msrb.mxu3 %v5721_v59 }
  0x71   : > { %v5704_v62 = vld [vmem:[#allocation2 + $0x7a0] sm:$0xf]  ;;  %v6424_v63 = vld [vmem:[#allocation2 + $0x7ac] sm:$0xf0]  ;;  %v5577_v5 = vor.u32 %v6392_v61, %v5576_v60  ;;  %2448 = vmatpush.bf16.msrb.mxu0 %v5321_v0 }
  0x72   : > { %v5304_v2 = vld [vmem:[#allocation2 + $0x480] sm:$0xf]  ;;  %v834_v3 = vld [vmem:[%s7331_s2 + $0x10] sm:$0xff]  ;;  %v5705_v11 = vor.u32 %v6424_v63, %v5704_v62  ;;  %2461 = vmatpush.bf16.msrb.mxu1 %v5449_v1 }
  0x73   : > { %v832_v4 = vld [vmem:[%s7331_s2] sm:$0xff]  ;;  %v6324_v6 = vld [vmem:[#allocation2 + $0x48c] sm:$0xf0]  ;;  %v7335_v8 = vpack.c.bf16 %v834_v3, %v834_v3  ;;  %2474 = vmatpush.bf16.msrb.mxu2 %v5577_v5  ;;  %v4842_v5 = vld [vmem:[#allocation2 + $0xf0] sm:$0xf0] }
  0x74   : > { %v5432_v7 = vld [vmem:[#allocation2 + $0x580] sm:$0xf]  ;;  %v7337_v9 = vpack.c.bf16 %v832_v4, %v832_v4  ;;  %v6356_v12 = vld [vmem:[#allocation2 + $0x58c] sm:$0xf0]  ;;  %v5305_v18 = vor.u32 %v6324_v6, %v5304_v2  ;;  %2487 = vmatpush.bf16.msrb.mxu3 %v5705_v11  ;;  %v6206_v4 = vld [vmem:[#allocation2 + $0xe4] sm:$0xf] }
  0x75   : > { %v5560_v13 = vld [vmem:[#allocation2 + $0x680] sm:$0xf]  ;;  %v6388_v14 = vld [vmem:[#allocation2 + $0x68c] sm:$0xf0]  ;;  %2428 = vmatmul.bf16.vlgmr.msra.gmra.mxu2 %v7335_v8  ;;  %v5433_v20 = vor.u32 %v6356_v12, %v5432_v7  ;;  %v6238_v6 = vld [vmem:[#allocation2 + $0x1e4] sm:$0xf] }
  0x76   : > { %v5688_v16 = vld [vmem:[#allocation2 + $0x780] sm:$0xf]  ;;  %v6420_v17 = vld [vmem:[#allocation2 + $0x78c] sm:$0xf0]  ;;  %2402 = vmatmul.bf16.vlgmr.msra.gmra.mxu0 %v7337_v9  ;;  %v5561_v21 = vor.u32 %v6388_v14, %v5560_v13  ;;  %v6270_v11 = vld [vmem:[#allocation2 + $0x2e4] sm:$0xf] }
  0x77   : > { %v5288_v22 = vld [vmem:[#allocation2 + $0x460] sm:$0xf]  ;;  %v6320_v23 = vld [vmem:[#allocation2 + $0x46c] sm:$0xf0]  ;;  %v5689_v26 = vor.u32 %v6420_v17, %v5688_v16  ;;  %2449 = vmatpush.bf16.msrb.mxu0 %v5305_v18  ;;  %2462 = vmatpush.bf16.msrb.mxu1 %v5433_v20  ;;  %v5098_v12 = vld [vmem:[#allocation2 + $0x2f0] sm:$0xf0]  ;;  %v4845_v20 = vor.u32 %v6206_v4, %v4842_v5 }
  0x78   : > { %v5416_v24 = vld [vmem:[#allocation2 + $0x560] sm:$0xf]  ;;  %v6352_v27 = vld [vmem:[#allocation2 + $0x56c] sm:$0xf0]  ;;  %v5289_v32 = vor.u32 %v6320_v23, %v5288_v22  ;;  %2475 = vmatpush.bf16.msrb.mxu2 %v5561_v21  ;;  %v6302_v16 = vld [vmem:[#allocation2 + $0x3e4] sm:$0xf] }
  0x79   : > { %v5544_v28 = vld [vmem:[#allocation2 + $0x660] sm:$0xf]  ;;  %v6384_v29 = vld [vmem:[#allocation2 + $0x66c] sm:$0xf0]  ;;  %v5417_v33 = vor.u32 %v6352_v27, %v5416_v24  ;;  %2488 = vmatpush.bf16.msrb.mxu3 %v5689_v26  ;;  %v5226_v17 = vld [vmem:[#allocation2 + $0x3f0] sm:$0xf0]  ;;  %v4973_v24 = vor.u32 %v6238_v6, %v4970_v10  ;;  %v5101_v26 = vor.u32 %v6270_v11, %v5098_v12 }
  0x7a   : > { %v5672_v30 = vld [vmem:[#allocation2 + $0x760] sm:$0xf]  ;;  %v6416_v31 = vld [vmem:[#allocation2 + $0x76c] sm:$0xf0]  ;;  %v5545_v34 = vor.u32 %v6384_v29, %v5544_v28  ;;  %v6202_v21 = vld [vmem:[#allocation2 + $0xc4] sm:$0xf] }
  0x7b   : > { %v5272_v35 = vld [vmem:[#allocation2 + $0x440] sm:$0xf]  ;;  %v6316_v36 = vld [vmem:[#allocation2 + $0x44c] sm:$0xf0]  ;;  %v5673_v38 = vor.u32 %v6416_v31, %v5672_v30  ;;  %2450 = vmatpush.bf16.msrb.mxu0 %v5289_v32  ;;  %2463 = vmatpush.bf16.msrb.mxu1 %v5417_v33  ;;  %v839_v23 = vld [vmem:[%s7331_s2 + $0x38] sm:$0xff]  ;;  %v5229_v30 = vor.u32 %v6302_v16, %v5226_v17 }
  0x7c   : > { %v5400_v37 = vld [vmem:[#allocation2 + $0x540] sm:$0xf]  ;;  %v6348_v39 = vld [vmem:[#allocation2 + $0x54c] sm:$0xf0]  ;;  %v5273_v44 = vor.u32 %v6316_v36, %v5272_v35  ;;  %2476 = vmatpush.bf16.msrb.mxu2 %v5545_v34  ;;  %v4826_v27 = vld [vmem:[#allocation2 + $0xd0] sm:$0xf0] }
  0x7d   : > { %v5528_v40 = vld [vmem:[#allocation2 + $0x640] sm:$0xf]  ;;  %v6380_v41 = vld [vmem:[#allocation2 + $0x64c] sm:$0xf0]  ;;  %v5401_v45 = vor.u32 %v6348_v39, %v5400_v37  ;;  %2489 = vmatpush.bf16.msrb.mxu3 %v5673_v38  ;;  %v6234_v28 = vld [vmem:[#allocation2 + $0x1c4] sm:$0xf]  ;;  %v7357_v38 = vpack.c.bf16 %v839_v23, %v839_v23  ;;  %v4829_v39 = vor.u32 %v6202_v21, %v4826_v27 }
  0x7e   : > { %v5656_v42 = vld [vmem:[#allocation2 + $0x740] sm:$0xf]  ;;  %v6412_v43 = vld [vmem:[#allocation2 + $0x74c] sm:$0xf0]  ;;  %v5529_v46 = vor.u32 %v6380_v41, %v5528_v40  ;;  %v837_v29 = vld [vmem:[%s7331_s2 + $0x28] sm:$0xff] }
  0x7f   : > { %v5256_v47 = vld [vmem:[#allocation2 + $0x420] sm:$0xf]  ;;  %v6312_v48 = vld [vmem:[#allocation2 + $0x42c] sm:$0xf0]  ;;  %v5657_v50 = vor.u32 %v6412_v43, %v5656_v42  ;;  %2451 = vmatpush.bf16.msrb.mxu0 %v5273_v44  ;;  %2464 = vmatpush.bf16.msrb.mxu1 %v5401_v45  ;;  %v4954_v31 = vld [vmem:[#allocation2 + $0x1d0] sm:$0xf0]  ;;  %v7359_v40 = vpack.c.bf16 %v837_v29, %v837_v29 }
  0x80   : > { %v5384_v49 = vld [vmem:[#allocation2 + $0x520] sm:$0xf]  ;;  %v6344_v51 = vld [vmem:[#allocation2 + $0x52c] sm:$0xf0]  ;;  %v5257_v56 = vor.u32 %v6312_v48, %v5256_v47  ;;  %2477 = vmatpush.bf16.msrb.mxu2 %v5529_v46  ;;  %v6266_v32 = vld [vmem:[#allocation2 + $0x2c4] sm:$0xf]  ;;  %v4957_v41 = vor.u32 %v6234_v28, %v4954_v31 }
  0x81   : > { %v5512_v52 = vld [vmem:[#allocation2 + $0x620] sm:$0xf]  ;;  %v6376_v53 = vld [vmem:[#allocation2 + $0x62c] sm:$0xf0]  ;;  %v5385_v59 = vor.u32 %v6344_v51, %v5384_v49  ;;  %2490 = vmatpush.bf16.msrb.mxu3 %v5657_v50  ;;  %v5082_v33 = vld [vmem:[#allocation2 + $0x2d0] sm:$0xf0] }
  0x82   : > { %v5640_v54 = vld [vmem:[#allocation2 + $0x720] sm:$0xf]  ;;  %v6408_v55 = vld [vmem:[#allocation2 + $0x72c] sm:$0xf0]  ;;  %v5513_v60 = vor.u32 %v6376_v53, %v5512_v52  ;;  %v6298_v35 = vld [vmem:[#allocation2 + $0x3c4] sm:$0xf]  ;;  %v5085_v42 = vor.u32 %v6266_v32, %v5082_v33 }
  0x83   : > { %v5240_v57 = vld [vmem:[#allocation2 + $0x400] sm:$0xf]  ;;  %v6308_v58 = vld [vmem:[#allocation2 + $0x40c] sm:$0xf0]  ;;  %v5641_v0 = vor.u32 %v6408_v55, %v5640_v54  ;;  %2452 = vmatpush.bf16.msrb.mxu0 %v5257_v56  ;;  %2465 = vmatpush.bf16.msrb.mxu1 %v5385_v59  ;;  %v5210_v36 = vld [vmem:[#allocation2 + $0x3d0] sm:$0xf0] }
  0x84   : > { %v5368_v61 = vld [vmem:[#allocation2 + $0x500] sm:$0xf]  ;;  %v6340_v62 = vld [vmem:[#allocation2 + $0x50c] sm:$0xf0]  ;;  %v5241_v7 = vor.u32 %v6308_v58, %v5240_v57  ;;  %2478 = vmatpush.bf16.msrb.mxu2 %v5513_v60  ;;  %v6198_v43 = vld [vmem:[#allocation2 + $0xa4] sm:$0xf]  ;;  %v5213_v46 = vor.u32 %v6298_v35, %v5210_v36 }
  0x85   : > { %v5496_v63 = vld [vmem:[#allocation2 + $0x600] sm:$0xf]  ;;  %v6372_v1 = vld [vmem:[#allocation2 + $0x60c] sm:$0xf0]  ;;  %v5369_v13 = vor.u32 %v6340_v62, %v5368_v61  ;;  %2491 = vmatpush.bf16.msrb.mxu3 %v5641_v0  ;;  %v4810_v44 = vld [vmem:[#allocation2 + $0xb0] sm:$0xf0] }
  0x86   : > { %v5624_v2 = vld [vmem:[#allocation2 + $0x700] sm:$0xf]  ;;  %v6404_v3 = vld [vmem:[#allocation2 + $0x70c] sm:$0xf0]  ;;  %v5497_v14 = vor.u32 %v6372_v1, %v5496_v63  ;;  %v6230_v45 = vld [vmem:[#allocation2 + $0x1a4] sm:$0xf]  ;;  %v4813_v52 = vor.u32 %v6198_v43, %v4810_v44 }
  0x87   : > { %v838_v18 = vld [vmem:[%s7331_s2 + $0x30] sm:$0xff]  ;;  %v5625_v19 = vor.u32 %v6404_v3, %v5624_v2  ;;  %v836_v22 = vld [vmem:[%s7331_s2 + $0x20] sm:$0xff]  ;;  %2453 = vmatpush.bf16.msrb.mxu0 %v5241_v7  ;;  %2466 = vmatpush.bf16.msrb.mxu1 %v5369_v13  ;;  %s6539_s2 = smul.u32 24, %s7325_s19 }
  0x88   : > { %v7353_v34 = vpack.c.bf16 %v838_v18, %v838_v18  ;;  %2479 = vmatpush.bf16.msrb.mxu2 %v5497_v14  ;;  %v7355_v37 = vpack.c.bf16 %v836_v22, %v836_v22  ;;  %v4938_v47 = vld [vmem:[#allocation2 + $0x1b0] sm:$0xf0]  ;;  %v6262_v48 = vld [vmem:[#allocation2 + $0x2a4] sm:$0xf] }
  0x89   : > { %2492 = vmatpush.bf16.msrb.mxu3 %v5625_v19  ;;  %v5066_v49 = vld [vmem:[#allocation2 + $0x2b0] sm:$0xf0]  ;;  %v6294_v50 = vld [vmem:[#allocation2 + $0x3a4] sm:$0xf]  ;;  %v4941_v53 = vor.u32 %v6230_v45, %v4938_v47  ;;  %s7704_s20 = scalar_lea.vmem %s7775_s30, %s6539_s2 }
  0x8a   : > { %v5194_v51 = vld [vmem:[#allocation2 + $0x3b0] sm:$0xf0]  ;;  %2454 = vmatmul.bf16.vlgmr.msrb.gmra.mxu0 %v7355_v37  ;;  %2467 = vmatmul.bf16.vlgmr.msrb.gmra.mxu1 %v7359_v40  ;;  %v5069_v54 = vor.u32 %v6262_v48, %v5066_v49  ;;  %v6194_v55 = vld [vmem:[#allocation2 + $0x84] sm:$0xf] }
  0x8b   : > { %2498 = vmatpush.bf16.msra.mxu0 %v4845_v20  ;;  %2511 = vmatpush.bf16.msra.mxu1 %v4973_v24  ;;  %v4794_v56 = vld [vmem:[#allocation2 + $0x90] sm:$0xf0]  ;;  %v6226_v57 = vld [vmem:[#allocation2 + $0x184] sm:$0xf]  ;;  %v5197_v58 = vor.u32 %v6294_v50, %v5194_v51 }
  0x8c   : > { %2524 = vmatpush.bf16.msra.mxu2 %v5101_v26  ;;  %2493 = vmatmul.bf16.vlgmr.msrb.gmra.mxu3 %v7357_v38  ;;  %v4922_v59 = vld [vmem:[#allocation2 + $0x190] sm:$0xf0]  ;;  %v6258_v60 = vld [vmem:[#allocation2 + $0x284] sm:$0xf]  ;;  %v4797_v0 = vor.u32 %v6194_v55, %v4794_v56 }
  0x8d   : > { %2537 = vmatpush.bf16.msra.mxu3 %v5229_v30  ;;  %2480 = vmatmul.bf16.vlgmr.msrb.gmra.mxu2 %v7353_v34  ;;  %v5050_v61 = vld [vmem:[#allocation2 + $0x290] sm:$0xf0]  ;;  %v6290_v62 = vld [vmem:[#allocation2 + $0x384] sm:$0xf]  ;;  %v4925_v1 = vor.u32 %v6226_v57, %v4922_v59 }
  0x8e   : > { %v5178_v63 = vld [vmem:[#allocation2 + $0x390] sm:$0xf0]  ;;  %v5053_v2 = vor.u32 %v6258_v60, %v5050_v61  ;;  %v6190_v3 = vld [vmem:[#allocation2 + $0x64] sm:$0xf] }
  0x8f   : > { %2499 = vmatpush.bf16.msra.mxu0 %v4829_v39  ;;  %2512 = vmatpush.bf16.msra.mxu1 %v4957_v41  ;;  %v4778_v4 = vld [vmem:[#allocation2 + $0x70] sm:$0xf0]  ;;  %v6222_v5 = vld [vmem:[#allocation2 + $0x164] sm:$0xf]  ;;  %v5181_v6 = vor.u32 %v6290_v62, %v5178_v63 }
  0x90   : > { %2525 = vmatpush.bf16.msra.mxu2 %v5085_v42  ;;  %v4906_v7 = vld [vmem:[#allocation2 + $0x170] sm:$0xf0]  ;;  %v6254_v10 = vld [vmem:[#allocation2 + $0x264] sm:$0xf]  ;;  %v4781_v14 = vor.u32 %v6190_v3, %v4778_v4 }
  0x91   : > { %2538 = vmatpush.bf16.msra.mxu3 %v5213_v46  ;;  %v5034_v11 = vld [vmem:[#allocation2 + $0x270] sm:$0xf0]  ;;  %v6286_v12 = vld [vmem:[#allocation2 + $0x364] sm:$0xf]  ;;  %v4909_v16 = vor.u32 %v6222_v5, %v4906_v7 }
  0x92   : > { %v5162_v13 = vld [vmem:[#allocation2 + $0x370] sm:$0xf0]  ;;  %v5037_v17 = vor.u32 %v6254_v10, %v5034_v11  ;;  %v6186_v18 = vld [vmem:[#allocation2 + $0x44] sm:$0xf] }
  0x93   : > { %2500 = vmatpush.bf16.msra.mxu0 %v4813_v52  ;;  %2513 = vmatpush.bf16.msra.mxu1 %v4941_v53  ;;  %v4762_v19 = vld [vmem:[#allocation2 + $0x50] sm:$0xf0]  ;;  %v6218_v20 = vld [vmem:[#allocation2 + $0x144] sm:$0xf]  ;;  %v5165_v21 = vor.u32 %v6286_v12, %v5162_v13 }
  0x94   : > { %2526 = vmatpush.bf16.msra.mxu2 %v5069_v54  ;;  %v4890_v22 = vld [vmem:[#allocation2 + $0x150] sm:$0xf0]  ;;  %v6250_v23 = vld [vmem:[#allocation2 + $0x244] sm:$0xf]  ;;  %v4765_v28 = vor.u32 %v6186_v18, %v4762_v19 }
  0x95   : > { %2539 = vmatpush.bf16.msra.mxu3 %v5197_v58  ;;  %v5018_v24 = vld [vmem:[#allocation2 + $0x250] sm:$0xf0]  ;;  %v6282_v26 = vld [vmem:[#allocation2 + $0x344] sm:$0xf]  ;;  %v4893_v29 = vor.u32 %v6218_v20, %v4890_v22 }
  0x96   : > { %v5146_v27 = vld [vmem:[#allocation2 + $0x350] sm:$0xf0]  ;;  %v5021_v30 = vor.u32 %v6250_v23, %v5018_v24  ;;  %v6182_v31 = vld [vmem:[#allocation2 + $0x24] sm:$0xf] }
  0x97   : > { %2501 = vmatpush.bf16.msra.mxu0 %v4797_v0  ;;  %2514 = vmatpush.bf16.msra.mxu1 %v4925_v1  ;;  %v4746_v32 = vld [vmem:[#allocation2 + $0x30] sm:$0xf0]  ;;  %v6214_v33 = vld [vmem:[#allocation2 + $0x124] sm:$0xf]  ;;  %v5149_v35 = vor.u32 %v6282_v26, %v5146_v27 }
  0x98   : > { %2527 = vmatpush.bf16.msra.mxu2 %v5053_v2  ;;  %v4874_v36 = vld [vmem:[#allocation2 + $0x130] sm:$0xf0]  ;;  %v6246_v39 = vld [vmem:[#allocation2 + $0x224] sm:$0xf]  ;;  %v4749_v44 = vor.u32 %v6182_v31, %v4746_v32 }
  0x99   : > { %2540 = vmatpush.bf16.msra.mxu3 %v5181_v6  ;;  %v5002_v41 = vld [vmem:[#allocation2 + $0x230] sm:$0xf0]  ;;  %v6278_v42 = vld [vmem:[#allocation2 + $0x324] sm:$0xf]  ;;  %v4877_v47 = vor.u32 %v6214_v33, %v4874_v36 }
  0x9a   : > { %v5130_v43 = vld [vmem:[#allocation2 + $0x330] sm:$0xf0]  ;;  %v6178_v45 = vld [vmem:[#allocation2 + $0x4] sm:$0xf]  ;;  %v5005_v48 = vor.u32 %v6246_v39, %v5002_v41 }
  0x9b   : > { %2502 = vmatpush.bf16.msra.mxu0 %v4781_v14  ;;  %2515 = vmatpush.bf16.msra.mxu1 %v4909_v16  ;;  %v4730_v46 = vld [vmem:[#allocation2 + $0x10] sm:$0xf0]  ;;  %v6210_v49 = vld [vmem:[#allocation2 + $0x104] sm:$0xf]  ;;  %v5133_v52 = vor.u32 %v6278_v42, %v5130_v43 }
  0x9c   : > { %2528 = vmatpush.bf16.msra.mxu2 %v5037_v17  ;;  %v4858_v50 = vld [vmem:[#allocation2 + $0x110] sm:$0xf0]  ;;  %v6242_v51 = vld [vmem:[#allocation2 + $0x204] sm:$0xf]  ;;  %v4733_v59 = vor.u32 %v6178_v45, %v4730_v46 }
  0x9d   : > { %2541 = vmatpush.bf16.msra.mxu3 %v5165_v21  ;;  %v4986_v53 = vld [vmem:[#allocation2 + $0x210] sm:$0xf0]  ;;  %v6274_v54 = vld [vmem:[#allocation2 + $0x304] sm:$0xf]  ;;  %v4861_v63 = vor.u32 %v6210_v49, %v4858_v50 }
  0x9e   : > { %v5114_v55 = vld [vmem:[#allocation2 + $0x310] sm:$0xf0]  ;;  %v6334_v56 = vld [vmem:[#allocation2 + $0x4e4] sm:$0xf]  ;;  %v4989_v0 = vor.u32 %v6242_v51, %v4986_v53 }
  0x9f   : > { %2503 = vmatpush.bf16.msra.mxu0 %v4765_v28  ;;  %2516 = vmatpush.bf16.msra.mxu1 %v4893_v29  ;;  %v5354_v57 = vld [vmem:[#allocation2 + $0x4f0] sm:$0xf0]  ;;  %v6366_v58 = vld [vmem:[#allocation2 + $0x5e4] sm:$0xf]  ;;  %v5117_v3 = vor.u32 %v6274_v54, %v5114_v55 }
  0xa0   : > { %2529 = vmatpush.bf16.msra.mxu2 %v5021_v30  ;;  %v5482_v60 = vld [vmem:[#allocation2 + $0x5f0] sm:$0xf0]  ;;  %v6398_v61 = vld [vmem:[#allocation2 + $0x6e4] sm:$0xf]  ;;  %v5357_v4 = vor.u32 %v6334_v56, %v5354_v57 }
  0xa1   : > { %2542 = vmatpush.bf16.msra.mxu3 %v5149_v35  ;;  %v5610_v62 = vld [vmem:[#allocation2 + $0x6f0] sm:$0xf0]  ;;  %v6430_v1 = vld [vmem:[#allocation2 + $0x7e4] sm:$0xf]  ;;  %v5485_v5 = vor.u32 %v6366_v58, %v5482_v60 }
  0xa2   : > { %v5738_v2 = vld [vmem:[#allocation2 + $0x7f0] sm:$0xf0]  ;;  %v5613_v6 = vor.u32 %v6398_v61, %v5610_v62  ;;  %v6330_v7 = vld [vmem:[#allocation2 + $0x4c4] sm:$0xf] }
  0xa3   : > { %2504 = vmatpush.bf16.msra.mxu0 %v4749_v44  ;;  %2517 = vmatpush.bf16.msra.mxu1 %v4877_v47  ;;  %v5338_v10 = vld [vmem:[#allocation2 + $0x4d0] sm:$0xf0]  ;;  %v6362_v11 = vld [vmem:[#allocation2 + $0x5c4] sm:$0xf]  ;;  %v5741_v12 = vor.u32 %v6430_v1, %v5738_v2 }
  0xa4   : > { %2530 = vmatpush.bf16.msra.mxu2 %v5005_v48  ;;  %v5466_v13 = vld [vmem:[#allocation2 + $0x5d0] sm:$0xf0]  ;;  %v6394_v14 = vld [vmem:[#allocation2 + $0x6c4] sm:$0xf]  ;;  %v5341_v19 = vor.u32 %v6330_v7, %v5338_v10 }
  0xa5   : > { %2543 = vmatpush.bf16.msra.mxu3 %v5133_v52  ;;  %v5594_v16 = vld [vmem:[#allocation2 + $0x6d0] sm:$0xf0]  ;;  %v6426_v17 = vld [vmem:[#allocation2 + $0x7c4] sm:$0xf]  ;;  %v5469_v20 = vor.u32 %v6362_v11, %v5466_v13 }
  0xa6   : > { %v5722_v18 = vld [vmem:[#allocation2 + $0x7d0] sm:$0xf0]  ;;  %v5597_v21 = vor.u32 %v6394_v14, %v5594_v16  ;;  %v6326_v22 = vld [vmem:[#allocation2 + $0x4a4] sm:$0xf] }
  0xa7   : > { %2505 = vmatpush.bf16.msra.mxu0 %v4733_v59  ;;  %2518 = vmatpush.bf16.msra.mxu1 %v4861_v63  ;;  %v5322_v23 = vld [vmem:[#allocation2 + $0x4b0] sm:$0xf0]  ;;  %v6358_v24 = vld [vmem:[#allocation2 + $0x5a4] sm:$0xf]  ;;  %v5725_v26 = vor.u32 %v6426_v17, %v5722_v18 }
  0xa8   : > { %2531 = vmatpush.bf16.msra.mxu2 %v4989_v0  ;;  %v5450_v27 = vld [vmem:[#allocation2 + $0x5b0] sm:$0xf0]  ;;  %v6390_v28 = vld [vmem:[#allocation2 + $0x6a4] sm:$0xf]  ;;  %v5325_v32 = vor.u32 %v6326_v22, %v5322_v23 }
  0xa9   : > { %2544 = vmatpush.bf16.msra.mxu3 %v5117_v3  ;;  %v5578_v29 = vld [vmem:[#allocation2 + $0x6b0] sm:$0xf0]  ;;  %v6422_v30 = vld [vmem:[#allocation2 + $0x7a4] sm:$0xf]  ;;  %v5453_v33 = vor.u32 %v6358_v24, %v5450_v27 }
  0xaa   : > { %v5706_v31 = vld [vmem:[#allocation2 + $0x7b0] sm:$0xf0]  ;;  %2506 = vmatmul.bf16.vlgmr.msra.gmra.mxu0 %v7337_v9  ;;  %2519 = vmatmul.bf16.vlgmr.msra.gmra.mxu1 %v7346_v25  ;;  %v5581_v35 = vor.u32 %v6390_v28, %v5578_v29  ;;  %v6322_v36 = vld [vmem:[#allocation2 + $0x484] sm:$0xf] }
  0xab   : > { %2550 = vmatpush.bf16.msrb.mxu0 %v5357_v4  ;;  %2563 = vmatpush.bf16.msrb.mxu1 %v5485_v5  ;;  %v5306_v39 = vld [vmem:[#allocation2 + $0x490] sm:$0xf0]  ;;  %v6354_v41 = vld [vmem:[#allocation2 + $0x584] sm:$0xf]  ;;  %v5709_v42 = vor.u32 %v6422_v30, %v5706_v31 }
  0xac   : > { %2576 = vmatpush.bf16.msrb.mxu2 %v5613_v6  ;;  %2545 = vmatmul.bf16.vlgmr.msra.gmra.mxu3 %v7340_v15  ;;  %v5434_v43 = vld [vmem:[#allocation2 + $0x590] sm:$0xf0]  ;;  %v6386_v44 = vld [vmem:[#allocation2 + $0x684] sm:$0xf]  ;;  %v5309_v48 = vor.u32 %v6322_v36, %v5306_v39  ;;  %v4848_v39 = vld [vmem:[#allocation2 + $0xe8] sm:$0xf] }
  0xad   : > { %2589 = vmatpush.bf16.msrb.mxu3 %v5741_v12  ;;  %2532 = vmatmul.bf16.vlgmr.msra.gmra.mxu2 %v7335_v8  ;;  %v5562_v45 = vld [vmem:[#allocation2 + $0x690] sm:$0xf0]  ;;  %v6418_v46 = vld [vmem:[#allocation2 + $0x784] sm:$0xf]  ;;  %v5437_v49 = vor.u32 %v6354_v41, %v5434_v43  ;;  %v6209_v41 = vld [vmem:[#allocation2 + $0xf4] sm:$0xf0] }
  0xae   : > { %v5690_v47 = vld [vmem:[#allocation2 + $0x790] sm:$0xf0]  ;;  %v5565_v50 = vor.u32 %v6386_v44, %v5562_v45  ;;  %v6318_v51 = vld [vmem:[#allocation2 + $0x464] sm:$0xf]  ;;  %v6241_v44 = vld [vmem:[#allocation2 + $0x1f4] sm:$0xf0] }
  0xaf   : > { %2551 = vmatpush.bf16.msrb.mxu0 %v5341_v19  ;;  %2564 = vmatpush.bf16.msrb.mxu1 %v5469_v20  ;;  %v5290_v52 = vld [vmem:[#allocation2 + $0x470] sm:$0xf0]  ;;  %v6350_v53 = vld [vmem:[#allocation2 + $0x564] sm:$0xf]  ;;  %v5693_v54 = vor.u32 %v6418_v46, %v5690_v47  ;;  %v5104_v45 = vld [vmem:[#allocation2 + $0x2e8] sm:$0xf] }
  0xb0   : > { %2577 = vmatpush.bf16.msrb.mxu2 %v5597_v21  ;;  %v5418_v55 = vld [vmem:[#allocation2 + $0x570] sm:$0xf0]  ;;  %v6382_v56 = vld [vmem:[#allocation2 + $0x664] sm:$0xf]  ;;  %v5293_v60 = vor.u32 %v6318_v51, %v5290_v52  ;;  %v6273_v46 = vld [vmem:[#allocation2 + $0x2f4] sm:$0xf0]  ;;  %v4849_v52 = vor.u32 %v6209_v41, %v4848_v39 }
  0xb1   : > { %2590 = vmatpush.bf16.msrb.mxu3 %v5725_v26  ;;  %v5546_v57 = vld [vmem:[#allocation2 + $0x670] sm:$0xf0]  ;;  %v6414_v58 = vld [vmem:[#allocation2 + $0x764] sm:$0xf]  ;;  %v5421_v61 = vor.u32 %v6350_v53, %v5418_v55  ;;  %v4832_v55 = vld [vmem:[#allocation2 + $0xc8] sm:$0xf] }
  0xb2   : > { %v5674_v59 = vld [vmem:[#allocation2 + $0x770] sm:$0xf0]  ;;  %v5549_v62 = vor.u32 %v6382_v56, %v5546_v57  ;;  %v6314_v63 = vld [vmem:[#allocation2 + $0x444] sm:$0xf]  ;;  %v6205_v56 = vld [vmem:[#allocation2 + $0xd4] sm:$0xf0] }
  0xb3   : > { %2552 = vmatpush.bf16.msrb.mxu0 %v5325_v32  ;;  %2565 = vmatpush.bf16.msrb.mxu1 %v5453_v33  ;;  %v5274_v0 = vld [vmem:[#allocation2 + $0x450] sm:$0xf0]  ;;  %v6346_v1 = vld [vmem:[#allocation2 + $0x544] sm:$0xf]  ;;  %v5677_v2 = vor.u32 %v6414_v58, %v5674_v59  ;;  %v4960_v57 = vld [vmem:[#allocation2 + $0x1c8] sm:$0xf] }
  0xb4   : > { %2578 = vmatpush.bf16.msrb.mxu2 %v5581_v35  ;;  %v5402_v3 = vld [vmem:[#allocation2 + $0x550] sm:$0xf0]  ;;  %v6378_v4 = vld [vmem:[#allocation2 + $0x644] sm:$0xf]  ;;  %v5277_v10 = vor.u32 %v6314_v63, %v5274_v0  ;;  %v6237_v59 = vld [vmem:[#allocation2 + $0x1d4] sm:$0xf0]  ;;  %v4833_v0 = vor.u32 %v6205_v56, %v4832_v55 }
  0xb5   : > { %2591 = vmatpush.bf16.msrb.mxu3 %v5709_v42  ;;  %v5530_v5 = vld [vmem:[#allocation2 + $0x650] sm:$0xf0]  ;;  %v6410_v6 = vld [vmem:[#allocation2 + $0x744] sm:$0xf]  ;;  %v5405_v11 = vor.u32 %v6346_v1, %v5402_v3  ;;  %v4976_v42 = vld [vmem:[#allocation2 + $0x1e8] sm:$0xf]  ;;  %v4961_v1 = vor.u32 %v6237_v59, %v4960_v57 }
  0xb6   : > { %v5658_v7 = vld [vmem:[#allocation2 + $0x750] sm:$0xf0]  ;;  %v5533_v12 = vor.u32 %v6378_v4, %v5530_v5  ;;  %v6310_v13 = vld [vmem:[#allocation2 + $0x424] sm:$0xf]  ;;  %v4977_v53 = vor.u32 %v6241_v44, %v4976_v42  ;;  %v6301_v63 = vld [vmem:[#allocation2 + $0x3d4] sm:$0xf0] }
  0xb7   : > { %2553 = vmatpush.bf16.msrb.mxu0 %v5309_v48  ;;  %2566 = vmatpush.bf16.msrb.mxu1 %v5437_v49  ;;  %v5258_v14 = vld [vmem:[#allocation2 + $0x430] sm:$0xf0]  ;;  %v6342_v16 = vld [vmem:[#allocation2 + $0x524] sm:$0xf]  ;;  %v5661_v17 = vor.u32 %v6410_v6, %v5658_v7  ;;  %v5232_v49 = vld [vmem:[#allocation2 + $0x3e8] sm:$0xf] }
  0xb8   : > { %2579 = vmatpush.bf16.msrb.mxu2 %v5565_v50  ;;  %v5386_v18 = vld [vmem:[#allocation2 + $0x530] sm:$0xf0]  ;;  %v6374_v19 = vld [vmem:[#allocation2 + $0x624] sm:$0xf]  ;;  %v5261_v23 = vor.u32 %v6310_v13, %v5258_v14  ;;  %v6305_v50 = vld [vmem:[#allocation2 + $0x3f4] sm:$0xf0] }
  0xb9   : > { %2592 = vmatpush.bf16.msrb.mxu3 %v5693_v54  ;;  %v5514_v20 = vld [vmem:[#allocation2 + $0x630] sm:$0xf0]  ;;  %v6406_v21 = vld [vmem:[#allocation2 + $0x724] sm:$0xf]  ;;  %v5389_v27 = vor.u32 %v6342_v16, %v5386_v18  ;;  %v5105_v54 = vor.u32 %v6273_v46, %v5104_v45  ;;  %v5233_v58 = vor.u32 %v6305_v50, %v5232_v49  ;;  %v4816_v3 = vld [vmem:[#allocation2 + $0xa8] sm:$0xf] }
  0xba   : > { %v5642_v22 = vld [vmem:[#allocation2 + $0x730] sm:$0xf0]  ;;  %v6306_v24 = vld [vmem:[#allocation2 + $0x404] sm:$0xf]  ;;  %v5517_v28 = vor.u32 %v6374_v19, %v5514_v20  ;;  %v6201_v4 = vld [vmem:[#allocation2 + $0xb4] sm:$0xf0] }
  0xbb   : > { %2554 = vmatpush.bf16.msrb.mxu0 %v5293_v60  ;;  %2567 = vmatpush.bf16.msrb.mxu1 %v5421_v61  ;;  %v5242_v26 = vld [vmem:[#allocation2 + $0x410] sm:$0xf0]  ;;  %v6338_v29 = vld [vmem:[#allocation2 + $0x504] sm:$0xf]  ;;  %v5645_v32 = vor.u32 %v6406_v21, %v5642_v22  ;;  %v5088_v60 = vld [vmem:[#allocation2 + $0x2c8] sm:$0xf]  ;;  %v4817_v14 = vor.u32 %v6201_v4, %v4816_v3 }
  0xbc   : > { %2580 = vmatpush.bf16.msrb.mxu2 %v5549_v62  ;;  %v5370_v30 = vld [vmem:[#allocation2 + $0x510] sm:$0xf0]  ;;  %v6370_v31 = vld [vmem:[#allocation2 + $0x604] sm:$0xf]  ;;  %v5245_v43 = vor.u32 %v6306_v24, %v5242_v26  ;;  %v6269_v61 = vld [vmem:[#allocation2 + $0x2d4] sm:$0xf0] }
  0xbd   : > { %2593 = vmatpush.bf16.msrb.mxu3 %v5677_v2  ;;  %v5498_v33 = vld [vmem:[#allocation2 + $0x610] sm:$0xf0]  ;;  %v6402_v35 = vld [vmem:[#allocation2 + $0x704] sm:$0xf]  ;;  %v5373_v47 = vor.u32 %v6338_v29, %v5370_v30  ;;  %v5216_v62 = vld [vmem:[#allocation2 + $0x3c8] sm:$0xf]  ;;  %v5089_v2 = vor.u32 %v6269_v61, %v5088_v60 }
  0xbe   : > { %v5626_v36 = vld [vmem:[#allocation2 + $0x710] sm:$0xf0]  ;;  %v5501_v48 = vor.u32 %v6370_v31, %v5498_v33  ;;  %v4944_v5 = vld [vmem:[#allocation2 + $0x1a8] sm:$0xf]  ;;  %v5217_v6 = vor.u32 %v6301_v63, %v5216_v62  ;;  %v6233_v7 = vld [vmem:[#allocation2 + $0x1b4] sm:$0xf0] }
  0xbf   : > { %2555 = vmatpush.bf16.msrb.mxu0 %v5277_v10  ;;  %2568 = vmatpush.bf16.msrb.mxu1 %v5405_v11  ;;  %v5629_v51 = vor.u32 %v6402_v35, %v5626_v36  ;;  %v5072_v10 = vld [vmem:[#allocation2 + $0x2a8] sm:$0xf]  ;;  %v6265_v11 = vld [vmem:[#allocation2 + $0x2b4] sm:$0xf0]  ;;  %v4945_v16 = vor.u32 %v6233_v7, %v4944_v5 }
  0xc0   : > { %2581 = vmatpush.bf16.msrb.mxu2 %v5533_v12  ;;  %v5200_v12 = vld [vmem:[#allocation2 + $0x3a8] sm:$0xf]  ;;  %v6297_v13 = vld [vmem:[#allocation2 + $0x3b4] sm:$0xf0] }
  0xc1   : > { %2594 = vmatpush.bf16.msrb.mxu3 %v5661_v17  ;;  %v5073_v17 = vor.u32 %v6265_v11, %v5072_v10  ;;  %v4800_v18 = vld [vmem:[#allocation2 + $0x88] sm:$0xf]  ;;  %v6197_v19 = vld [vmem:[#allocation2 + $0x94] sm:$0xf0]  ;;  %v5201_v21 = vor.u32 %v6297_v13, %v5200_v12 }
  0xc2   : > { %v4928_v20 = vld [vmem:[#allocation2 + $0x188] sm:$0xf]  ;;  %v6229_v22 = vld [vmem:[#allocation2 + $0x194] sm:$0xf0] }
  0xc3   : > { %2556 = vmatpush.bf16.msrb.mxu0 %v5261_v23  ;;  %2569 = vmatpush.bf16.msrb.mxu1 %v5389_v27  ;;  %v5056_v23 = vld [vmem:[#allocation2 + $0x288] sm:$0xf]  ;;  %v6261_v24 = vld [vmem:[#allocation2 + $0x294] sm:$0xf0]  ;;  %v4929_v29 = vor.u32 %v6229_v22, %v4928_v20 }
  0xc4   : > { %2582 = vmatpush.bf16.msrb.mxu2 %v5517_v28  ;;  %v5184_v26 = vld [vmem:[#allocation2 + $0x388] sm:$0xf]  ;;  %v6293_v27 = vld [vmem:[#allocation2 + $0x394] sm:$0xf0]  ;;  %v4801_v28 = vor.u32 %v6197_v19, %v4800_v18  ;;  %v5057_v30 = vor.u32 %v6261_v24, %v5056_v23 }
  0xc5   : > { %2595 = vmatpush.bf16.msrb.mxu3 %v5645_v32  ;;  %v4784_v31 = vld [vmem:[#allocation2 + $0x68] sm:$0xf]  ;;  %v6193_v32 = vld [vmem:[#allocation2 + $0x74] sm:$0xf0]  ;;  %v5185_v35 = vor.u32 %v6293_v27, %v5184_v26 }
  0xc6   : > { %v4912_v33 = vld [vmem:[#allocation2 + $0x168] sm:$0xf]  ;;  %v6225_v36 = vld [vmem:[#allocation2 + $0x174] sm:$0xf0]  ;;  %v4785_v44 = vor.u32 %v6193_v32, %v4784_v31 }
  0xc7   : > { %2557 = vmatpush.bf16.msrb.mxu0 %v5245_v43  ;;  %2570 = vmatpush.bf16.msrb.mxu1 %v5373_v47  ;;  %v5040_v39 = vld [vmem:[#allocation2 + $0x268] sm:$0xf]  ;;  %v6257_v41 = vld [vmem:[#allocation2 + $0x274] sm:$0xf0]  ;;  %v4913_v45 = vor.u32 %v6225_v36, %v4912_v33 }
  0xc8   : > { %2583 = vmatpush.bf16.msrb.mxu2 %v5501_v48  ;;  %v5168_v42 = vld [vmem:[#allocation2 + $0x368] sm:$0xf]  ;;  %v6289_v43 = vld [vmem:[#allocation2 + $0x374] sm:$0xf0]  ;;  %v5041_v46 = vor.u32 %v6257_v41, %v5040_v39 }
  0xc9   : > { %2596 = vmatpush.bf16.msrb.mxu3 %v5629_v51  ;;  %v4768_v47 = vld [vmem:[#allocation2 + $0x48] sm:$0xf]  ;;  %v6189_v48 = vld [vmem:[#allocation2 + $0x54] sm:$0xf0]  ;;  %v5169_v50 = vor.u32 %v6289_v43, %v5168_v42 }
  0xca   : > { %2558 = vmatmul.bf16.vlgmr.msrb.gmra.mxu0 %v7355_v37  ;;  %2571 = vmatmul.bf16.vlgmr.msrb.gmra.mxu1 %v7359_v40  ;;  %v4896_v49 = vld [vmem:[#allocation2 + $0x148] sm:$0xf]  ;;  %v6221_v51 = vld [vmem:[#allocation2 + $0x154] sm:$0xf0]  ;;  %v4769_v56 = vor.u32 %v6189_v48, %v4768_v47 }
  0xcb   : > { %2602 = vmatpush.bf16.msra.mxu0 %v4849_v52  ;;  %2615 = vmatpush.bf16.msra.mxu1 %v4977_v53  ;;  %v5024_v52 = vld [vmem:[#allocation2 + $0x248] sm:$0xf]  ;;  %v6253_v53 = vld [vmem:[#allocation2 + $0x254] sm:$0xf0]  ;;  %v4897_v57 = vor.u32 %v6221_v51, %v4896_v49 }
  0xcc   : > { %2628 = vmatpush.bf16.msra.mxu2 %v5105_v54  ;;  %2597 = vmatmul.bf16.vlgmr.msrb.gmra.mxu3 %v7357_v38  ;;  %v5152_v54 = vld [vmem:[#allocation2 + $0x348] sm:$0xf]  ;;  %v6285_v55 = vld [vmem:[#allocation2 + $0x354] sm:$0xf0] }
  0xcd   : > { %2641 = vmatpush.bf16.msra.mxu3 %v5233_v58  ;;  %2584 = vmatmul.bf16.vlgmr.msrb.gmra.mxu2 %v7353_v34  ;;  %v5025_v58 = vor.u32 %v6253_v53, %v5024_v52  ;;  %v4752_v59 = vld [vmem:[#allocation2 + $0x28] sm:$0xf]  ;;  %v6185_v60 = vld [vmem:[#allocation2 + $0x34] sm:$0xf0]  ;;  %v5153_v62 = vor.u32 %v6285_v55, %v5152_v54 }
  0xce   : > { %v4880_v61 = vld [vmem:[#allocation2 + $0x128] sm:$0xf]  ;;  %v6217_v63 = vld [vmem:[#allocation2 + $0x134] sm:$0xf0]  ;;  %v4753_v4 = vor.u32 %v6185_v60, %v4752_v59 }
  0xcf   : > { %2603 = vmatpush.bf16.msra.mxu0 %v4833_v0  ;;  %2616 = vmatpush.bf16.msra.mxu1 %v4961_v1  ;;  %v5008_v0 = vld [vmem:[#allocation2 + $0x228] sm:$0xf]  ;;  %v6249_v1 = vld [vmem:[#allocation2 + $0x234] sm:$0xf0]  ;;  %v4881_v7 = vor.u32 %v6217_v63, %v4880_v61 }
  0xd0   : > { %2629 = vmatpush.bf16.msra.mxu2 %v5089_v2  ;;  %v5136_v2 = vld [vmem:[#allocation2 + $0x328] sm:$0xf]  ;;  %v6281_v3 = vld [vmem:[#allocation2 + $0x334] sm:$0xf0]  ;;  %v5009_v10 = vor.u32 %v6249_v1, %v5008_v0 }
  0xd1   : > { %2642 = vmatpush.bf16.msra.mxu3 %v5217_v6  ;;  %v4736_v5 = vld [vmem:[#allocation2 + $0x8] sm:$0xf]  ;;  %v6181_v6 = vld [vmem:[#allocation2 + $0x14] sm:$0xf0] }
  0xd2   : > { %v4864_v11 = vld [vmem:[#allocation2 + $0x108] sm:$0xf]  ;;  %v6213_v12 = vld [vmem:[#allocation2 + $0x114] sm:$0xf0]  ;;  %v4737_v22 = vor.u32 %v6181_v6, %v4736_v5  ;;  %v7377_v6 = vld [vmem:[#allocation4] sm:$0xf] }
  0xd3   : > { %2604 = vmatpush.bf16.msra.mxu0 %v4817_v14  ;;  %2617 = vmatpush.bf16.msra.mxu1 %v4945_v16  ;;  %v4992_v13 = vld [vmem:[#allocation2 + $0x208] sm:$0xf]  ;;  %v5137_v14 = vor.u32 %v6281_v3, %v5136_v2  ;;  %v6245_v16 = vld [vmem:[#allocation2 + $0x214] sm:$0xf0]  ;;  %v4865_v27 = vor.u32 %v6213_v12, %v4864_v11 }
  0xd4   : > { %2630 = vmatpush.bf16.msra.mxu2 %v5073_v17  ;;  %v5120_v17 = vld [vmem:[#allocation2 + $0x308] sm:$0xf]  ;;  %v6277_v18 = vld [vmem:[#allocation2 + $0x314] sm:$0xf0] }
  0xd5   : > { %2643 = vmatpush.bf16.msra.mxu3 %v5201_v21  ;;  %v5360_v19 = vld [vmem:[#allocation2 + $0x4e8] sm:$0xf]  ;;  %v6337_v20 = vld [vmem:[#allocation2 + $0x4f4] sm:$0xf0]  ;;  %v5121_v31 = vor.u32 %v6277_v18, %v5120_v17  ;;  %v1106_v18 = vperm.slane %v7377_v6, 0 }
  0xd6   : > { %v5488_v21 = vld [vmem:[#allocation2 + $0x5e8] sm:$0xf]  ;;  %v6369_v23 = vld [vmem:[#allocation2 + $0x5f4] sm:$0xf0]  ;;  %v5361_v32 = vor.u32 %v6337_v20, %v5360_v19 }
  0xd7   : > { %2605 = vmatpush.bf16.msra.mxu0 %v4801_v28  ;;  %2618 = vmatpush.bf16.msra.mxu1 %v4929_v29  ;;  %v5616_v24 = vld [vmem:[#allocation2 + $0x6e8] sm:$0xf]  ;;  %v6401_v26 = vld [vmem:[#allocation2 + $0x6f4] sm:$0xf0]  ;;  %v4993_v28 = vor.u32 %v6245_v16, %v4992_v13  ;;  %v5489_v33 = vor.u32 %v6369_v23, %v5488_v21 }
  0xd8   : > { %2631 = vmatpush.bf16.msra.mxu2 %v5057_v30  ;;  %v5744_v29 = vld [vmem:[#allocation2 + $0x7e8] sm:$0xf]  ;;  %v6433_v30 = vld [vmem:[#allocation2 + $0x7f4] sm:$0xf0] }
  0xd9   : > { %2644 = vmatpush.bf16.msra.mxu3 %v5185_v35  ;;  %v5617_v35 = vor.u32 %v6401_v26, %v5616_v24  ;;  %v5344_v36 = vld [vmem:[#allocation2 + $0x4c8] sm:$0xf]  ;;  %v6333_v39 = vld [vmem:[#allocation2 + $0x4d4] sm:$0xf0]  ;;  %v5745_v42 = vor.u32 %v6433_v30, %v5744_v29 }
  0xda   : > { %v5472_v41 = vld [vmem:[#allocation2 + $0x5c8] sm:$0xf]  ;;  %v6365_v43 = vld [vmem:[#allocation2 + $0x5d4] sm:$0xf0]  ;;  %v5345_v48 = vor.u32 %v6333_v39, %v5344_v36 }
  0xdb   : > { %2606 = vmatpush.bf16.msra.mxu0 %v4785_v44  ;;  %2619 = vmatpush.bf16.msra.mxu1 %v4913_v45  ;;  %v5600_v44 = vld [vmem:[#allocation2 + $0x6c8] sm:$0xf]  ;;  %v6397_v45 = vld [vmem:[#allocation2 + $0x6d4] sm:$0xf0]  ;;  %v5473_v49 = vor.u32 %v6365_v43, %v5472_v41 }
  0xdc   : > { %2632 = vmatpush.bf16.msra.mxu2 %v5041_v46  ;;  %v5728_v46 = vld [vmem:[#allocation2 + $0x7c8] sm:$0xf]  ;;  %v6429_v47 = vld [vmem:[#allocation2 + $0x7d4] sm:$0xf0] }
  0xdd   : > { %2645 = vmatpush.bf16.msra.mxu3 %v5169_v50  ;;  %v5601_v50 = vor.u32 %v6397_v45, %v5600_v44  ;;  %v5328_v51 = vld [vmem:[#allocation2 + $0x4a8] sm:$0xf]  ;;  %v6329_v52 = vld [vmem:[#allocation2 + $0x4b4] sm:$0xf0]  ;;  %v5729_v54 = vor.u32 %v6429_v47, %v5728_v46 }
  0xde   : > { %v5456_v53 = vld [vmem:[#allocation2 + $0x5a8] sm:$0xf]  ;;  %v6361_v55 = vld [vmem:[#allocation2 + $0x5b4] sm:$0xf0]  ;;  %v5329_v60 = vor.u32 %v6329_v52, %v5328_v51 }
  0xdf   : > { %2607 = vmatpush.bf16.msra.mxu0 %v4769_v56  ;;  %2620 = vmatpush.bf16.msra.mxu1 %v4897_v57  ;;  %v5584_v56 = vld [vmem:[#allocation2 + $0x6a8] sm:$0xf]  ;;  %v6393_v57 = vld [vmem:[#allocation2 + $0x6b4] sm:$0xf0] }
  0xe0   : > { %2633 = vmatpush.bf16.msra.mxu2 %v5025_v58  ;;  %v5712_v58 = vld [vmem:[#allocation2 + $0x7a8] sm:$0xf]  ;;  %v6425_v59 = vld [vmem:[#allocation2 + $0x7b4] sm:$0xf0]  ;;  %v5585_v63 = vor.u32 %v6393_v57, %v5584_v56 }
  0xe1   : > { %2646 = vmatpush.bf16.msra.mxu3 %v5153_v62  ;;  %v5312_v61 = vld [vmem:[#allocation2 + $0x488] sm:$0xf]  ;;  %v5457_v62 = vor.u32 %v6361_v55, %v5456_v53  ;;  %v6325_v0 = vld [vmem:[#allocation2 + $0x494] sm:$0xf0]  ;;  %v5713_v3 = vor.u32 %v6425_v59, %v5712_v58 }
  0xe2   : > { %v5440_v1 = vld [vmem:[#allocation2 + $0x588] sm:$0xf]  ;;  %v6357_v2 = vld [vmem:[#allocation2 + $0x594] sm:$0xf0]  ;;  %v5313_v11 = vor.u32 %v6325_v0, %v5312_v61 }
  0xe3   : > { %2608 = vmatpush.bf16.msra.mxu0 %v4753_v4  ;;  %2621 = vmatpush.bf16.msra.mxu1 %v4881_v7  ;;  %v5568_v4 = vld [vmem:[#allocation2 + $0x688] sm:$0xf]  ;;  %v6389_v5 = vld [vmem:[#allocation2 + $0x694] sm:$0xf0]  ;;  %v5441_v13 = vor.u32 %v6357_v2, %v5440_v1 }
  0xe4   : > { %2634 = vmatpush.bf16.msra.mxu2 %v5009_v10  ;;  %v5696_v7 = vld [vmem:[#allocation2 + $0x788] sm:$0xf]  ;;  %v6421_v10 = vld [vmem:[#allocation2 + $0x794] sm:$0xf0] }
  0xe5   : > { %2647 = vmatpush.bf16.msra.mxu3 %v5137_v14  ;;  %v5296_v12 = vld [vmem:[#allocation2 + $0x468] sm:$0xf]  ;;  %v5569_v14 = vor.u32 %v6389_v5, %v5568_v4  ;;  %v6321_v16 = vld [vmem:[#allocation2 + $0x474] sm:$0xf0]  ;;  %v5697_v19 = vor.u32 %v6421_v10, %v5696_v7 }
  0xe6   : > { %v5424_v17 = vld [vmem:[#allocation2 + $0x568] sm:$0xf]  ;;  %v6353_v20 = vld [vmem:[#allocation2 + $0x574] sm:$0xf0]  ;;  %v5297_v26 = vor.u32 %v6321_v16, %v5296_v12  ;;  %v2416_v45 = vpop.f32.mrf.mxu1  ;;  %v4850_v16 = vld [vmem:[#allocation2 + $0xf8] sm:$0xf0] }
  0xe7   : > { %2609 = vmatpush.bf16.msra.mxu0 %v4737_v22  ;;  %2622 = vmatpush.bf16.msra.mxu1 %v4865_v27  ;;  %v5552_v21 = vld [vmem:[#allocation2 + $0x668] sm:$0xf]  ;;  %v6385_v22 = vld [vmem:[#allocation2 + $0x674] sm:$0xf0] }
  0xe8   : > { %2635 = vmatpush.bf16.msra.mxu2 %v4993_v28  ;;  %v5680_v23 = vld [vmem:[#allocation2 + $0x768] sm:$0xf]  ;;  %v6417_v24 = vld [vmem:[#allocation2 + $0x774] sm:$0xf0]  ;;  %v5425_v28 = vor.u32 %v6353_v20, %v5424_v17  ;;  %v5553_v29 = vor.u32 %v6385_v22, %v5552_v21  ;;  %v6239_v17 = vld [vmem:[#allocation2 + $0x1ec] sm:$0xf] }
  0xe9   : > { %2648 = vmatpush.bf16.msra.mxu3 %v5121_v31  ;;  %v5280_v30 = vld [vmem:[#allocation2 + $0x448] sm:$0xf]  ;;  %v6317_v31 = vld [vmem:[#allocation2 + $0x454] sm:$0xf0]  ;;  %v6271_v20 = vld [vmem:[#allocation2 + $0x2ec] sm:$0xf] }
  0xea   : > { %2610 = vmatmul.bf16.vlgmr.msra.gmra.mxu0 %v7337_v9  ;;  %2623 = vmatmul.bf16.vlgmr.msra.gmra.mxu1 %v7346_v25  ;;  %v6349_v36 = vld [vmem:[#allocation2 + $0x554] sm:$0xf0]  ;;  %v5536_v39 = vld [vmem:[#allocation2 + $0x648] sm:$0xf]  ;;  %v5281_v44 = vor.u32 %v6317_v31, %v5280_v30  ;;  %v5106_v21 = vld [vmem:[#allocation2 + $0x2f8] sm:$0xf0] }
  0xeb   : > { %2654 = vmatpush.bf16.msrb.mxu0 %v5361_v32  ;;  %2667 = vmatpush.bf16.msrb.mxu1 %v5489_v33  ;;  %v5408_v32 = vld [vmem:[#allocation2 + $0x548] sm:$0xf]  ;;  %v6381_v41 = vld [vmem:[#allocation2 + $0x654] sm:$0xf0] }
  0xec   : > { %2680 = vmatpush.bf16.msrb.mxu2 %v5617_v35  ;;  %2649 = vmatmul.bf16.vlgmr.msra.gmra.mxu3 %v7340_v15  ;;  %v5681_v35 = vor.u32 %v6417_v24, %v5680_v23  ;;  %v6413_v43 = vld [vmem:[#allocation2 + $0x754] sm:$0xf0]  ;;  %v5409_v46 = vor.u32 %v6349_v36, %v5408_v32  ;;  %v5537_v47 = vor.u32 %v6381_v41, %v5536_v39  ;;  %v5648_v57 = vld [vmem:[#allocation2 + $0x728] sm:$0xf]  ;;  %v6235_v36 = vld [vmem:[#allocation2 + $0x1cc] sm:$0xf] }
  0xed   : > { %2693 = vmatpush.bf16.msrb.mxu3 %v5745_v42  ;;  %2636 = vmatmul.bf16.vlgmr.msra.gmra.mxu2 %v7335_v8  ;;  %v5664_v42 = vld [vmem:[#allocation2 + $0x748] sm:$0xf]  ;;  %v6345_v53 = vld [vmem:[#allocation2 + $0x534] sm:$0xf0]  ;;  %v5109_v32 = vor.u32 %v6271_v20, %v5106_v21 }
  0xee   : > { %v5665_v52 = vor.u32 %v6413_v43, %v5664_v42  ;;  %v6377_v55 = vld [vmem:[#allocation2 + $0x634] sm:$0xf0]  ;;  %v5504_v5 = vld [vmem:[#allocation2 + $0x608] sm:$0xf]  ;;  %v2418_v22 = vpop.f32.mrf.mxu1  ;;  %v4962_v42 = vld [vmem:[#allocation2 + $0x1d8] sm:$0xf0] }
  0xef   : > { %2655 = vmatpush.bf16.msrb.mxu0 %v5345_v48  ;;  %2668 = vmatpush.bf16.msrb.mxu1 %v5473_v49  ;;  %v5264_v48 = vld [vmem:[#allocation2 + $0x428] sm:$0xf]  ;;  %v6313_v49 = vld [vmem:[#allocation2 + $0x434] sm:$0xf0]  ;;  %v6267_v43 = vld [vmem:[#allocation2 + $0x2cc] sm:$0xf] }
  0xf0   : > { %2681 = vmatpush.bf16.msrb.mxu2 %v5601_v50  ;;  %v5392_v50 = vld [vmem:[#allocation2 + $0x528] sm:$0xf]  ;;  %v6409_v58 = vld [vmem:[#allocation2 + $0x734] sm:$0xf0]  ;;  %v5265_v61 = vor.u32 %v6313_v49, %v5264_v48  ;;  %v4965_v48 = vor.u32 %v6235_v36, %v4962_v42  ;;  %v4914_v22 = vld [vmem:[#allocation2 + $0x178] sm:$0xf0] }
  0xf1   : > { %2694 = vmatpush.bf16.msrb.mxu3 %v5729_v54  ;;  %v5520_v54 = vld [vmem:[#allocation2 + $0x628] sm:$0xf]  ;;  %v5393_v1 = vor.u32 %v6345_v53, %v5392_v50  ;;  %v6341_v4 = vld [vmem:[#allocation2 + $0x514] sm:$0xf0]  ;;  %v5649_v10 = vor.u32 %v6409_v58, %v5648_v57  ;;  %v6199_v50 = vld [vmem:[#allocation2 + $0xac] sm:$0xf] }
  0xf2   : > { %v5521_v2 = vor.u32 %v6377_v55, %v5520_v54  ;;  %v5632_v12 = vld [vmem:[#allocation2 + $0x708] sm:$0xf]  ;;  %v4946_v54 = vld [vmem:[#allocation2 + $0x1b8] sm:$0xf0]  ;;  %v6263_v55 = vld [vmem:[#allocation2 + $0x2ac] sm:$0xf] }
  0xf3   : > { %2656 = vmatpush.bf16.msrb.mxu0 %v5329_v60  ;;  %2669 = vmatpush.bf16.msrb.mxu1 %v5457_v62  ;;  %v2403_v27 = vpop.f32.mrf.mxu0  ;;  %v2442_v60 = vpop.f32.mrf.mxu3  ;;  %v5248_v62 = vld [vmem:[#allocation2 + $0x408] sm:$0xf]  ;;  %v6295_v57 = vld [vmem:[#allocation2 + $0x3ac] sm:$0xf]  ;;  %v5202_v58 = vld [vmem:[#allocation2 + $0x3b8] sm:$0xf0] }
  0xf4   : > { %2682 = vmatpush.bf16.msrb.mxu2 %v5585_v63  ;;  %v2404_v33 = vadd.f32 %v2403_v27, %v1106_v18  ;;  %v6309_v63 = vld [vmem:[#allocation2 + $0x414] sm:$0xf0]  ;;  %v5234_v27 = vld [vmem:[#allocation2 + $0x3f8] sm:$0xf0] }
  0xf5   : > { %2695 = vmatpush.bf16.msrb.mxu3 %v5713_v3  ;;  %v5376_v3 = vld [vmem:[#allocation2 + $0x508] sm:$0xf]  ;;  %v5249_v18 = vor.u32 %v6309_v63, %v5248_v62  ;;  %v6195_v62 = vld [vmem:[#allocation2 + $0x8c] sm:$0xf]  ;;  %v4802_v63 = vld [vmem:[#allocation2 + $0x98] sm:$0xf0] }
  0xf6   : > { %v2417_v51 = vadd.f32 %v2416_v45, %v2404_v33  ;;  %v5377_v23 = vor.u32 %v6341_v4, %v5376_v3  ;;  %v6203_v33 = vld [vmem:[#allocation2 + $0xcc] sm:$0xf]  ;;  %v5058_v4 = vld [vmem:[#allocation2 + $0x298] sm:$0xf0] }
  0xf7   : > { %2657 = vmatpush.bf16.msrb.mxu0 %v5313_v11  ;;  %2670 = vmatpush.bf16.msrb.mxu1 %v5441_v13  ;;  %v6373_v11 = vld [vmem:[#allocation2 + $0x614] sm:$0xf0]  ;;  %v6299_v45 = vld [vmem:[#allocation2 + $0x3cc] sm:$0xf]  ;;  %v5026_v42 = vld [vmem:[#allocation2 + $0x258] sm:$0xf0] }
  0xf8   : > { %2683 = vmatpush.bf16.msrb.mxu2 %v5569_v14  ;;  %v2429_v56 = vpop.f32.mrf.mxu2  ;;  %v6405_v13 = vld [vmem:[#allocation2 + $0x714] sm:$0xf0]  ;;  %v6207_v14 = vld [vmem:[#allocation2 + $0xec] sm:$0xf]  ;;  %v5505_v24 = vor.u32 %v6373_v11, %v5504_v5  ;;  %v4805_v11 = vor.u32 %v6195_v62, %v4802_v63 }
  0xf9   : > { %2696 = vmatpush.bf16.msrb.mxu3 %v5697_v19  ;;  %v2430_v59 = vadd.f32 %v2429_v56, %v2417_v51  ;;  %v4978_v19 = vld [vmem:[#allocation2 + $0x1f8] sm:$0xf0]  ;;  %v6259_v3 = vld [vmem:[#allocation2 + $0x28c] sm:$0xf] }
  0xfa   : > { %v4981_v31 = vor.u32 %v6239_v17, %v4978_v19  ;;  %v4818_v51 = vld [vmem:[#allocation2 + $0xb8] sm:$0xf0]  ;;  %v6291_v5 = vld [vmem:[#allocation2 + $0x38c] sm:$0xf] }
  0xfb   : > { %2658 = vmatpush.bf16.msrb.mxu0 %v5297_v26  ;;  %2671 = vmatpush.bf16.msrb.mxu1 %v5425_v28  ;;  %v2405_v0 = vpop.f32.mrf.mxu0  ;;  %v7380_v7 = vadd.f32 %v2442_v60, %v2430_v59  ;;  %v6303_v26 = vld [vmem:[#allocation2 + $0x3ec] sm:$0xf]  ;;  %v5633_v28 = vor.u32 %v6405_v13, %v5632_v12  ;;  %v2444_v39 = vpop.f32.mrf.mxu3  ;;  %v5074_v56 = vld [vmem:[#allocation2 + $0x2b8] sm:$0xf0]  ;;  %v4821_v59 = vor.u32 %v6199_v50, %v4818_v51 }
  0xfc   : > { %2684 = vmatpush.bf16.msrb.mxu2 %v5553_v29  ;;  %v4853_v29 = vor.u32 %v6207_v14, %v4850_v16  ;;  %v5237_v41 = vor.u32 %v6303_v26, %v5234_v27  ;;  %v6227_v0 = vld [vmem:[#allocation2 + $0x18c] sm:$0xf]  ;;  %v5061_v14 = vor.u32 %v6259_v3, %v5058_v4  ;;  %v4786_v17 = vld [vmem:[#allocation2 + $0x78] sm:$0xf0] }
  0xfd   : > { %2697 = vmatpush.bf16.msrb.mxu3 %v5681_v35  ;;  %v4834_v35 = vld [vmem:[#allocation2 + $0xd8] sm:$0xf0]  ;;  %v6191_v16 = vld [vmem:[#allocation2 + $0x6c] sm:$0xf] }
  0xfe   : > { %v6287_v26 = vld [vmem:[#allocation2 + $0x36c] sm:$0xf]  ;;  %v5170_v27 = vld [vmem:[#allocation2 + $0x378] sm:$0xf0] }
  0xff   : > { %2659 = vmatpush.bf16.msrb.mxu0 %v5281_v44  ;;  %2672 = vmatpush.bf16.msrb.mxu1 %v5409_v46  ;;  %v5090_v44 = vld [vmem:[#allocation2 + $0x2d8] sm:$0xf0]  ;;  %v6179_v63 = vld [vmem:[#allocation2 + $0xc] sm:$0xf] }
 0x100   : > { %2685 = vmatpush.bf16.msrb.mxu2 %v5537_v47  ;;  %v2431_v30 = vpop.f32.mrf.mxu2  ;;  %v5218_v46 = vld [vmem:[#allocation2 + $0x3d8] sm:$0xf0]  ;;  %v4837_v47 = vor.u32 %v6203_v33, %v4834_v35  ;;  %v5093_v49 = vor.u32 %v6267_v43, %v5090_v44  ;;  %v6219_v35 = vld [vmem:[#allocation2 + $0x14c] sm:$0xf] }
 0x101   : > { %2698 = vmatpush.bf16.msrb.mxu3 %v5665_v52  ;;  %v6231_v52 = vld [vmem:[#allocation2 + $0x1ac] sm:$0xf]  ;;  %v5221_v53 = vor.u32 %v6299_v45, %v5218_v46  ;;  %v4770_v33 = vld [vmem:[#allocation2 + $0x58] sm:$0xf0] }
 0x102   : > { %v4949_v60 = vor.u32 %v6231_v52, %v4946_v54  ;;  %v4898_v39 = vld [vmem:[#allocation2 + $0x158] sm:$0xf0]  ;;  %v6283_v45 = vld [vmem:[#allocation2 + $0x34c] sm:$0xf] }
 0x103   : > { %2660 = vmatpush.bf16.msrb.mxu0 %v5265_v61  ;;  %2673 = vmatpush.bf16.msrb.mxu1 %v5393_v1  ;;  %v5077_v61 = vor.u32 %v6263_v55, %v5074_v56  ;;  %v5205_v1 = vor.u32 %v6295_v57, %v5202_v58  ;;  %v5154_v46 = vld [vmem:[#allocation2 + $0x358] sm:$0xf0]  ;;  %v4901_v50 = vor.u32 %v6219_v35, %v4898_v39  ;;  %v6183_v52 = vld [vmem:[#allocation2 + $0x2c] sm:$0xf] }
 0x104   : > { %2686 = vmatpush.bf16.msrb.mxu2 %v5521_v2  ;;  %v4930_v2 = vld [vmem:[#allocation2 + $0x198] sm:$0xf0]  ;;  %v6215_v54 = vld [vmem:[#allocation2 + $0x12c] sm:$0xf]  ;;  %v5157_v56 = vor.u32 %v6283_v45, %v5154_v46 }
 0x105   : > { %2699 = vmatpush.bf16.msrb.mxu3 %v5649_v10  ;;  %v5186_v10 = vld [vmem:[#allocation2 + $0x398] sm:$0xf0]  ;;  %v4933_v13 = vor.u32 %v6227_v0, %v4930_v2  ;;  %v6247_v58 = vld [vmem:[#allocation2 + $0x22c] sm:$0xf] }
 0x106   : > { %v5189_v21 = vor.u32 %v6291_v5, %v5186_v10  ;;  %v4882_v57 = vld [vmem:[#allocation2 + $0x138] sm:$0xf0]  ;;  %v6211_v3 = vld [vmem:[#allocation2 + $0x10c] sm:$0xf] }
 0x107   : > { %2661 = vmatpush.bf16.msrb.mxu0 %v5249_v18  ;;  %2674 = vmatpush.bf16.msrb.mxu1 %v5377_v23  ;;  %v2455_v12 = vpop.f32.mrf.mxu0  ;;  %v6223_v18 = vld [vmem:[#allocation2 + $0x16c] sm:$0xf]  ;;  %v2468_v20 = vpop.f32.mrf.mxu1  ;;  %v4738_v0 = vld [vmem:[#allocation2 + $0x18] sm:$0xf0] }
 0x108   : > { %2687 = vmatpush.bf16.msrb.mxu2 %v5505_v24  ;;  %v2456_v19 = vadd.f32 %v2455_v12, %v7380_v7  ;;  %v6255_v23 = vld [vmem:[#allocation2 + $0x26c] sm:$0xf]  ;;  %v5042_v24 = vld [vmem:[#allocation2 + $0x278] sm:$0xf0]  ;;  %v4917_v30 = vor.u32 %v6223_v18, %v4914_v22  ;;  %v5173_v7 = vor.u32 %v6287_v26, %v5170_v27 }
 0x109   : > { %2700 = vmatpush.bf16.msrb.mxu3 %v5633_v28  ;;  %v4866_v4 = vld [vmem:[#allocation2 + $0x118] sm:$0xf0]  ;;  %v6243_v5 = vld [vmem:[#allocation2 + $0x20c] sm:$0xf] }
 0x10a   : > { %2662 = vmatmul.bf16.vlgmr.msrb.gmra.mxu0 %v7355_v37  ;;  %2675 = vmatmul.bf16.vlgmr.msrb.gmra.mxu1 %v7359_v40  ;;  %v2469_v28 = vadd.f32 %v2468_v20, %v2456_v19  ;;  %v4994_v12 = vld [vmem:[#allocation2 + $0x218] sm:$0xf0]  ;;  %v6367_v19 = vld [vmem:[#allocation2 + $0x5ec] sm:$0xf]  ;;  %v4741_v20 = vor.u32 %v6179_v63, %v4738_v0 }
 0x10b   : > { %2706 = vmatpush.bf16.msra.mxu0 %v4853_v29  ;;  %2719 = vmatpush.bf16.msra.mxu1 %v4981_v31  ;;  %v4789_v29 = vor.u32 %v6191_v16, %v4786_v17  ;;  %v5045_v31 = vor.u32 %v6255_v23, %v5042_v24  ;;  %v6335_v17 = vld [vmem:[#allocation2 + $0x4ec] sm:$0xf]  ;;  %v5362_v18 = vld [vmem:[#allocation2 + $0x4f8] sm:$0xf0]  ;;  %v4869_v24 = vor.u32 %v6211_v3, %v4866_v4 }
 0x10c   : > { %2732 = vmatpush.bf16.msra.mxu2 %v5109_v32  ;;  %2701 = vmatmul.bf16.vlgmr.msrb.gmra.mxu3 %v7357_v38  ;;  %v6187_v32 = vld [vmem:[#allocation2 + $0x4c] sm:$0xf]  ;;  %v5618_v23 = vld [vmem:[#allocation2 + $0x6f8] sm:$0xf0]  ;;  %v4997_v26 = vor.u32 %v6243_v5, %v4994_v12 }
 0x10d   : > { %2745 = vmatpush.bf16.msra.mxu3 %v5237_v41  ;;  %2688 = vmatmul.bf16.vlgmr.msrb.gmra.mxu2 %v7353_v34  ;;  %v6251_v41 = vld [vmem:[#allocation2 + $0x24c] sm:$0xf]  ;;  %v5346_v35 = vld [vmem:[#allocation2 + $0x4d8] sm:$0xf0] }
 0x10e   : > { %v5029_v51 = vor.u32 %v6251_v41, %v5026_v42  ;;  %v6399_v22 = vld [vmem:[#allocation2 + $0x6ec] sm:$0xf]  ;;  %v5474_v39 = vld [vmem:[#allocation2 + $0x5d8] sm:$0xf0] }
 0x10f   : > { %2707 = vmatpush.bf16.msra.mxu0 %v4837_v47  ;;  %2720 = vmatpush.bf16.msra.mxu1 %v4965_v48  ;;  %v2494_v44 = vpop.f32.mrf.mxu3  ;;  %v4773_v47 = vor.u32 %v6187_v32, %v4770_v33  ;;  %v2470_v55 = vpop.f32.mrf.mxu1  ;;  %v6431_v27 = vld [vmem:[#allocation2 + $0x7ec] sm:$0xf]  ;;  %v5621_v32 = vor.u32 %v6399_v22, %v5618_v23  ;;  %v5602_v42 = vld [vmem:[#allocation2 + $0x6d8] sm:$0xf0] }
 0x110   : > { %2733 = vmatpush.bf16.msra.mxu2 %v5093_v49  ;;  %v2481_v36 = vpop.f32.mrf.mxu2  ;;  %v2457_v49 = vpop.f32.mrf.mxu0  ;;  %v6331_v33 = vld [vmem:[#allocation2 + $0x4cc] sm:$0xf]  ;;  %v5586_v55 = vld [vmem:[#allocation2 + $0x6b8] sm:$0xf0] }
 0x111   : > { %2746 = vmatpush.bf16.msra.mxu3 %v5221_v53  ;;  %v2482_v43 = vadd.f32 %v2481_v36, %v2469_v28  ;;  %v4754_v53 = vld [vmem:[#allocation2 + $0x38] sm:$0xf0]  ;;  %v6363_v36 = vld [vmem:[#allocation2 + $0x5cc] sm:$0xf]  ;;  %v5349_v45 = vor.u32 %v6331_v33, %v5346_v35 }
 0x112   : > { %v4757_v62 = vor.u32 %v6183_v52, %v4754_v53  ;;  %v5746_v28 = vld [vmem:[#allocation2 + $0x7f8] sm:$0xf0]  ;;  %v6395_v41 = vld [vmem:[#allocation2 + $0x6cc] sm:$0xf]  ;;  %v5477_v46 = vor.u32 %v6363_v36, %v5474_v39 }
 0x113   : > { %2708 = vmatpush.bf16.msra.mxu0 %v4821_v59  ;;  %2721 = vmatpush.bf16.msra.mxu1 %v4949_v60  ;;  %v7387_v48 = vadd.f32 %v2494_v44, %v2482_v43  ;;  %v5010_v59 = vld [vmem:[#allocation2 + $0x238] sm:$0xf0]  ;;  %v6279_v60 = vld [vmem:[#allocation2 + $0x32c] sm:$0xf] }
 0x114   : > { %2734 = vmatpush.bf16.msra.mxu2 %v5077_v61  ;;  %v5138_v61 = vld [vmem:[#allocation2 + $0x338] sm:$0xf0]  ;;  %v5013_v2 = vor.u32 %v6247_v58, %v5010_v59  ;;  %v6427_v43 = vld [vmem:[#allocation2 + $0x7cc] sm:$0xf] }
 0x115   : > { %2747 = vmatpush.bf16.msra.mxu3 %v5205_v1  ;;  %v4885_v1 = vor.u32 %v6215_v54, %v4882_v57  ;;  %v5730_v44 = vld [vmem:[#allocation2 + $0x7d8] sm:$0xf0]  ;;  %v6327_v49 = vld [vmem:[#allocation2 + $0x4ac] sm:$0xf] }
 0x116   : > { %v5733_v52 = vor.u32 %v6427_v43, %v5730_v44  ;;  %v5458_v53 = vld [vmem:[#allocation2 + $0x5b8] sm:$0xf0]  ;;  %v6391_v54 = vld [vmem:[#allocation2 + $0x6ac] sm:$0xf] }
 0x117   : > { %2709 = vmatpush.bf16.msra.mxu0 %v4805_v11  ;;  %2722 = vmatpush.bf16.msra.mxu1 %v4933_v13  ;;  %v5141_v11 = vor.u32 %v6279_v60, %v5138_v61  ;;  %v6275_v13 = vld [vmem:[#allocation2 + $0x30c] sm:$0xf]  ;;  %v2496_v16 = vpop.f32.mrf.mxu3  ;;  %v5714_v57 = vld [vmem:[#allocation2 + $0x7b8] sm:$0xf0]  ;;  %v5589_v60 = vor.u32 %v6391_v54, %v5586_v55 }
 0x118   : > { %2735 = vmatpush.bf16.msra.mxu2 %v5061_v14  ;;  %v2483_v10 = vpop.f32.mrf.mxu2  ;;  %v5122_v14 = vld [vmem:[#allocation2 + $0x318] sm:$0xf0]  ;;  %v6323_v61 = vld [vmem:[#allocation2 + $0x48c] sm:$0xf] }
 0x119   : > { %2748 = vmatpush.bf16.msra.mxu3 %v5189_v21  ;;  %v5490_v21 = vld [vmem:[#allocation2 + $0x5f8] sm:$0xf0]  ;;  %v6419_v3 = vld [vmem:[#allocation2 + $0x78c] sm:$0xf] }
 0x11a   : > { %v5442_v0 = vld [vmem:[#allocation2 + $0x598] sm:$0xf0]  ;;  %v6319_v10 = vld [vmem:[#allocation2 + $0x46c] sm:$0xf] }
 0x11b   : > { %2710 = vmatpush.bf16.msra.mxu0 %v4789_v29  ;;  %2723 = vmatpush.bf16.msra.mxu1 %v4917_v30  ;;  %v5125_v29 = vor.u32 %v6275_v13, %v5122_v14  ;;  %v5365_v30 = vor.u32 %v6335_v17, %v5362_v18  ;;  %v6351_v12 = vld [vmem:[#allocation2 + $0x56c] sm:$0xf]  ;;  %v5426_v16 = vld [vmem:[#allocation2 + $0x578] sm:$0xf0] }
 0x11c   : > { %2736 = vmatpush.bf16.msra.mxu2 %v5045_v31  ;;  %v5493_v31 = vor.u32 %v6367_v19, %v5490_v21  ;;  %v6383_v17 = vld [vmem:[#allocation2 + $0x66c] sm:$0xf]  ;;  %v5554_v18 = vld [vmem:[#allocation2 + $0x678] sm:$0xf0]  ;;  %v5429_v22 = vor.u32 %v6351_v12, %v5426_v16 }
 0x11d   : > { %2749 = vmatpush.bf16.msra.mxu3 %v5173_v7  ;;  %v5749_v7 = vor.u32 %v6431_v27, %v5746_v28  ;;  %v6415_v19 = vld [vmem:[#allocation2 + $0x76c] sm:$0xf]  ;;  %v5557_v23 = vor.u32 %v6383_v17, %v5554_v18  ;;  %v5666_v36 = vld [vmem:[#allocation2 + $0x758] sm:$0xf0]  ;;  %v6448_v18 = vld [vmem:[#allocation6 + $0x70] sm:$0xff] }
 0x11e   : > { %v6347_v27 = vld [vmem:[#allocation2 + $0x54c] sm:$0xf]  ;;  %v5266_v44 = vld [vmem:[#allocation2 + $0x438] sm:$0xf0] }
 0x11f   : > { %2711 = vmatpush.bf16.msra.mxu0 %v4773_v47  ;;  %2724 = vmatpush.bf16.msra.mxu1 %v4901_v50  ;;  %v5605_v47 = vor.u32 %v6395_v41, %v5602_v42  ;;  %v5330_v50 = vld [vmem:[#allocation2 + $0x4b8] sm:$0xf0]  ;;  %v6411_v35 = vld [vmem:[#allocation2 + $0x74c] sm:$0xf] }
 0x120   : > { %2737 = vmatpush.bf16.msra.mxu2 %v5029_v51  ;;  %v6359_v51 = vld [vmem:[#allocation2 + $0x5ac] sm:$0xf]  ;;  %v5333_v58 = vor.u32 %v6327_v49, %v5330_v50  ;;  %v5394_v49 = vld [vmem:[#allocation2 + $0x538] sm:$0xf0] }
 0x121   : > { %2750 = vmatpush.bf16.msra.mxu3 %v5157_v56  ;;  %v6423_v56 = vld [vmem:[#allocation2 + $0x7ac] sm:$0xf]  ;;  %v5461_v59 = vor.u32 %v6359_v51, %v5458_v53  ;;  %v5522_v51 = vld [vmem:[#allocation2 + $0x638] sm:$0xf0] }
 0x122   : > { %v5717_v63 = vor.u32 %v6423_v56, %v5714_v57  ;;  %v6311_v43 = vld [vmem:[#allocation2 + $0x42c] sm:$0xf]  ;;  %v5650_v53 = vld [vmem:[#allocation2 + $0x738] sm:$0xf0] }
 0x123   : > { %2712 = vmatpush.bf16.msra.mxu0 %v4757_v62  ;;  %2725 = vmatpush.bf16.msra.mxu1 %v4885_v1  ;;  %v5314_v62 = vld [vmem:[#allocation2 + $0x498] sm:$0xf0]  ;;  %v6387_v1 = vld [vmem:[#allocation2 + $0x68c] sm:$0xf]  ;;  %v5269_v54 = vor.u32 %v6311_v43, %v5266_v44 }
 0x124   : > { %2738 = vmatpush.bf16.msra.mxu2 %v5013_v2  ;;  %v5570_v2 = vld [vmem:[#allocation2 + $0x698] sm:$0xf0]  ;;  %v6375_v50 = vld [vmem:[#allocation2 + $0x62c] sm:$0xf] }
 0x125   : > { %2751 = vmatpush.bf16.msra.mxu3 %v5141_v11  ;;  %v5573_v5 = vor.u32 %v6387_v1, %v5570_v2  ;;  %v5298_v11 = vld [vmem:[#allocation2 + $0x478] sm:$0xf0]  ;;  %v6307_v55 = vld [vmem:[#allocation2 + $0x40c] sm:$0xf]  ;;  %v5525_v57 = vor.u32 %v6375_v50, %v5522_v51  ;;  %v6452_v50 = vld [vmem:[#allocation6 + $0x90] sm:$0xff] }
 0x126   : > { %v5301_v21 = vor.u32 %v6319_v10, %v5298_v11  ;;  %v6403_v2 = vld [vmem:[#allocation2 + $0x70c] sm:$0xf]  ;;  %v6441_v10 = vld [vmem:[#allocation6 + $0x38] sm:$0xff] }
 0x127   : > { %2713 = vmatpush.bf16.msra.mxu0 %v4741_v20  ;;  %2726 = vmatpush.bf16.msra.mxu1 %v4869_v24  ;;  %v7393_v4 = vpop.f32.mrf.mxu0  ;;  %v7395_v13 = vpop.f32.mrf.mxu1  ;;  %v5682_v20 = vld [vmem:[#allocation2 + $0x778] sm:$0xf0]  ;;  %v6315_v24 = vld [vmem:[#allocation2 + $0x44c] sm:$0xf] }
 0x128   : > { %2739 = vmatpush.bf16.msra.mxu2 %v4997_v26  ;;  %v5282_v26 = vld [vmem:[#allocation2 + $0x458] sm:$0xf0] }
 0x129   : > { %2752 = vmatpush.bf16.msra.mxu3 %v5125_v29  ;;  %v5685_v29 = vor.u32 %v6415_v19, %v5682_v20  ;;  %v6449_v12 = vld [vmem:[#allocation6 + $0x78] sm:$0xff]  ;;  %v6439_v19 = vld [vmem:[#allocation6 + $0x28] sm:$0xff] }
 0x12a   : > { %2714 = vmatmul.bf16.vlgmr.msra.gmra.mxu0 %v7337_v9  ;;  %2727 = vmatmul.bf16.vlgmr.msra.gmra.mxu1 %v7346_v25  ;;  %v5698_v9 = vld [vmem:[#allocation2 + $0x798] sm:$0xf0]  ;;  %v6447_v20 = vld [vmem:[#allocation6 + $0x68] sm:$0xff] }
 0x12b   : > { %2758 = vmatpush.bf16.msrb.mxu0 %v5365_v30  ;;  %2771 = vmatpush.bf16.msrb.mxu1 %v5493_v31  ;;  %v5701_v14 = vor.u32 %v6419_v3, %v5698_v9  ;;  %v5410_v30 = vld [vmem:[#allocation2 + $0x558] sm:$0xf0]  ;;  %v6379_v31 = vld [vmem:[#allocation2 + $0x64c] sm:$0xf] }
 0x12c   : > { %2784 = vmatpush.bf16.msrb.mxu2 %v5621_v32  ;;  %2753 = vmatmul.bf16.vlgmr.msra.gmra.mxu3 %v7340_v15  ;;  %v5317_v15 = vor.u32 %v6323_v61, %v5314_v62  ;;  %v5538_v32 = vld [vmem:[#allocation2 + $0x658] sm:$0xf0]  ;;  %v5413_v41 = vor.u32 %v6347_v27, %v5410_v30  ;;  %v6436_v30 = vld [vmem:[#allocation6 + $0x10] sm:$0xff] }
 0x12d   : > { %2797 = vmatpush.bf16.msrb.mxu3 %v5749_v7  ;;  %2740 = vmatmul.bf16.vlgmr.msra.gmra.mxu2 %v7335_v8  ;;  %v6355_v8 = vld [vmem:[#allocation2 + $0x58c] sm:$0xf]  ;;  %v5285_v7 = vor.u32 %v6315_v24, %v5282_v26  ;;  %v5541_v42 = vor.u32 %v6379_v31, %v5538_v32  ;;  %v5634_v3 = vld [vmem:[#allocation2 + $0x718] sm:$0xf0] }
 0x12e   : > { %v5445_v25 = vor.u32 %v6355_v8, %v5442_v0  ;;  %v6371_v8 = vld [vmem:[#allocation2 + $0x60c] sm:$0xf]  ;;  %v1107_v0 = vperm.slane %v7377_v6, 1  ;;  %v6457_v17 = vld [vmem:[#allocation6 + $0xb8] sm:$0xff] }
 0x12f   : > { %2759 = vmatpush.bf16.msrb.mxu0 %v5349_v45  ;;  %2772 = vmatpush.bf16.msrb.mxu1 %v5477_v46  ;;  %v7399_v33 = vpop.f32.mrf.mxu3  ;;  %v2509_v39 = vpop.f32.mrf.mxu0  ;;  %v6343_v45 = vld [vmem:[#allocation2 + $0x52c] sm:$0xf]  ;;  %v6445_v26 = vld [vmem:[#allocation6 + $0x58] sm:$0xff] }
 0x130   : > { %2785 = vmatpush.bf16.msrb.mxu2 %v5605_v47  ;;  %v7397_v28 = vpop.f32.mrf.mxu2  ;;  %v2522_v46 = vpop.f32.mrf.mxu1  ;;  %v5669_v47 = vor.u32 %v6411_v35, %v5666_v36  ;;  %v5397_v56 = vor.u32 %v6343_v45, %v5394_v49  ;;  %v2508_v11 = vadd.f32 %v7393_v4, %v1107_v0  ;;  %v6455_v24 = vld [vmem:[#allocation6 + $0xa8] sm:$0xff]  ;;  %v6453_v36 = vld [vmem:[#allocation6 + $0x98] sm:$0xff]  ;;  %v6434_v45 = vld [vmem:[#allocation6] sm:$0xff]  ;;  %v2810_v49 = vpack.c.bf16 %v7387_v48, %v7387_v48 }
 0x131   : > { %2798 = vmatpush.bf16.msrb.mxu3 %v5733_v52  ;;  %v6407_v52 = vld [vmem:[#allocation2 + $0x72c] sm:$0xf]  ;;  %v6442_v46 = vld [vmem:[#allocation6 + $0x40] sm:$0xff] }
 0x132   : > { %v5653_v62 = vor.u32 %v6407_v52, %v5650_v53  ;;  %v2521_v16 = vadd.f32 %v7395_v13, %v2508_v11  ;;  %v6435_v39 = vld [vmem:[#allocation6 + $0x8] sm:$0xff] }
 0x133   : > { %2760 = vmatpush.bf16.msrb.mxu0 %v5333_v58  ;;  %2773 = vmatpush.bf16.msrb.mxu1 %v5461_v59  ;;  %v5250_v58 = vld [vmem:[#allocation2 + $0x418] sm:$0xf0]  ;;  %v6339_v59 = vld [vmem:[#allocation2 + $0x50c] sm:$0xf] }
 0x134   : > { %2786 = vmatpush.bf16.msrb.mxu2 %v5589_v60  ;;  %v5378_v60 = vld [vmem:[#allocation2 + $0x518] sm:$0xf0]  ;;  %v5253_v9 = vor.u32 %v6307_v55, %v5250_v58  ;;  %v2534_v4 = vadd.f32 %v7397_v28, %v2521_v16  ;;  %v6451_v53 = vld [vmem:[#allocation6 + $0x88] sm:$0xff] }
 0x135   : > { %2799 = vmatpush.bf16.msrb.mxu3 %v5717_v63  ;;  %v5506_v63 = vld [vmem:[#allocation2 + $0x618] sm:$0xf0] }
 0x136   : > { %v2547_v13 = vadd.f32 %v7399_v33, %v2534_v4  ;;  %v6444_v33 = vld [vmem:[#allocation6 + $0x50] sm:$0xff] }
 0x137   : > { %2761 = vmatpush.bf16.msrb.mxu0 %v5317_v15  ;;  %2774 = vmatpush.bf16.msrb.mxu1 %v5445_v25  ;;  %v2548_v1 = vpop.f32.mrf.mxu3  ;;  %v5381_v15 = vor.u32 %v6339_v59, %v5378_v60  ;;  %v5509_v25 = vor.u32 %v6371_v8, %v5506_v63  ;;  %v1108_v59 = vperm.slane %v7377_v6, 2 }
 0x138   : > { %2787 = vmatpush.bf16.msrb.mxu2 %v5573_v5  ;;  %v2535_v61 = vpop.f32.mrf.mxu2  ;;  %v5637_v5 = vor.u32 %v6403_v2, %v5634_v3 }
 0x139   : > { %2800 = vmatpush.bf16.msrb.mxu3 %v5701_v14  ;;  %v6440_v14 = vld [vmem:[#allocation6 + $0x30] sm:$0xff] }
 0x13b   : > { %2762 = vmatpush.bf16.msrb.mxu0 %v5301_v21  ;;  %2775 = vmatpush.bf16.msrb.mxu1 %v5429_v22  ;;  %v6456_v21 = vld [vmem:[#allocation6 + $0xb0] sm:$0xff]  ;;  %v6438_v22 = vld [vmem:[#allocation6 + $0x20] sm:$0xff] }
 0x13c   : > { %2788 = vmatpush.bf16.msrb.mxu2 %v5557_v23  ;;  %v6446_v23 = vld [vmem:[#allocation6 + $0x60] sm:$0xff] }
 0x13d   : > { %2801 = vmatpush.bf16.msrb.mxu3 %v5685_v29  ;;  %v6454_v29 = vld [vmem:[#allocation6 + $0xa0] sm:$0xff] }
 0x13f   : > { %2763 = vmatpush.bf16.msrb.mxu0 %v5285_v7  ;;  %2776 = vmatpush.bf16.msrb.mxu1 %v5413_v41  ;;  %v6443_v41 = vld [vmem:[#allocation6 + $0x48] sm:$0xff] }
 0x140   : > { %2789 = vmatpush.bf16.msrb.mxu2 %v5541_v42 }
 0x141   : > { %2802 = vmatpush.bf16.msrb.mxu3 %v5669_v47 }
 0x143   : > { %2764 = vmatpush.bf16.msrb.mxu0 %v5269_v54  ;;  %2777 = vmatpush.bf16.msrb.mxu1 %v5397_v56 }
 0x144   : > { %2790 = vmatpush.bf16.msrb.mxu2 %v5525_v57  ;;  %v6450_v57 = vld [vmem:[#allocation6 + $0x80] sm:$0xff] }
 0x145   : > { %2803 = vmatpush.bf16.msrb.mxu3 %v5653_v62 }
 0x147   : > { %2765 = vmatpush.bf16.msrb.mxu0 %v5253_v9  ;;  %2778 = vmatpush.bf16.msrb.mxu1 %v5381_v15  ;;  %v6465_v9 = vld [vmem:[#allocation6 + $0xf8] sm:$0xff] }
 0x148   : > { %2791 = vmatpush.bf16.msrb.mxu2 %v5509_v25 }
 0x149   : > { %2804 = vmatpush.bf16.msrb.mxu3 %v5637_v5 }
 0x14a   : > { %2766 = vmatmul.bf16.vlgmr.msrb.gmra.mxu0 %v7355_v37  ;;  %2779 = vmatmul.bf16.vlgmr.msrb.gmra.mxu1 %v7359_v40  ;;  %v2559_v37 = vpop.f32.mrf.mxu0  ;;  %v2572_v40 = vpop.f32.mrf.mxu1 }
 0x14b   : > { %3074 = vmatpush.bf16.msra.mxu0 %v6441_v10  ;;  %3087 = vmatpush.bf16.msra.mxu1 %v6449_v12  ;;  %v6464_v10 = vld [vmem:[#allocation6 + $0xf0] sm:$0xff] }
 0x14c   : > { %2792 = vmatmul.bf16.vlgmr.msrb.gmra.mxu2 %v7353_v34  ;;  %2805 = vmatmul.bf16.vlgmr.msrb.gmra.mxu3 %v7357_v38  ;;  %v6437_v34 = vld [vmem:[#allocation6 + $0x18] sm:$0xff]  ;;  %v2560_v38 = vadd.f32 %v2559_v37, %v2547_v13  ;;  %v6459_v37 = vld [vmem:[#allocation6 + $0xc8] sm:$0xff] }
 0x14d   : > { %3100 = vmatpush.bf16.msra.mxu2 %v6457_v17  ;;  %3113 = vmatpush.bf16.msra.mxu3 %v6465_v9  ;;  %v6463_v17 = vld [vmem:[#allocation6 + $0xe8] sm:$0xff] }
 0x14e   : > { %v2573_v31 = vadd.f32 %v2572_v40, %v2560_v38 }
 0x14f   : > { %3075 = vmatpush.bf16.msra.mxu0 %v6440_v14  ;;  %3088 = vmatpush.bf16.msra.mxu1 %v6448_v18  ;;  %v2598_v28 = vpop.f32.mrf.mxu3 }
 0x150   : > { %v2585_v27 = vpop.f32.mrf.mxu2 }
 0x151   : > { %3101 = vmatpush.bf16.msra.mxu2 %v6456_v21  ;;  %v2586_v7 = vadd.f32 %v2585_v27, %v2573_v31  ;;  %3114 = vmatpush.bf16.msra.mxu3 %v6464_v10  ;;  %v6460_v21 = vld [vmem:[#allocation6 + $0xd0] sm:$0xff] }
 0x152   : > { %v2561_v32 = vpop.f32.mrf.mxu0  ;;  %v2574_v35 = vpop.f32.mrf.mxu1  ;;  %v3226_v10 = vld [vmem:[%s7424_s5 + $0x30] sm:$0xff] }
 0x153   : > { %3076 = vmatpush.bf16.msra.mxu0 %v6439_v19  ;;  %3089 = vmatpush.bf16.msra.mxu1 %v6447_v20  ;;  %v2599_v44 = vadd.f32 %v2598_v28, %v2586_v7  ;;  %v6462_v19 = vld [vmem:[#allocation6 + $0xe0] sm:$0xff]  ;;  %v6461_v20 = vld [vmem:[#allocation6 + $0xd8] sm:$0xff] }
 0x155   : > { %3102 = vmatpush.bf16.msra.mxu2 %v6455_v24  ;;  %v2811_v47 = vpack.c.bf16 %v2599_v44, %v2599_v44  ;;  %3115 = vmatpush.bf16.msra.mxu3 %v6463_v17 }
 0x157   : > { %3077 = vmatpush.bf16.msra.mxu0 %v6438_v22  ;;  %3090 = vmatpush.bf16.msra.mxu1 %v6446_v23  ;;  %v2600_v43 = vpop.f32.mrf.mxu3 }
 0x158   : > { %v2587_v42 = vpop.f32.mrf.mxu2 }
 0x159   : > { %3103 = vmatpush.bf16.msra.mxu2 %v6454_v29  ;;  %3116 = vmatpush.bf16.msra.mxu3 %v6462_v19  ;;  %v3227_v19 = vld [vmem:[%s7424_s5 + $0x38] sm:$0xff] }
 0x15b   : > { %3078 = vmatpush.bf16.msra.mxu0 %v6437_v34  ;;  %3091 = vmatpush.bf16.msra.mxu1 %v6445_v26  ;;  %v6458_v34 = vld [vmem:[#allocation6 + $0xc0] sm:$0xff]  ;;  %v1109_v26 = vperm.slane %v7377_v6, 3 }
 0x15d   : > { %3104 = vmatpush.bf16.msra.mxu2 %v6453_v36  ;;  %3117 = vmatpush.bf16.msra.mxu3 %v6461_v20 }
 0x15f   : > { %3079 = vmatpush.bf16.msra.mxu0 %v6436_v30  ;;  %3092 = vmatpush.bf16.msra.mxu1 %v6444_v33 }
 0x161   : > { %3105 = vmatpush.bf16.msra.mxu2 %v6452_v50  ;;  %3118 = vmatpush.bf16.msra.mxu3 %v6460_v21 }
 0x163   : > { %3080 = vmatpush.bf16.msra.mxu0 %v6435_v39  ;;  %3093 = vmatpush.bf16.msra.mxu1 %v6443_v41 }
 0x165   : > { %3106 = vmatpush.bf16.msra.mxu2 %v6451_v53  ;;  %3119 = vmatpush.bf16.msra.mxu3 %v6459_v37 }
 0x167   : > { %3081 = vmatpush.bf16.msra.mxu0 %v6434_v45  ;;  %3094 = vmatpush.bf16.msra.mxu1 %v6442_v46  ;;  %v2611_v51 = vpop.f32.mrf.mxu0  ;;  %v2624_v52 = vpop.f32.mrf.mxu1 }
 0x168   : > { %v2612_v48 = vadd.f32 %v2611_v51, %v1108_v59  ;;  %v3224_v59 = vld [vmem:[%s7424_s5 + $0x20] sm:$0xff] }
 0x169   : > { %3107 = vmatpush.bf16.msra.mxu2 %v6450_v57  ;;  %3120 = vmatpush.bf16.msra.mxu3 %v6458_v34 }
 0x16a   : > { %3082 = vmatmul.bf16.vlgmr.msra.gmra.mxu0 %v2810_v49  ;;  %3095 = vmatmul.bf16.vlgmr.msra.gmra.mxu1 %v2811_v47  ;;  %v2625_v62 = vadd.f32 %v2624_v52, %v2612_v48  ;;  %v6667_v49 = vld [vmem:[#allocation7] ss:$0 sm:$0xff]  ;;  %v3232_v48 = vadd.f32 1e-20, %v3224_v59 }
 0x16f   : > { %v2650_v55 = vpop.f32.mrf.mxu3  ;;  %v2613_v56 = vpop.f32.mrf.mxu0 }
 0x170   : > { %v2637_v54 = vpop.f32.mrf.mxu2  ;;  %v2626_v58 = vpop.f32.mrf.mxu1 }
 0x171   : > { %v2638_v8 = vadd.f32 %v2637_v54, %v2625_v62  ;;  %v3220_v58 = vld [vmem:[%s7424_s5] sm:$0xff] }
 0x173   : > { %v2651_v63 = vadd.f32 %v2650_v55, %v2638_v8  ;;  %v3221_v8 = vld [vmem:[%s7424_s5 + $0x8] sm:$0xff] }
 0x177   : > { %v2652_v61 = vpop.f32.mrf.mxu3 }
 0x178   : > { %v2639_v60 = vpop.f32.mrf.mxu2  ;;  %v3228_v61 = vadd.f32 1e-20, %v3220_v58 }
 0x179   : > { %v3222_v60 = vld [vmem:[%s7424_s5 + $0x10] sm:$0xff] }
 0x17a   : > { %v3230_v62 = vadd.f32 1e-20, %v3222_v60  ;;  %6669 = vlog2.f32 %v3228_v61  ;;  %v3159_v60 = vld [vmem:[#allocation9 + $0x68] sm:$0xff] }
 0x17b   : > { %6671 = vlog2.f32 %v3232_v48 }
 0x17c   : > { %6673 = vlog2.f32 %v3230_v62 }
 0x187   : > { %v2663_v0 = vpop.f32.mrf.mxu0  ;;  %v2676_v2 = vpop.f32.mrf.mxu1 }
 0x188   : > { %v2664_v1 = vadd.f32 %v2663_v0, %v2651_v63  ;;  %v3225_v63 = vld [vmem:[%s7424_s5 + $0x28] sm:$0xff]  ;;  %v3223_v0 = vld [vmem:[%s7424_s5 + $0x18] sm:$0xff] }
 0x18a   : > { %v2677_v3 = vadd.f32 %v2676_v2, %v2664_v1  ;;  %v3229_v1 = vadd.f32 1e-20, %v3221_v8 }
 0x18c   : > { %6675 = vlog2.f32 %v3229_v1 }
 0x18f   : > { %v2702_v5 = vpop.f32.mrf.mxu3  ;;  %v2665_v12 = vpop.f32.mrf.mxu0 }
 0x190   : > { %v2689_v15 = vpop.f32.mrf.mxu2  ;;  %v2678_v14 = vpop.f32.mrf.mxu1 }
 0x191   : > { %v2690_v25 = vadd.f32 %v2689_v15, %v2677_v3  ;;  %v3233_v3 = vadd.f32 1e-20, %v3225_v63  ;;  %v3231_v15 = vadd.f32 1e-20, %v3223_v0  ;;  %v3158_v0 = vld [vmem:[#allocation9 + $0x60] sm:$0xff] }
 0x193   : > { %v2703_v11 = vadd.f32 %v2702_v5, %v2690_v25  ;;  %v6670_v5 = vpop.eup %6669  ;;  %6677 = vlog2.f32 %v3233_v3 }
 0x194   : > { %6679 = vlog2.f32 %v3231_v15  ;;  %v3237_v17 = vmul.f32 0.6931472, %v6670_v5  ;;  %v3157_v5 = vld [vmem:[#allocation9 + $0x58] sm:$0xff] }
 0x195   : > { %v2812_v16 = vpack.c.bf16 %v2703_v11, %v2703_v11  ;;  %v6672_v11 = vpop.eup %6671 }
 0x196   : > { %v6674_v14 = vpop.eup %6673  ;;  %v3252_v37 = vsub.f32 0.0, %v3237_v17 }
 0x197   : > { %3108 = vmatmul.bf16.vlgmr.msra.gmra.mxu2 %v2812_v16  ;;  %v2704_v4 = vpop.f32.mrf.mxu3  ;;  %v3241_v20 = vmul.f32 0.6931472, %v6674_v14  ;;  %v6676_v21 = vpop.eup %6675 }
 0x198   : > { %v2691_v18 = vpop.f32.mrf.mxu2  ;;  %v3245_v4 = vmul.f32 0.6931472, %v6672_v11 }
 0x199   : > { %v3234_v18 = vadd.f32 1e-20, %v3226_v10 }
 0x19a   : > { %v3256_v34 = vsub.f32 0.0, %v3245_v4  ;;  %v3156_v4 = vld [vmem:[#allocation9 + $0x50] sm:$0xff] }
 0x1a7   : > { %v2715_v13 = vpop.f32.mrf.mxu0  ;;  %v2728_v22 = vpop.f32.mrf.mxu1 }
 0x1a8   : > { %v2716_v29 = vadd.f32 %v2715_v13, %v1109_v26 }
 0x1aa   : > { %v2729_v30 = vadd.f32 %v2728_v22, %v2716_v29  ;;  %v6678_v22 = vpop.eup %6677 }
 0x1ab   : > { %v3247_v26 = vmul.f32 0.6931472, %v6678_v22 }
 0x1af   : > { %v2754_v40 = vpop.f32.mrf.mxu3  ;;  %v2717_v38 = vpop.f32.mrf.mxu0 }
 0x1b0   : > { %v2741_v23 = vpop.f32.mrf.mxu2  ;;  %v2730_v24 = vpop.f32.mrf.mxu1  ;;  %v3254_v38 = vsub.f32 0.0, %v3241_v20 }
 0x1b1   : > { %v2742_v31 = vadd.f32 %v2741_v23, %v2729_v30  ;;  %v3235_v23 = vadd.f32 1e-20, %v3227_v19  ;;  %v3239_v24 = vmul.f32 0.6931472, %v6676_v21 }
 0x1b3   : > { %v2755_v32 = vadd.f32 %v2754_v40, %v2742_v31  ;;  %v6680_v40 = vpop.eup %6679  ;;  %v3264_v31 = vadd.f32 1e-20, %v3256_v34 }
 0x1b4   : > { %v3243_v29 = vmul.f32 0.6931472, %v6680_v40  ;;  %v3155_v40 = vld [vmem:[#allocation9 + $0x48] sm:$0xff] }
 0x1b7   : > { %v2756_v28 = vpop.f32.mrf.mxu3 }
 0x1b8   : > { %v2743_v27 = vpop.f32.mrf.mxu2  ;;  %v3260_v28 = vadd.f32 1e-20, %v3252_v37 }
 0x1c7   : > { %v2767_v33 = vpop.f32.mrf.mxu0  ;;  %v2780_v35 = vpop.f32.mrf.mxu1 }
 0x1c8   : > { %v2768_v36 = vadd.f32 %v2767_v33, %v2755_v32  ;;  %v3262_v33 = vadd.f32 1e-20, %v3254_v38 }
 0x1ca   : > { %v2781_v7 = vadd.f32 %v2780_v35, %v2768_v36  ;;  %v3253_v35 = vsub.f32 0.0, %v3239_v24  ;;  %v3257_v36 = vsub.f32 0.0, %v3247_v26 }
 0x1cf   : > { %v2793_v39 = vpop.f32.mrf.mxu2  ;;  %v2806_v42 = vpop.f32.mrf.mxu3 }
 0x1d0   : > { %v2794_v41 = vadd.f32 %v2793_v39, %v2781_v7  ;;  %v2769_v43 = vpop.f32.mrf.mxu0  ;;  %v2782_v44 = vpop.f32.mrf.mxu1  ;;  %v3255_v7 = vsub.f32 0.0, %v3243_v29  ;;  %v3154_v29 = vld [vmem:[#allocation9 + $0x40] sm:$0xff] }
 0x1d1   : > { %v3265_v43 = vadd.f32 1e-20, %v3257_v36 }
 0x1d2   : > { %v2807_v45 = vadd.f32 %v2806_v42, %v2794_v41  ;;  %v3261_v42 = vadd.f32 1e-20, %v3253_v35  ;;  %v3263_v44 = vadd.f32 1e-20, %v3255_v7 }
 0x1d4   : > { %v2813_v46 = vpack.c.bf16 %v2807_v45, %v2807_v45 }
 0x1d6   : > { %3121 = vmatmul.bf16.vlgmr.msra.gmra.mxu3 %v2813_v46  ;;  %v3162_v46 = vlaneseq }
 0x1d7   : > { %v2795_v6 = vpop.f32.mrf.mxu2  ;;  %v2808_v47 = vpop.f32.mrf.mxu3 }
 0x1e7   : > { %v3083_v50 = vpop.f32.mrf.mxu0  ;;  %v3096_v52 = vpop.f32.mrf.mxu1 }
 0x1e8   : > { %v3084_v51 = vadd.f32 %v6667_v49, %v3083_v50 }
 0x1ea   : > { %v3097_v53 = vadd.f32 %v3096_v52, %v3084_v51  ;;  %v3161_v52 = vld [vmem:[#allocation9 + $0x78] sm:$0xff] }
 0x1eb   : > { %3380 = vmatpush.msrb.mxu1 %v3161_v52  ;;  %3184 = vmatpush.msrb.mxu0 %v3161_v52 }
 0x1ef   : > { %v3085_v54 = vpop.f32.mrf.mxu0  ;;  %v3098_v55 = vpop.f32.mrf.mxu1 }
 0x21a   : > { %v3109_v56 = vpop.f32.mrf.mxu2 }
 0x21b   : > { %v3110_v2 = vadd.f32 %v3109_v56, %v3097_v53  ;;  %v3160_v53 = vld [vmem:[#allocation9 + $0x70] sm:$0xff] }
 0x21c   : > { %3381 = vmatpush.msrb.mxu1 %v3160_v53  ;;  %3185 = vmatpush.msrb.mxu0 %v3160_v53 }
 0x21e   : > { %3382 = vmatpush.msrb.mxu1 %v3159_v60  ;;  %3186 = vmatpush.msrb.mxu0 %v3159_v60 }
 0x220   : > { %3383 = vmatpush.msrb.mxu1 %v3158_v0  ;;  %3187 = vmatpush.msrb.mxu0 %v3158_v0  ;;  %v3151_v0 = vld [vmem:[#allocation9 + $0x28] sm:$0xff] }
 0x222   : > { %v3111_v57 = vpop.f32.mrf.mxu2  ;;  %3384 = vmatpush.msrb.mxu1 %v3157_v5  ;;  %3188 = vmatpush.msrb.mxu0 %v3157_v5 }
 0x223   : > { %v3163_v57 = vand.u32 127, %v3162_v46  ;;  %v3152_v46 = vld [vmem:[#allocation9 + $0x30] sm:$0xff] }
 0x224   : > { %3385 = vmatpush.msrb.mxu1 %v3156_v4  ;;  %3189 = vmatpush.msrb.mxu0 %v3156_v4 }
 0x225   : > { %v3168_v15 = vand.u32 15, %v3163_v57 }
 0x226   : > { %3386 = vmatpush.msrb.mxu1 %v3155_v40  ;;  %3190 = vmatpush.msrb.mxu0 %v3155_v40 }
 0x227   : > { %vm7450_vm4 = vcmp.lt.s32.totalorder %v3168_v15, 11  ;;  %v3146_v15 = vld [vmem:[#allocation9] sm:$0xff] }
 0x228   : > { %3387 = vmatpush.msrb.mxu1 %v3154_v29  ;;  %3191 = vmatpush.msrb.mxu0 %v3154_v29 }
 0x259   : > { %v3122_v9 = vpop.f32.mrf.mxu3 }
 0x25a   : > { %v3123_v25 = vadd.f32 %v3122_v9, %v3110_v2 }
 0x25c   : > { %v3126_v12 = vsub.f32 0.0, %v3123_v25 }
 0x25e   : > { %v3127_v16 = vmul.f32 1.442695, %v3126_v12 }
 0x260   : > { %6681 = vpow2.f32 %v3127_v16 }
 0x261   : > { %v3124_v13 = vpop.f32.mrf.mxu3  ;;  %6683 = vlog2.f32 %v3234_v18 }
 0x262   : > { %6685 = vlog2.f32 %v3235_v23 }
 0x266   : > { %v6682_v27 = vpop.eup %6681 }
 0x267   : > { %v3129_v30 = vadd.f32 1.0, %v6682_v27  ;;  %v6684_v32 = vpop.eup %6683  ;;  %v6504_v27 = vld [vmem:[#allocation13 + $0x70] sm:$0xff] }
 0x268   : > { %v3249_v39 = vmul.f32 0.6931472, %v6684_v32  ;;  %v6686_v41 = vpop.eup %6685 }
 0x269   : > { %6687 = vrcp.f32 %v3129_v30  ;;  %v3251_v47 = vmul.f32 0.6931472, %v6686_v41  ;;  %v3141_v56 = vand.u32 2147483648, %v3129_v30  ;;  %v3139_v48 = vand.u32 2147483647, %v3129_v30 }
 0x26a   : > { %6689 = vlog2.f32 %v3260_v28  ;;  %v3258_v6 = vsub.f32 0.0, %v3249_v39  ;;  %vm3135_vm1 = vweird.f32 %v3129_v30  ;;  %v3153_v39 = vld [vmem:[#allocation9 + $0x38] sm:$0xff] }
 0x26b   : > { %6691 = vlog2.f32 %v3264_v31  ;;  %v3259_v59 = vsub.f32 0.0, %v3251_v47  ;;  %v3142_v9 = vor.u32 1.1754944e-38, %v3141_v56  ;;  %vm3140_vm3 = vcmp.eq.f32.partialorder %v3139_v48, 8.507059e+37  ;;  %3388 = vmatpush.msrb.mxu1 %v3153_v39  ;;  %3192 = vmatpush.msrb.mxu0 %v3153_v39  ;;  %v5981_v39 = vld [vmem:[#allocation10 + $0xb0] sm:$0xf] }
 0x26c   : > { %6693 = vlog2.f32 %v3262_v33  ;;  %v3266_v58 = vadd.f32 1e-20, %v3258_v6 }
 0x26d   : > { %6695 = vlog2.f32 %v3261_v42  ;;  %v3267_v25 = vadd.f32 1e-20, %v3259_v59  ;;  %3389 = vmatpush.msrb.mxu1 %v3152_v46  ;;  %3193 = vmatpush.msrb.mxu0 %v3152_v46 }
 0x26e   : > { %6697 = vlog2.f32 %v3265_v43 }
 0x26f   : > { %v6688_v45 = vpop.eup %6687  ;;  %6699 = vlog2.f32 %v3263_v44  ;;  %3390 = vmatpush.msrb.mxu1 %v3151_v0  ;;  %3194 = vmatpush.msrb.mxu0 %v3151_v0  ;;  %v6481_v0 = vld [vmem:[#allocation10 + $0x7c] sm:$0xf] }
 0x270   : > { %v6690_v49 = vpop.eup %6689  ;;  %v3131_v50 = vmul.f32 %v6688_v45, %v3129_v30  ;;  %vm3136_vm0 = vweird.f32 %v6688_v45  ;;  %6701 = vlog2.f32 %v3266_v58 }
 0x271   : > { %v6692_v51 = vpop.eup %6691  ;;  %v3269_v62 = vmul.f32 0.6931472, %v6690_v49  ;;  %vm3137_vm2 = vmor %vm3135_vm1, %vm3136_vm0  ;;  %6703 = vlog2.f32 %v3267_v25 }
 0x272   : > { %v6694_v54 = vpop.eup %6693  ;;  %v3132_v55 = vsub.f32 1.0, %v3131_v50  ;;  %v3277_v8 = vmul.f32 0.6931472, %v6692_v51 }
 0x273   : > { %v3273_v63 = vmul.f32 0.6931472, %v6694_v54  ;;  %v6696_v1 = vpop.eup %6695  ;;  %v3284_v12 = vsub.f32 0.0, %v3269_v62 }
 0x274   : > { %v3133_v61 = vmul.f32 %v6688_v45, %v3132_v55  ;;  %v6698_v3 = vpop.eup %6697  ;;  %v3288_v16 = vsub.f32 0.0, %v3277_v8  ;;  %v3271_v18 = vmul.f32 0.6931472, %v6696_v1  ;;  %v3150_v1 = vld [vmem:[#allocation9 + $0x20] sm:$0xff] }
 0x275   : > { %v6700_v10 = vpop.eup %6699  ;;  %v3286_v17 = vsub.f32 0.0, %v3273_v63  ;;  %v3279_v22 = vmul.f32 0.6931472, %v6698_v3  ;;  %3391 = vmatpush.msrb.mxu1 %v3150_v1  ;;  %3195 = vmatpush.msrb.mxu0 %v3150_v1  ;;  %v3148_v3 = vld [vmem:[#allocation9 + $0x10] sm:$0xff] }
 0x276   : > { %v3134_v2 = vadd.f32 %v6688_v45, %v3133_v61  ;;  %v3275_v23 = vmul.f32 0.6931472, %v6700_v10  ;;  %v3285_v28 = vsub.f32 0.0, %v3271_v18  ;;  %v6702_v30 = vpop.eup %6701 }
 0x277   : > { %v3289_v36 = vsub.f32 0.0, %v3279_v22  ;;  %v3281_v47 = vmul.f32 0.6931472, %v6702_v30 }
 0x278   : > { %v3138_v11 = vsel %vm3137_vm2, %v6688_v45, %v3134_v2  ;;  %v3287_v7 = vsub.f32 0.0, %v3275_v23  ;;  %v6704_v45 = vpop.eup %6703  ;;  %v3149_v2 = vld [vmem:[#allocation9 + $0x18] sm:$0xff] }
 0x279   : > { %v7441_v14 = vsel %vm3140_vm3, %v3142_v9, %v3138_v11  ;;  %v3283_v52 = vmul.f32 0.6931472, %v6704_v45  ;;  %v3290_v55 = vsub.f32 0.0, %v3281_v47  ;;  %3392 = vmatpush.msrb.mxu1 %v3149_v2  ;;  %3196 = vmatpush.msrb.mxu0 %v3149_v2  ;;  %v3147_v9 = vld [vmem:[#allocation9 + $0x8] sm:$0xff] }
 0x27a   : > { %v3300_v19 = vperm.slane %v7441_v14, 0  ;;  %v3296_v20 = vrot.slane %v7441_v14, 4  ;;  %v3294_v21 = vrot.slane %v7441_v14, 2  ;;  %v3293_v13 = vrot.slane %v7441_v14, 1  ;;  %3145 = vst [vmem:[%s803_s29] sm:$0xff] %v7441_v14  ;;  %v5951_v2 = vld [vmem:[#allocation10 + $0x84] sm:$0xf0] }
 0x27b   : > { %v3297_v37 = vrot.slane %v7441_v14, 5  ;;  %v3295_v26 = vrot.slane %v7441_v14, 3  ;;  %v3298_v49 = vrot.slane %v7441_v14, 6  ;;  %v3299_v53 = vrot.slane %v7441_v14, 7  ;;  %3393 = vmatpush.msrb.mxu1 %v3148_v3  ;;  %3197 = vmatpush.msrb.mxu0 %v3148_v3  ;;  %v5957_v3 = vld [vmem:[#allocation10 + $0x80] sm:$0xf] }
 0x27c   : > { %v3316_v34 = vadd.f32 %v3300_v19, %v3284_v12  ;;  %v3304_v38 = vperm.slane %v3296_v20, 0  ;;  %v3302_v24 = vperm.slane %v3294_v21, 0  ;;  %v3301_v35 = vperm.slane %v3293_v13, 0 }
 0x27d   : > { %v3305_v43 = vperm.slane %v3297_v37, 0  ;;  %v3303_v44 = vperm.slane %v3295_v26, 0  ;;  %v3306_v56 = vperm.slane %v3298_v49, 0  ;;  %v3291_v59 = vsub.f32 0.0, %v3283_v52  ;;  %3394 = vmatpush.msrb.mxu1 %v3147_v9  ;;  %3198 = vmatpush.msrb.mxu0 %v3147_v9  ;;  %v6483_v9 = vld [vmem:[#allocation10 + $0x88] sm:$0xf0] }
 0x27e   : > { %v7456_v31 = vsel %vm7450_vm4, %v3316_v34, -1e+30  ;;  %v3320_v32 = vadd.f32 %v3304_v38, %v3288_v16  ;;  %v3318_v33 = vadd.f32 %v3302_v24, %v3286_v17  ;;  %v3317_v6 = vadd.f32 %v3301_v35, %v3285_v28 }
 0x27f   : > { %3332 = vmax.xlane.f32.xlu0 %v7456_v31  ;;  %v3321_v50 = vadd.f32 %v3305_v43, %v3289_v36  ;;  %v3319_v51 = vadd.f32 %v3303_v44, %v3287_v7  ;;  %v3307_v60 = vperm.slane %v3299_v53, 0  ;;  %v3322_v61 = vadd.f32 %v3306_v56, %v3290_v55  ;;  %3395 = vmatpush.msrb.mxu1 %v3146_v15  ;;  %v5975_v7 = vld [vmem:[#allocation10 + $0xb4] sm:$0xf0]  ;;  %v5961_v55 = vld [vmem:[#allocation10 + $0x90] sm:$0xf] }
 0x280   : > { %v7461_v41 = vsel %vm7450_vm4, %v3320_v32, -1e+30  ;;  %v7465_v42 = vsel %vm7450_vm4, %v3318_v33, -1e+30  ;;  %v3325_v54 = vsel %vm7450_vm4, %v3317_v6, -1e+30  ;;  %3199 = vmatpush.msrb.mxu0 %v3146_v15  ;;  %v5954_v15 = vor.u32 %v6481_v0, %v5951_v2 }
 0x281   : > { %3340 = vmax.xlane.f32.xlu2 %v7461_v41  ;;  %3336 = vmax.xlane.f32.xlu1 %v7465_v42  ;;  %v7475_v57 = vsel %vm7450_vm4, %v3321_v50, -1e+30  ;;  %v3327_v58 = vsel %vm7450_vm4, %v3319_v51, -1e+30  ;;  %v3323_v48 = vadd.f32 %v3307_v60, %v3291_v59  ;;  %v7482_v62 = vsel %vm7450_vm4, %v3322_v61, -1e+30 }
 0x282   : > { %v3177_v63 = vsel %vm7450_vm4, %v7441_v14, -1e+30  ;;  %v6488_v32 = vld [vmem:[#allocation10 + $0xb0] sm:$0xf0]  ;;  %v6487_v33 = vld [vmem:[#allocation10 + $0xac] sm:$0xf] }
 0x283   : > { %v7487_v8 = vsel %vm7450_vm4, %v3323_v48, -1e+30  ;;  %v6485_v56 = vld [vmem:[#allocation10 + $0x98] sm:$0xf0]  ;;  %v5963_v59 = vld [vmem:[#allocation10 + $0x9c] sm:$0xf0] }
 0x284   : > { %v5969_v60 = vld [vmem:[#allocation10 + $0x98] sm:$0xf]  ;;  %v6486_v61 = vld [vmem:[#allocation10 + $0xa0] sm:$0xf0] }
 0x287   : > { %3334 = vmax.xlane.f32.xlu0 %v3325_v54 }
 0x289   : > { %3342 = vmax.xlane.f32.xlu2 %v7475_v57  ;;  %3338 = vmax.xlane.f32.xlu1 %v3327_v58 }
 0x28f   : > { %3344 = vmax.xlane.f32.xlu0 %v7482_v62 }
 0x291   : > { %3346 = vmax.xlane.f32.xlu1 %v7487_v8  ;;  %3178 = vmax.xlane.f32.xlu2 %v3177_v63 }
 0x2f2   : > { %v3333_v25 = vpop.xlane.xlu0 %3332 }
 0x2f3   : > { %v3348_v5 = vsub.f32 %v7456_v31, %v3333_v25  ;;  %v5973_v31 = vld [vmem:[#allocation10 + $0xa8] sm:$0xf]  ;;  %v5958_v25 = vor.u32 %v6483_v9, %v5957_v3 }
 0x2f4   : > { %v3341_v10 = vpop.xlane.xlu2 %3340  ;;  %v3337_v12 = vpop.xlane.xlu1 %3336  ;;  %v5974_v36 = vor.u32 %v6488_v32, %v5973_v31  ;;  %v5913_v31 = vld [vmem:[#allocation10 + $0x30] sm:$0xf]  ;;  %v6473_v32 = vld [vmem:[#allocation10 + $0x38] sm:$0xf0] }
 0x2f5   : > { %v3356_v11 = vmul.f32 1.442695, %v3348_v5  ;;  %v3350_v20 = vsub.f32 %v7465_v42, %v3337_v12  ;;  %v3352_v26 = vsub.f32 %v7461_v41, %v3341_v10  ;;  %v6489_v41 = vld [vmem:[#allocation10 + $0xb8] sm:$0xf0]  ;;  %v5978_v42 = vor.u32 %v6487_v33, %v5975_v7  ;;  %v5937_v5 = vld [vmem:[#allocation10 + $0x60] sm:$0xf] }
 0x2f6   : > { %v5982_v43 = vor.u32 %v6489_v41, %v5981_v39  ;;  %3721 = vmatpush.bf16.msrb.mxu2 %v5974_v36  ;;  %v6479_v10 = vld [vmem:[#allocation10 + $0x68] sm:$0xf0]  ;;  %v6472_v33 = vld [vmem:[#allocation10 + $0x34] sm:$0xf]  ;;  %v5915_v36 = vld [vmem:[#allocation10 + $0x3c] sm:$0xf0] }
 0x2f7   : > { %6705 = vpow2.f32 %v3356_v11  ;;  %v3360_v21 = vmul.f32 1.442695, %v3350_v20  ;;  %v3364_v29 = vmul.f32 1.442695, %v3352_v26  ;;  %3750 = vmatpush.bf16.msrb.mxu3 %v5978_v42  ;;  %v6478_v11 = vld [vmem:[#allocation10 + $0x64] sm:$0xf]  ;;  %v5938_v12 = vor.u32 %v6479_v10, %v5937_v5 }
 0x2f8   : > { %3779 = vmatpush.bf16.msra.mxu0 %v5982_v43  ;;  %v5921_v7 = vld [vmem:[#allocation10 + $0x38] sm:$0xf]  ;;  %v6474_v39 = vld [vmem:[#allocation10 + $0x40] sm:$0xf0]  ;;  %v5918_v41 = vor.u32 %v6472_v33, %v5915_v36 }
 0x2f9   : > { %v5922_v42 = vor.u32 %v6474_v39, %v5921_v7  ;;  %v5901_v43 = vld [vmem:[#allocation10 + $0x18] sm:$0xf] }
 0x2fa   : > { %v3335_v16 = vpop.xlane.xlu0 %3334 }
 0x2fb   : > { %v3349_v17 = vsub.f32 %v3325_v54, %v3335_v16  ;;  %v5939_v16 = vld [vmem:[#allocation10 + $0x6c] sm:$0xf0] }
 0x2fc   : > { %v3343_v18 = vpop.xlane.xlu2 %3342  ;;  %v3339_v13 = vpop.xlane.xlu1 %3338 }
 0x2fd   : > { %v7494_v4 = vpop.eup %6705  ;;  %v3358_v19 = vmul.f32 1.442695, %v3349_v17  ;;  %v3351_v40 = vsub.f32 %v3327_v58, %v3339_v13  ;;  %v3353_v35 = vsub.f32 %v7475_v57, %v3343_v18  ;;  %v6484_v57 = vld [vmem:[#allocation10 + $0x94] sm:$0xf]  ;;  %v5962_v58 = vor.u32 %v6485_v56, %v5961_v55  ;;  %v5945_v17 = vld [vmem:[#allocation10 + $0x68] sm:$0xf] }
 0x2fe   : > { %5879 = vmatmul.msk.f32.vlgmr.msrb.gmra.mxu1 %vm7450_vm4, %v7494_v4  ;;  %v5966_v48 = vor.u32 %v6484_v57, %v5963_v59  ;;  %v6480_v18 = vld [vmem:[#allocation10 + $0x70] sm:$0xf0]  ;;  %v5889_v57 = vld [vmem:[#allocation10] sm:$0xf]  ;;  %v6466_v59 = vld [vmem:[#allocation10 + $0x4] sm:$0xf] }
 0x2ff   : > { %6707 = vpow2.f32 %v3358_v19  ;;  %v3362_v38 = vmul.f32 1.442695, %v3351_v40  ;;  %v3366_v44 = vmul.f32 1.442695, %v3353_v35  ;;  %3722 = vmatpush.bf16.msrb.mxu2 %v5962_v58  ;;  %v5942_v19 = vor.u32 %v6478_v11, %v5939_v16  ;;  %v6476_v13 = vld [vmem:[#allocation10 + $0x50] sm:$0xf0] }
 0x300   : > { %6709 = vpow2.f32 %v3360_v21  ;;  %3751 = vmatpush.bf16.msrb.mxu3 %v5966_v48  ;;  %v5946_v20 = vor.u32 %v6480_v18, %v5945_v17  ;;  %v5925_v21 = vld [vmem:[#allocation10 + $0x48] sm:$0xf]  ;;  %v5927_v40 = vld [vmem:[#allocation10 + $0x54] sm:$0xf0]  ;;  %v5914_v35 = vor.u32 %v6473_v32, %v5913_v31  ;;  %v6467_v58 = vld [vmem:[#allocation10 + $0x8] sm:$0xf0] }
 0x301   : > { %v3372_v18 = vsel %vm7450_vm4, %v7494_v4, 0.0 }
 0x302   : > { %v3345_v45 = vpop.xlane.xlu0 %3344 }
 0x303   : > { %v3354_v6 = vsub.f32 %v7482_v62, %v3345_v45  ;;  %v5970_v62 = vor.u32 %v6486_v61, %v5969_v60  ;;  %v6469_v45 = vld [vmem:[#allocation10 + $0x1c] sm:$0xf]  ;;  %v5891_v60 = vld [vmem:[#allocation10 + $0xc] sm:$0xf0]  ;;  %v5890_v61 = vor.u32 %v6467_v58, %v5889_v57 }
 0x304   : > { %v3179_v22 = vpop.xlane.xlu2 %3178  ;;  %v3347_v49 = vpop.xlane.xlu1 %3346  ;;  %3752 = vmatpush.bf16.msrb.mxu3 %v5954_v15  ;;  %v5894_v48 = vor.u32 %v6466_v59, %v5891_v60  ;;  %v6515_v59 = vld [vmem:[#allocation16 + $0x8] sm:$0xf0] }
 0x305   : > { %v7500_v37 = vpop.eup %6707  ;;  %v3180_v23 = vsub.f32 %v3177_v63, %v3179_v22  ;;  %v3368_v47 = vmul.f32 1.442695, %v3354_v6  ;;  %v3355_v51 = vsub.f32 %v7487_v8, %v3347_v49  ;;  %3780 = vmatpush.bf16.msra.mxu0 %v5970_v62  ;;  %v5949_v8 = vld [vmem:[#allocation10 + $0x78] sm:$0xf]  ;;  %v6482_v63 = vld [vmem:[#allocation10 + $0x80] sm:$0xf0] }
 0x306   : > { %5880 = vmatmul.msk.f32.gmra.mxu1 %vm7450_vm4, %v7500_v37  ;;  %v7505_v24 = vpop.eup %6709  ;;  %v5950_v1 = vor.u32 %v6482_v63, %v5949_v8  ;;  %v6475_v22 = vld [vmem:[#allocation10 + $0x4c] sm:$0xf]  ;;  %v5909_v49 = vld [vmem:[#allocation10 + $0x20] sm:$0xf]  ;;  %v5897_v62 = vld [vmem:[#allocation10 + $0x8] sm:$0xf] }
 0x307   : > { %v3181_v34 = vmul.f32 1.442695, %v3180_v23  ;;  %v3370_v52 = vmul.f32 1.442695, %v3355_v51  ;;  %v5926_v23 = vor.u32 %v6476_v13, %v5925_v21  ;;  %v5930_v26 = vor.u32 %v6475_v22, %v5927_v40  ;;  %v6471_v51 = vld [vmem:[#allocation10 + $0x28] sm:$0xf0] }
 0x308   : > { %3723 = vmatpush.bf16.msrb.mxu2 %v5950_v1  ;;  %3753 = vmatpush.bf16.msrb.mxu3 %v5942_v19  ;;  %v5910_v55 = vor.u32 %v6471_v51, %v5909_v49  ;;  %v6468_v8 = vld [vmem:[#allocation10 + $0x10] sm:$0xf0] }
 0x309   : > { %6711 = vpow2.f32 %v3181_v34  ;;  %3781 = vmatpush.bf16.msra.mxu0 %v5958_v25  ;;  %v5933_v34 = vld [vmem:[#allocation10 + $0x50] sm:$0xf]  ;;  %v5898_v63 = vor.u32 %v6468_v8, %v5897_v62  ;;  %v6530_v62 = vld [vmem:[#allocation16 + $0x80] sm:$0xf0] }
 0x30a   : > { %6713 = vpow2.f32 %v3362_v38  ;;  %v6477_v38 = vld [vmem:[#allocation10 + $0x58] sm:$0xf0] }
 0x30b   : > { %6715 = vpow2.f32 %v3364_v29  ;;  %v5934_v29 = vor.u32 %v6477_v38, %v5933_v34  ;;  %v6165_v38 = vld [vmem:[#allocation16 + $0xa8] sm:$0xf] }
 0x30c   : > { %6717 = vpow2.f32 %v3366_v44  ;;  %3724 = vmatpush.bf16.msrb.mxu2 %v5938_v12  ;;  %3754 = vmatpush.bf16.msrb.mxu3 %v5930_v26  ;;  %v6470_v44 = vld [vmem:[#allocation10 + $0x20] sm:$0xf0]  ;;  %v6536_v26 = vld [vmem:[#allocation16 + $0xb0] sm:$0xf0] }
 0x30d   : > { %6719 = vpow2.f32 %v3368_v47  ;;  %3782 = vmatpush.bf16.msra.mxu0 %v5946_v20  ;;  %v5902_v6 = vor.u32 %v6470_v44, %v5901_v43  ;;  %v5903_v47 = vld [vmem:[#allocation10 + $0x24] sm:$0xf0]  ;;  %v6153_v44 = vld [vmem:[#allocation16 + $0x90] sm:$0xf] }
 0x30e   : > { %5881 = vmatmul.msk.f32.gmra.mxu1 %vm7450_vm4, %v7505_v24  ;;  %6721 = vpow2.f32 %v3370_v52  ;;  %v5906_v52 = vor.u32 %v6469_v45, %v5903_v47  ;;  %v6533_v45 = vld [vmem:[#allocation16 + $0x98] sm:$0xf0] }
 0x30f   : > { %v7511_v28 = vpop.eup %6711  ;;  %v6154_v49 = vor.u32 %v6533_v45, %v6153_v44 }
 0x310   : > { %5878 = vmatmul.msk.f32.vlgmr.msrb.gmra.mxu0 %vm7450_vm4, %v7511_v28  ;;  %v7516_v30 = vpop.eup %6713  ;;  %3725 = vmatpush.bf16.msrb.mxu2 %v5926_v23 }
 0x311   : > { %v7522_v46 = vpop.eup %6715  ;;  %3783 = vmatpush.bf16.msra.mxu0 %v5934_v29  ;;  %3755 = vmatpush.bf16.msrb.mxu3 %v5918_v41  ;;  %v3373_v41 = vsel %vm7450_vm4, %v7500_v37, 0.0 }
 0x312   : > { %v7528_v50 = vpop.eup %6717 }
 0x313   : > { %v7534_v53 = vpop.eup %6719 }
 0x314   : > { %v7539_v54 = vpop.eup %6721  ;;  %3726 = vmatpush.bf16.msrb.mxu2 %v5914_v35  ;;  %v6166_v35 = vor.u32 %v6536_v26, %v6165_v38 }
 0x315   : > { %3784 = vmatpush.bf16.msra.mxu0 %v5922_v42  ;;  %3756 = vmatpush.bf16.msrb.mxu3 %v5906_v52 }
 0x316   : > { %5882 = vmatmul.msk.f32.gmra.mxu1 %vm7450_vm4, %v7516_v30 }
 0x318   : > { %3727 = vmatpush.bf16.msrb.mxu2 %v5902_v6 }
 0x319   : > { %3785 = vmatpush.bf16.msra.mxu0 %v5910_v55  ;;  %3757 = vmatpush.bf16.msrb.mxu3 %v5894_v48  ;;  %v3374_v55 = vsel %vm7450_vm4, %v7505_v24, 0.0  ;;  %v6141_v48 = vld [vmem:[#allocation16 + $0x78] sm:$0xf] }
 0x31c   : > { %3728 = vmatpush.bf16.msrb.mxu2 %v5890_v61 }
 0x31d   : > { %3786 = vmatpush.bf16.msra.mxu0 %v5898_v63 }
 0x31e   : > { %5883 = vmatmul.msk.f32.gmra.mxu1 %vm7450_vm4, %v7522_v46 }
 0x321   : > { %4304 = vmatpush.bf16.msrb.mxu0 %v6166_v35 }
 0x325   : > { %4305 = vmatpush.bf16.msrb.mxu0 %v6154_v49 }
 0x326   : > { %5884 = vmatmul.msk.f32.gmra.mxu1 %vm7450_vm4, %v7528_v50 }
 0x32e   : > { %5885 = vmatmul.msk.f32.gmra.mxu1 %vm7450_vm4, %v7534_v53 }
 0x336   : > { %5886 = vmatmul.msk.f32.gmra.mxu1 %vm7450_vm4, %v7539_v54 }
 0x37b   : > { %v3397_v56 = vpop.f32.mrf.mxu1 }
 0x37c   : > { %6723 = vrcp.f32 %v3397_v56  ;;  %v3432_v15 = vand.u32 2147483648, %v3397_v56  ;;  %v3430_v25 = vand.u32 2147483647, %v3397_v56  ;;  %vm3426_vm6 = vweird.f32 %v3397_v56 }
 0x37e   : > { %v3433_v12 = vor.u32 1.1754944e-38, %v3432_v15  ;;  %vm3431_vm8 = vcmp.eq.f32.partialorder %v3430_v25, 8.507059e+37 }
 0x382   : > { %v6724_v0 = vpop.eup %6723 }
 0x383   : > { %v3422_v1 = vmul.f32 %v6724_v0, %v3397_v56  ;;  %v3400_v2 = vpop.f32.mrf.mxu1  ;;  %vm3427_vm5 = vweird.f32 %v6724_v0 }
 0x384   : > { %6725 = vrcp.f32 %v3400_v2  ;;  %vm3428_vm7 = vmor %vm3426_vm6, %vm3427_vm5  ;;  %v3447_v23 = vand.u32 2147483648, %v3400_v2  ;;  %v3445_v40 = vand.u32 2147483647, %v3400_v2  ;;  %vm3441_vm10 = vweird.f32 %v3400_v2 }
 0x385   : > { %v3423_v3 = vsub.f32 1.0, %v3422_v1  ;;  %v6142_v1 = vor.u32 %v6530_v62, %v6141_v48  ;;  %v6167_v62 = vld [vmem:[#allocation16 + $0xb4] sm:$0xf0] }
 0x386   : > { %v3448_v31 = vor.u32 1.1754944e-38, %v3447_v23  ;;  %vm3446_vm12 = vcmp.eq.f32.partialorder %v3445_v40, 8.507059e+37 }
 0x387   : > { %v3424_v9 = vmul.f32 %v6724_v0, %v3423_v3  ;;  %v3183_v3 = vsel %vm7450_vm4, %v7511_v28, 0.0  ;;  %4306 = vmatpush.bf16.msrb.mxu0 %v6142_v1  ;;  %v6155_v1 = vld [vmem:[#allocation16 + $0x9c] sm:$0xf0] }
 0x389   : > { %v3425_v5 = vadd.f32 %v6724_v0, %v3424_v9 }
 0x38a   : > { %v6726_v10 = vpop.eup %6725 }
 0x38b   : > { %v3429_v11 = vsel %vm3428_vm7, %v6724_v0, %v3425_v5  ;;  %v3437_v16 = vmul.f32 %v6726_v10, %v3400_v2  ;;  %v7544_v17 = vpop.f32.mrf.mxu1  ;;  %vm3442_vm9 = vweird.f32 %v6726_v10 }
 0x38c   : > { %6727 = vrcp.f32 %v7544_v17  ;;  %v3434_v20 = vsel %vm3431_vm8, %v3433_v12, %v3429_v11  ;;  %vm3443_vm11 = vmor %vm3441_vm10, %vm3442_vm9  ;;  %v3462_v42 = vand.u32 2147483648, %v7544_v17  ;;  %v3460_v51 = vand.u32 2147483647, %v7544_v17  ;;  %v6129_v12 = vld [vmem:[#allocation16 + $0x60] sm:$0xf] }
 0x38d   : > { %v3438_v19 = vsub.f32 1.0, %v3437_v16  ;;  %v7556_v21 = vpop.f32.mrf.mxu0  ;;  %v3435_v13 = vmul.f32 %v3434_v20, %v3372_v18  ;;  %vm3456_vm14 = vweird.f32 %v7544_v17  ;;  %v6527_v16 = vld [vmem:[#allocation16 + $0x68] sm:$0xf0] }
 0x38e   : > { %6729 = vrcp.f32 %v7556_v21  ;;  %v3215_v37 = vand.u32 2147483648, %v7556_v21  ;;  %v3213_v61 = vand.u32 2147483647, %v7556_v21  ;;  %v3463_v24 = vor.u32 1.1754944e-38, %v3462_v42 }
 0x38f   : > { %v3439_v22 = vmul.f32 %v6726_v10, %v3438_v19  ;;  %3541 = vst [vmem:[%s7554_s25] sm:$0xff] %v3435_v13  ;;  %vm3461_vm1 = vcmp.eq.f32.partialorder %v3460_v51, 8.507059e+37  ;;  %vm3209_vm2 = vweird.f32 %v7556_v21  ;;  %v6130_v18 = vor.u32 %v6527_v16, %v6129_v12  ;;  %v6143_v12 = vld [vmem:[#allocation16 + $0x84] sm:$0xf0] }
 0x390   : > { %v3216_v9 = vor.u32 1.1754944e-38, %v3215_v37  ;;  %vm3214_vm5 = vcmp.eq.f32.partialorder %v3213_v61, 8.507059e+37 }
 0x391   : > { %v3440_v34 = vadd.f32 %v6726_v10, %v3439_v22  ;;  %4307 = vmatpush.bf16.msrb.mxu0 %v6130_v18  ;;  %v6524_v22 = vld [vmem:[#allocation16 + $0x50] sm:$0xf0] }
 0x392   : > { %v6728_v4 = vpop.eup %6727 }
 0x393   : > { %v3444_v29 = vsel %vm3443_vm11, %v6726_v10, %v3440_v34  ;;  %v3452_v32 = vmul.f32 %v6728_v4, %v7544_v17  ;;  %v7561_v33 = vpop.f32.mrf.mxu1  ;;  %vm3457_vm13 = vweird.f32 %v6728_v4  ;;  %v6105_v34 = vld [vmem:[#allocation16 + $0x30] sm:$0xf] }
 0x394   : > { %6731 = vrcp.f32 %v7561_v33  ;;  %v6730_v36 = vpop.eup %6729  ;;  %v3449_v39 = vsel %vm3446_vm12, %v3448_v31, %v3444_v29  ;;  %vm7576_vm15 = vmor %vm3456_vm14, %vm3457_vm13  ;;  %v3477_v10 = vand.u32 2147483648, %v7561_v33  ;;  %v3475_v20 = vand.u32 2147483647, %v7561_v33 }
 0x395   : > { %v3453_v7 = vsub.f32 1.0, %v3452_v32  ;;  %v3205_v43 = vmul.f32 %v6730_v36, %v7556_v21  ;;  %v3450_v47 = vmul.f32 %v3449_v39, %v3373_v41  ;;  %vm3210_vm0 = vweird.f32 %v6730_v36  ;;  %v6093_v39 = vld [vmem:[#allocation16 + $0x18] sm:$0xf]  ;;  %v6518_v41 = vld [vmem:[#allocation16 + $0x20] sm:$0xf0] }
 0x396   : > { %vm3211_vm3 = vmor %vm3209_vm2, %vm3210_vm0  ;;  %vm3471_vm7 = vweird.f32 %v7561_v33  ;;  %v3478_v38 = vor.u32 1.1754944e-38, %v3477_v10  ;;  %vm3476_vm9 = vcmp.eq.f32.partialorder %v3475_v20, 8.507059e+37 }
 0x397   : > { %v3454_v6 = vmul.f32 %v6728_v4, %v3453_v7  ;;  %v3206_v52 = vsub.f32 1.0, %v3205_v43  ;;  %3542 = vst [vmem:[%s7554_s25 + $0x8] sm:$0xff] %v3450_v47  ;;  %v3549_v57 = vpack.c.bf16 %v3450_v47, %v3435_v13  ;;  %v6117_v13 = vld [vmem:[#allocation16 + $0x48] sm:$0xf]  ;;  %v6094_v47 = vor.u32 %v6518_v41, %v6093_v39  ;;  %v6497_v39 = vld [vmem:[#allocation13 + $0x38] sm:$0xff] }
 0x398   : > { %v6118_v40 = vor.u32 %v6524_v22, %v6117_v13  ;;  %v6526_v22 = vld [vmem:[#allocation16 + $0x64] sm:$0xf]  ;;  %4040 = vmatpush.bf16.msra.mxu1 %v6497_v39 }
 0x399   : > { %v3455_v56 = vadd.f32 %v6728_v4, %v3454_v6  ;;  %v3207_v60 = vmul.f32 %v6730_v36, %v3206_v52  ;;  %3729 = vmatmul.bf16.vlgmr.msrb.gmra.mxu2 %v3549_v57  ;;  %3758 = vmatmul.bf16.vlgmr.msrb.gmra.mxu3 %v3549_v57 }
 0x39a   : > { %v6732_v58 = vpop.eup %6731  ;;  %3787 = vmatmul.bf16.vlgmr.msra.gmra.mxu0 %v3549_v57  ;;  %v3376_v57 = vsel %vm7450_vm4, %v7522_v46, 0.0 }
 0x39b   : > { %v3467_v8 = vmul.f32 %v6732_v58, %v7561_v33  ;;  %v7582_v63 = vpop.f32.mrf.mxu1  ;;  %v3459_v0 = vsel %vm7576_vm15, %v6728_v4, %v3455_v56  ;;  %v3208_v2 = vadd.f32 %v6730_v36, %v3207_v60  ;;  %vm3472_vm6 = vweird.f32 %v6732_v58  ;;  %v6521_v4 = vld [vmem:[#allocation16 + $0x38] sm:$0xf0]  ;;  %4308 = vmatpush.bf16.msrb.mxu0 %v6118_v40  ;;  %v6081_v56 = vld [vmem:[#allocation16] sm:$0xf]  ;;  %v6535_v60 = vld [vmem:[#allocation16 + $0xac] sm:$0xf] }
 0x39c   : > { %6733 = vrcp.f32 %v7582_v63  ;;  %v3464_v25 = vsel %vm3461_vm1, %v3463_v24, %v3459_v0  ;;  %vm3473_vm8 = vmor %vm3471_vm7, %vm3472_vm6  ;;  %v3375_v33 = vsel %vm7450_vm4, %v7516_v30, 0.0  ;;  %v3492_v43 = vand.u32 2147483648, %v7582_v63  ;;  %v6532_v0 = vld [vmem:[#allocation16 + $0x94] sm:$0xf] }
 0x39d   : > { %v3468_v15 = vsub.f32 1.0, %v3467_v8  ;;  %v3212_v5 = vsel %vm3211_vm3, %v6730_v36, %v3208_v2  ;;  %v3465_v11 = vmul.f32 %v3464_v25, %v3374_v55  ;;  %v6106_v36 = vor.u32 %v6521_v4, %v6105_v34 }
 0x39e   : > { %v3217_v28 = vsel %vm3214_vm5, %v3216_v9, %v3212_v5  ;;  %v3490_v44 = vand.u32 2147483647, %v7582_v63  ;;  %vm3486_vm11 = vweird.f32 %v7582_v63  ;;  %v3493_v49 = vor.u32 1.1754944e-38, %v3492_v43 }
 0x39f   : > { %v3469_v17 = vmul.f32 %v6732_v58, %v3468_v15  ;;  %v3218_v19 = vmul.f32 %v3217_v28, %v3183_v3  ;;  %3543 = vst [vmem:[%s7554_s25 + $0x10] sm:$0xff] %v3465_v11  ;;  %4309 = vmatpush.bf16.msrb.mxu0 %v6106_v36  ;;  %v6082_v48 = vor.u32 %v6515_v59, %v6081_v56  ;;  %v3377_v28 = vsel %vm7450_vm4, %v7528_v50, 0.0  ;;  %v6514_v59 = vld [vmem:[#allocation16 + $0x4] sm:$0xf] }
 0x3a0   : > { %vm3491_vm13 = vcmp.eq.f32.partialorder %v3490_v44, 8.507059e+37  ;;  %v6158_v9 = vor.u32 %v6532_v0, %v6155_v1  ;;  %v6511_v0 = vld [vmem:[#allocation13 + $0xa8] sm:$0xff]  ;;  %v6494_v1 = vld [vmem:[#allocation13 + $0x20] sm:$0xff] }
 0x3a1   : > { %v3470_v21 = vadd.f32 %v6732_v58, %v3469_v17  ;;  %3219 = vst [vmem:[%s807_s24] sm:$0xff] %v3218_v19 }
 0x3a2   : > { %v6734_v23 = vpop.eup %6733 }
 0x3a3   : > { %v3482_v26 = vmul.f32 %v6734_v23, %v7582_v63  ;;  %v7602_v29 = vpop.f32.mrf.mxu1  ;;  %v3474_v31 = vsel %vm3473_vm8, %v6732_v58, %v3470_v21  ;;  %vm3487_vm10 = vweird.f32 %v6734_v23  ;;  %4310 = vmatpush.bf16.msrb.mxu0 %v6094_v47  ;;  %v6170_v63 = vor.u32 %v6535_v60, %v6167_v62  ;;  %v6083_v60 = vld [vmem:[#allocation16 + $0xc] sm:$0xf0]  ;;  %v6513_v62 = vld [vmem:[#allocation13 + $0xb8] sm:$0xff] }
 0x3a4   : > { %6735 = vrcp.f32 %v7602_v29  ;;  %v3479_v35 = vsel %vm3476_vm9, %v3478_v38, %v3474_v31  ;;  %vm3488_vm12 = vmor %vm3486_vm11, %vm3487_vm10  ;;  %v3507_v8 = vand.u32 2147483648, %v7602_v29  ;;  %v3505_v2 = vand.u32 2147483647, %v7602_v29  ;;  %4098 = vmatpush.bf16.msra.mxu3 %v6513_v62 }
 0x3a5   : > { %v3483_v32 = vsub.f32 1.0, %v3482_v26  ;;  %v3480_v7 = vmul.f32 %v3479_v35, %v3375_v33  ;;  %vm3501_vm15 = vweird.f32 %v7602_v29  ;;  %v3378_v31 = vsel %vm7450_vm4, %v7534_v53, 0.0  ;;  %v6523_v33 = vld [vmem:[#allocation16 + $0x4c] sm:$0xf]  ;;  %v6119_v35 = vld [vmem:[#allocation16 + $0x54] sm:$0xf0] }
 0x3a6   : > { %v3508_v15 = vor.u32 1.1754944e-38, %v3507_v8  ;;  %vm3506_vm1 = vcmp.eq.f32.partialorder %v3505_v2, 8.507059e+37  ;;  %v6122_v43 = vor.u32 %v6523_v33, %v6119_v35  ;;  %v6495_v8 = vld [vmem:[#allocation13 + $0x28] sm:$0xff]  ;;  %v6502_v2 = vld [vmem:[#allocation13 + $0x60] sm:$0xff] }
 0x3a7   : > { %v3484_v42 = vmul.f32 %v6734_v23, %v3483_v32  ;;  %3544 = vst [vmem:[%s7554_s25 + $0x18] sm:$0xff] %v3480_v7  ;;  %v3550_v45 = vpack.c.bf16 %v3480_v7, %v3465_v11  ;;  %4311 = vmatpush.bf16.msrb.mxu0 %v6082_v48  ;;  %v6529_v11 = vld [vmem:[#allocation16 + $0x7c] sm:$0xf] }
 0x3a8   : > { %v6146_v20 = vor.u32 %v6529_v11, %v6143_v12  ;;  %v6505_v48 = vld [vmem:[#allocation13 + $0x78] sm:$0xff]  ;;  %v6508_v11 = vld [vmem:[#allocation13 + $0x90] sm:$0xff]  ;;  %v6491_v12 = vld [vmem:[#allocation13 + $0x8] sm:$0xff] }
 0x3a9   : > { %v3485_v6 = vadd.f32 %v6734_v23, %v3484_v42  ;;  %3734 = vmatmul.bf16.gmra.mxu2 %v3550_v45  ;;  %3763 = vmatmul.bf16.gmra.mxu3 %v3550_v45 }
 0x3aa   : > { %v6736_v30 = vpop.eup %6735  ;;  %3792 = vmatmul.bf16.gmra.mxu0 %v3550_v45  ;;  %v6520_v45 = vld [vmem:[#allocation16 + $0x34] sm:$0xf]  ;;  %4069 = vmatpush.bf16.msra.mxu2 %v6505_v48 }
 0x3ab   : > { %v3497_v51 = vmul.f32 %v6736_v30, %v7602_v29  ;;  %v3415_v52 = vpop.f32.mrf.mxu1  ;;  %v3489_v55 = vsel %vm3488_vm12, %v6734_v23, %v3485_v6  ;;  %vm3502_vm14 = vweird.f32 %v6736_v30  ;;  %4317 = vmatpush.bf16.msra.mxu0 %v6170_v63  ;;  %v6131_v23 = vld [vmem:[#allocation16 + $0x6c] sm:$0xf0]  ;;  %v6107_v6 = vld [vmem:[#allocation16 + $0x3c] sm:$0xf0]  ;;  %v6503_v63 = vld [vmem:[#allocation13 + $0x68] sm:$0xff] }
 0x3ac   : > { %6737 = vrcp.f32 %v3415_v52  ;;  %v3494_v58 = vsel %vm3491_vm13, %v3493_v49, %v3489_v55  ;;  %vm3503_vm0 = vmor %vm3501_vm15, %vm3502_vm14  ;;  %v3522_v18 = vand.u32 2147483648, %v3415_v52  ;;  %v3520_v13 = vand.u32 2147483647, %v3415_v52 }
 0x3ad   : > { %v3498_v37 = vsub.f32 1.0, %v3497_v51  ;;  %v3495_v61 = vmul.f32 %v3494_v58, %v3376_v57  ;;  %vm3516_vm3 = vweird.f32 %v3415_v52  ;;  %v6134_v26 = vor.u32 %v6526_v22, %v6131_v23  ;;  %v6517_v51 = vld [vmem:[#allocation16 + $0x1c] sm:$0xf]  ;;  %v6161_v22 = vld [vmem:[#allocation16 + $0x98] sm:$0xf] }
 0x3ae   : > { %v3523_v38 = vor.u32 1.1754944e-38, %v3522_v18  ;;  %vm3521_vm6 = vcmp.eq.f32.partialorder %v3520_v13, 8.507059e+37  ;;  %v3379_v55 = vsel %vm7450_vm4, %v7539_v54, 0.0  ;;  %v6512_v54 = vld [vmem:[#allocation13 + $0xb0] sm:$0xff]  ;;  %4070 = vmatpush.bf16.msra.mxu2 %v6504_v27  ;;  %v6498_v18 = vld [vmem:[#allocation13 + $0x40] sm:$0xff] }
 0x3af   : > { %v3499_v24 = vmul.f32 %v6736_v30, %v3498_v37  ;;  %3545 = vst [vmem:[%s7554_s25 + $0x20] sm:$0xff] %v3495_v61  ;;  %4318 = vmatpush.bf16.msra.mxu0 %v6158_v9  ;;  %4099 = vmatpush.bf16.msra.mxu3 %v6512_v54  ;;  %v7634_v9 = vpack.c.bf16 %v7441_v14, %v7441_v14  ;;  %v6507_v14 = vld [vmem:[#allocation13 + $0x88] sm:$0xff]  ;;  %v3585_v13 = vld [vmem:[#allocation12] sm:$0x7] }
 0x3b0   : > { %v6534_v23 = vld [vmem:[#allocation16 + $0xa0] sm:$0xf0]  ;;  %v6113_v27 = vld [vmem:[#allocation16 + $0x38] sm:$0xf] }
 0x3b1   : > { %v3500_v3 = vadd.f32 %v6736_v30, %v3499_v24  ;;  %v6496_v24 = vld [vmem:[#allocation13 + $0x30] sm:$0xff]  ;;  %v6522_v54 = vld [vmem:[#allocation16 + $0x40] sm:$0xf0] }
 0x3b2   : > { %v6738_v46 = vpop.eup %6737  ;;  %4041 = vmatpush.bf16.msra.mxu1 %v6496_v24  ;;  %4071 = vmatpush.bf16.msra.mxu2 %v6503_v63 }
 0x3b3   : > { %v3512_v25 = vmul.f32 %v6738_v46, %v3415_v52  ;;  %v3418_v5 = vpop.f32.mrf.mxu1  ;;  %v3504_v10 = vsel %vm3503_vm0, %v6736_v30, %v3500_v3  ;;  %vm3517_vm2 = vweird.f32 %v6738_v46  ;;  %4319 = vmatpush.bf16.msra.mxu0 %v6146_v20  ;;  %v6110_v30 = vor.u32 %v6520_v45, %v6107_v6  ;;  %v6095_v52 = vld [vmem:[#allocation16 + $0x24] sm:$0xf0]  ;;  %4100 = vmatpush.bf16.msra.mxu3 %v6511_v0  ;;  %v6510_v3 = vld [vmem:[#allocation13 + $0xa0] sm:$0xff] }
 0x3b4   : > { %6739 = vrcp.f32 %v3418_v5  ;;  %v3509_v17 = vsel %vm3506_vm1, %v3508_v15, %v3504_v10  ;;  %vm3518_vm5 = vmor %vm3516_vm3, %vm3517_vm2  ;;  %v3535_v41 = vand.u32 2147483647, %v3418_v5  ;;  %v3537_v42 = vand.u32 2147483648, %v3418_v5  ;;  %v6501_v15 = vld [vmem:[#allocation13 + $0x58] sm:$0xff]  ;;  %v6500_v10 = vld [vmem:[#allocation13 + $0x50] sm:$0xff] }
 0x3b5   : > { %v3513_v16 = vsub.f32 1.0, %v3512_v25  ;;  %v3510_v19 = vmul.f32 %v3509_v17, %v3377_v28  ;;  %vm3531_vm8 = vweird.f32 %v3418_v5  ;;  %v6098_v57 = vor.u32 %v6517_v51, %v6095_v52  ;;  %v6509_v25 = vld [vmem:[#allocation13 + $0x98] sm:$0xff]  ;;  %v6506_v28 = vld [vmem:[#allocation13 + $0x80] sm:$0xff] }
 0x3b6   : > { %v3538_v53 = vor.u32 1.1754944e-38, %v3537_v42  ;;  %vm3536_vm10 = vcmp.eq.f32.partialorder %v3535_v41, 8.507059e+37  ;;  %4042 = vmatpush.bf16.msra.mxu1 %v6495_v8  ;;  %4072 = vmatpush.bf16.msra.mxu2 %v6502_v2  ;;  %v6490_v17 = vld [vmem:[#allocation13] sm:$0xff]  ;;  %v6114_v8 = vor.u32 %v6522_v54, %v6113_v27 }
 0x3b7   : > { %v3514_v21 = vmul.f32 %v6738_v46, %v3513_v16  ;;  %3546 = vst [vmem:[%s7554_s25 + $0x28] sm:$0xff] %v3510_v19  ;;  %v3551_v40 = vpack.c.bf16 %v3510_v19, %v3495_v61  ;;  %4320 = vmatpush.bf16.msra.mxu0 %v6134_v26  ;;  %v6086_v61 = vor.u32 %v6514_v59, %v6083_v60  ;;  %v6499_v16 = vld [vmem:[#allocation13 + $0x48] sm:$0xff]  ;;  %v6173_v19 = vld [vmem:[#allocation16 + $0xb0] sm:$0xf]  ;;  %v6537_v20 = vld [vmem:[#allocation16 + $0xb8] sm:$0xf0] }
 0x3b8   : > { %4101 = vmatpush.bf16.msra.mxu3 %v6510_v3  ;;  %v7647_v26 = vperm.slane %v3585_v13, 0 }
 0x3b9   : > { %v3515_v34 = vadd.f32 %v6738_v46, %v3514_v21  ;;  %3739 = vmatmul.bf16.gmra.mxu2 %v3551_v40  ;;  %3768 = vmatmul.bf16.gmra.mxu3 %v3551_v40  ;;  %v6174_v21 = vor.u32 %v6537_v20, %v6173_v19  ;;  %v6516_v19 = vld [vmem:[#allocation16 + $0x10] sm:$0xf0] }
 0x3ba   : > { %v6740_v4 = vpop.eup %6739  ;;  %3797 = vmatmul.bf16.gmra.mxu0 %v3551_v40  ;;  %4043 = vmatpush.bf16.msra.mxu1 %v6494_v1  ;;  %v6162_v40 = vor.u32 %v6534_v23, %v6161_v22 }
 0x3bb   : > { %v3527_v50 = vmul.f32 %v6740_v4, %v3418_v5  ;;  %v3519_v29 = vsel %vm3518_vm5, %v6738_v46, %v3515_v34  ;;  %vm3532_vm7 = vweird.f32 %v6740_v4  ;;  %4321 = vmatpush.bf16.msra.mxu0 %v6122_v43  ;;  %v6493_v46 = vld [vmem:[#allocation13 + $0x18] sm:$0xff]  ;;  %v6492_v5 = vld [vmem:[#allocation13 + $0x10] sm:$0xff]  ;;  %4073 = vmatpush.bf16.msra.mxu2 %v6501_v15  ;;  %v7639_v34 = vperm.slane %v3585_v13, 2  ;;  %v6137_v43 = vld [vmem:[#allocation16 + $0x68] sm:$0xf] }
 0x3bc   : > { %v3524_v32 = vsel %vm3521_vm6, %v3523_v38, %v3519_v29  ;;  %vm3533_vm9 = vmor %vm3531_vm8, %vm3532_vm7  ;;  %4102 = vmatpush.bf16.msra.mxu3 %v6509_v25  ;;  %v6149_v29 = vld [vmem:[#allocation16 + $0x80] sm:$0xf] }
 0x3bd   : > { %v3528_v36 = vsub.f32 1.0, %v3527_v50  ;;  %v3525_v7 = vmul.f32 %v3524_v32, %v3378_v31  ;;  %v7649_v50 = vperm.slane %v3585_v13, 1  ;;  %v6531_v31 = vld [vmem:[#allocation16 + $0x88] sm:$0xf0] }
 0x3be   : > { %4044 = vmatpush.bf16.msra.mxu1 %v6493_v46  ;;  %v6150_v32 = vor.u32 %v6531_v31, %v6149_v29 }
 0x3bf   : > { %v3529_v44 = vmul.f32 %v6740_v4, %v3528_v36  ;;  %3547 = vst [vmem:[%s7554_s25 + $0x30] sm:$0xff] %v3525_v7  ;;  %4322 = vmatpush.bf16.msra.mxu0 %v6110_v30  ;;  %4074 = vmatpush.bf16.msra.mxu2 %v6500_v10  ;;  %v6519_v10 = vld [vmem:[#allocation16 + $0x28] sm:$0xf0] }
 0x3c0   : > { %4103 = vmatpush.bf16.msra.mxu3 %v6508_v11 }
 0x3c1   : > { %v3530_v47 = vadd.f32 %v6740_v4, %v3529_v44  ;;  %v6528_v44 = vld [vmem:[#allocation16 + $0x70] sm:$0xf0] }
 0x3c2   : > { %4045 = vmatpush.bf16.msra.mxu1 %v6492_v5  ;;  %v6138_v45 = vor.u32 %v6528_v44, %v6137_v43  ;;  %v6101_v5 = vld [vmem:[#allocation16 + $0x20] sm:$0xf] }
 0x3c3   : > { %v3534_v49 = vsel %vm3533_vm9, %v6740_v4, %v3530_v47  ;;  %4323 = vmatpush.bf16.msra.mxu0 %v6098_v57  ;;  %4075 = vmatpush.bf16.msra.mxu2 %v6499_v16  ;;  %v6102_v11 = vor.u32 %v6519_v10, %v6101_v5 }
 0x3c4   : > { %v3539_v56 = vsel %vm3536_vm10, %v3538_v53, %v3534_v49  ;;  %4104 = vmatpush.bf16.msra.mxu3 %v6507_v14 }
 0x3c5   : > { %v3540_v37 = vmul.f32 %v3539_v56, %v3379_v55  ;;  %v6125_v56 = vld [vmem:[#allocation16 + $0x50] sm:$0xf] }
 0x3c6   : > { %4046 = vmatpush.bf16.msra.mxu1 %v6491_v12 }
 0x3c7   : > { %3548 = vst [vmem:[%s7554_s25 + $0x38] sm:$0xff] %v3540_v37  ;;  %v3552_v58 = vpack.c.bf16 %v3540_v37, %v3525_v7  ;;  %4324 = vmatpush.bf16.msra.mxu0 %v6086_v61  ;;  %4076 = vmatpush.bf16.msra.mxu2 %v6498_v18  ;;  %v6525_v37 = vld [vmem:[#allocation16 + $0x58] sm:$0xf0]  ;;  %v6089_v18 = vld [vmem:[#allocation16 + $0x8] sm:$0xf] }
 0x3c8   : > { %4105 = vmatpush.bf16.msra.mxu3 %v6506_v28  ;;  %v6126_v57 = vor.u32 %v6525_v37, %v6125_v56 }
 0x3c9   : > { %3744 = vmatmul.bf16.gmra.mxu2 %v3552_v58  ;;  %3773 = vmatmul.bf16.gmra.mxu3 %v3552_v58 }
 0x3ca   : > { %3802 = vmatmul.bf16.gmra.mxu0 %v3552_v58  ;;  %4047 = vmatpush.bf16.msra.mxu1 %v6490_v17 }
 0x3ce   : > { %4330 = vmatpush.bf16.msrb.mxu1 %v6174_v21  ;;  %v6090_v21 = vor.u32 %v6516_v19, %v6089_v18 }
 0x3d2   : > { %4331 = vmatpush.bf16.msrb.mxu1 %v6162_v40 }
 0x3d6   : > { %4332 = vmatpush.bf16.msrb.mxu1 %v6150_v32 }
 0x3da   : > { %4312 = vmatmul.bf16.vlgmr.msrb.gmra.mxu0 %v7634_v9  ;;  %4333 = vmatpush.bf16.msrb.mxu1 %v6138_v45 }
 0x3de   : > { %4334 = vmatpush.bf16.msrb.mxu1 %v6126_v57  ;;  %v6668_v57 = vld [vmem:[#allocation15] ss:$0 sm:$0xff] }
 0x3e2   : > { %4335 = vmatpush.bf16.msrb.mxu1 %v6114_v8 }
 0x3e6   : > { %4336 = vmatpush.bf16.msrb.mxu1 %v6102_v11 }
 0x3ea   : > { %4325 = vmatmul.bf16.vlgmr.msra.gmra.mxu0 %v7634_v9  ;;  %4337 = vmatpush.bf16.msrb.mxu1 %v6090_v21 }
 0x417   : > { %v3788_v4 = vpop.f32.mrf.mxu0 }
 0x418   : > { %v3789_v38 = vadd.f32 %v3788_v4, %v7639_v34 }
 0x41a   : > { %3810 = vst [vmem:[%s7644_s23 + $0x10] sm:$0xff] %v3789_v38 }
 0x41c   : > { %v3730_v33 = vpop.f32.mrf.mxu2  ;;  %v3759_v35 = vpop.f32.mrf.mxu3 }
 0x41d   : > { %v3731_v36 = vadd.f32 %v3730_v33, %v7647_v26  ;;  %v3760_v7 = vadd.f32 %v3759_v35, %v7649_v50 }
 0x41f   : > { %3808 = vst [vmem:[%s7644_s23] sm:$0xff] %v3731_v36  ;;  %v3790_v39 = vpop.f32.mrf.mxu0 }
 0x420   : > { %3809 = vst [vmem:[%s7644_s23 + $0x8] sm:$0xff] %v3760_v7  ;;  %v3791_v41 = vadd.f32 %v3790_v39, %v7639_v34 }
 0x422   : > { %3813 = vst [vmem:[%s7644_s23 + $0x28] sm:$0xff] %v3791_v41  ;;  %v3834_v42 = vpack.c.bf16 %v3791_v41, %v3789_v38 }
 0x424   : > { %4106 = vmatmul.bf16.vlgmr.msra.gmra.mxu3 %v3834_v42  ;;  %v3732_v6 = vpop.f32.mrf.mxu2  ;;  %v3761_v47 = vpop.f32.mrf.mxu3  ;;  %v7693_v42 = vld [vmem:[#allocation18] sm:$0x7] }
 0x425   : > { %v3733_v53 = vadd.f32 %v3732_v6, %v7647_v26  ;;  %v3762_v30 = vadd.f32 %v3761_v47, %v7649_v50  ;;  %v4170_v6 = vperm.slane %v7693_v42, 0 }
 0x427   : > { %3811 = vst [vmem:[%s7644_s23 + $0x18] sm:$0xff] %v3733_v53  ;;  %v3832_v49 = vpack.c.bf16 %v3733_v53, %v3731_v36  ;;  %v3833_v51 = vpack.c.bf16 %v3762_v30, %v3760_v7  ;;  %v3793_v52 = vpop.f32.mrf.mxu0 }
 0x428   : > { %3812 = vst [vmem:[%s7644_s23 + $0x20] sm:$0xff] %v3762_v30  ;;  %v3794_v55 = vadd.f32 %v3793_v52, %v7639_v34 }
 0x429   : > { %4048 = vmatmul.bf16.vlgmr.msra.gmra.mxu1 %v3832_v49  ;;  %4077 = vmatmul.bf16.vlgmr.msra.gmra.mxu2 %v3833_v51 }
 0x42a   : > { %3816 = vst [vmem:[%s7644_s23 + $0x40] sm:$0xff] %v3794_v55 }
 0x42c   : > { %v3735_v58 = vpop.f32.mrf.mxu2  ;;  %v3764_v59 = vpop.f32.mrf.mxu3 }
 0x42d   : > { %v3736_v60 = vadd.f32 %v3735_v58, %v7647_v26  ;;  %v3765_v61 = vadd.f32 %v3764_v59, %v7649_v50 }
 0x42f   : > { %3814 = vst [vmem:[%s7644_s23 + $0x30] sm:$0xff] %v3736_v60  ;;  %v3795_v48 = vpop.f32.mrf.mxu0 }
 0x430   : > { %3815 = vst [vmem:[%s7644_s23 + $0x38] sm:$0xff] %v3765_v61  ;;  %v3796_v62 = vadd.f32 %v3795_v48, %v7639_v34 }
 0x432   : > { %3819 = vst [vmem:[%s7644_s23 + $0x58] sm:$0xff] %v3796_v62  ;;  %v3837_v24 = vpack.c.bf16 %v3796_v62, %v3794_v55 }
 0x434   : > { %4111 = vmatmul.bf16.gmra.mxu3 %v3837_v24  ;;  %v3737_v63 = vpop.f32.mrf.mxu2  ;;  %v3766_v0 = vpop.f32.mrf.mxu3 }
 0x435   : > { %v3738_v1 = vadd.f32 %v3737_v63, %v7647_v26  ;;  %v3767_v2 = vadd.f32 %v3766_v0, %v7649_v50 }
 0x437   : > { %3817 = vst [vmem:[%s7644_s23 + $0x48] sm:$0xff] %v3738_v1  ;;  %v3835_v3 = vpack.c.bf16 %v3738_v1, %v3736_v60  ;;  %v3836_v46 = vpack.c.bf16 %v3767_v2, %v3765_v61  ;;  %v3798_v15 = vpop.f32.mrf.mxu0 }
 0x438   : > { %3818 = vst [vmem:[%s7644_s23 + $0x50] sm:$0xff] %v3767_v2  ;;  %v3799_v25 = vadd.f32 %v3798_v15, %v7639_v34 }
 0x439   : > { %4053 = vmatmul.bf16.gmra.mxu1 %v3835_v3  ;;  %4082 = vmatmul.bf16.gmra.mxu2 %v3836_v46 }
 0x43a   : > { %3822 = vst [vmem:[%s7644_s23 + $0x70] sm:$0xff] %v3799_v25 }
 0x43c   : > { %v3740_v12 = vpop.f32.mrf.mxu2  ;;  %v3769_v14 = vpop.f32.mrf.mxu3 }
 0x43d   : > { %v3741_v16 = vadd.f32 %v3740_v12, %v7647_v26  ;;  %v3770_v28 = vadd.f32 %v3769_v14, %v7649_v50 }
 0x43f   : > { %3820 = vst [vmem:[%s7644_s23 + $0x60] sm:$0xff] %v3741_v16  ;;  %v3800_v17 = vpop.f32.mrf.mxu0 }
 0x440   : > { %3821 = vst [vmem:[%s7644_s23 + $0x68] sm:$0xff] %v3770_v28  ;;  %v3801_v20 = vadd.f32 %v3800_v17, %v7639_v34 }
 0x442   : > { %3825 = vst [vmem:[%s7644_s23 + $0x88] sm:$0xff] %v3801_v20  ;;  %v3840_v13 = vpack.c.bf16 %v3801_v20, %v3799_v25 }
 0x444   : > { %4116 = vmatmul.bf16.gmra.mxu3 %v3840_v13  ;;  %v3742_v22 = vpop.f32.mrf.mxu2  ;;  %v3771_v23 = vpop.f32.mrf.mxu3 }
 0x445   : > { %v3743_v40 = vadd.f32 %v3742_v22, %v7647_v26  ;;  %v3772_v4 = vadd.f32 %v3771_v23, %v7649_v50 }
 0x447   : > { %3823 = vst [vmem:[%s7644_s23 + $0x78] sm:$0xff] %v3743_v40  ;;  %v3838_v38 = vpack.c.bf16 %v3743_v40, %v3741_v16  ;;  %v3839_v29 = vpack.c.bf16 %v3772_v4, %v3770_v28  ;;  %v3803_v31 = vpop.f32.mrf.mxu0 }
 0x448   : > { %3824 = vst [vmem:[%s7644_s23 + $0x80] sm:$0xff] %v3772_v4  ;;  %v3804_v32 = vadd.f32 %v3803_v31, %v7639_v34 }
 0x449   : > { %4058 = vmatmul.bf16.gmra.mxu1 %v3838_v38  ;;  %4087 = vmatmul.bf16.gmra.mxu2 %v3839_v29 }
 0x44a   : > { %3828 = vst [vmem:[%s7644_s23 + $0xa0] sm:$0xff] %v3804_v32 }
 0x44c   : > { %v3745_v33 = vpop.f32.mrf.mxu2  ;;  %v3774_v35 = vpop.f32.mrf.mxu3 }
 0x44d   : > { %v3746_v36 = vadd.f32 %v3745_v33, %v7647_v26  ;;  %v3775_v7 = vadd.f32 %v3774_v35, %v7649_v50 }
 0x44f   : > { %3826 = vst [vmem:[%s7644_s23 + $0x90] sm:$0xff] %v3746_v36  ;;  %v3805_v39 = vpop.f32.mrf.mxu0 }
 0x450   : > { %3827 = vst [vmem:[%s7644_s23 + $0x98] sm:$0xff] %v3775_v7  ;;  %v3806_v41 = vadd.f32 %v3805_v39, %v7639_v34 }
 0x452   : > { %3831 = vst [vmem:[%s7644_s23 + $0xb8] sm:$0xff] %v3806_v41  ;;  %v3843_v43 = vpack.c.bf16 %v3806_v41, %v3804_v32 }
 0x454   : > { %4121 = vmatmul.bf16.gmra.mxu3 %v3843_v43  ;;  %v3747_v44 = vpop.f32.mrf.mxu2  ;;  %v3776_v45 = vpop.f32.mrf.mxu3 }
 0x455   : > { %v3748_v47 = vadd.f32 %v3747_v44, %v7647_v26  ;;  %v3777_v53 = vadd.f32 %v3776_v45, %v7649_v50  ;;  %v4171_v50 = vperm.slane %v7693_v42, 1 }
 0x457   : > { %3829 = vst [vmem:[%s7644_s23 + $0xa8] sm:$0xff] %v3748_v47  ;;  %v3841_v30 = vpack.c.bf16 %v3748_v47, %v3746_v36  ;;  %v3842_v49 = vpack.c.bf16 %v3777_v53, %v3775_v7  ;;  %v4313_v34 = vpop.f32.mrf.mxu0  ;;  %v4172_v7 = vperm.slane %v7693_v42, 2 }
 0x458   : > { %3830 = vst [vmem:[%s7644_s23 + $0xb0] sm:$0xff] %v3777_v53  ;;  %v4314_v51 = vadd.f32 %v4313_v34, %v4170_v6 }
 0x459   : > { %4063 = vmatmul.bf16.gmra.mxu1 %v3841_v30  ;;  %4092 = vmatmul.bf16.gmra.mxu2 %v3842_v49 }
 0x45a   : > { %4343 = vst [vmem:[%s7704_s20] sm:$0xff] %v4314_v51 }
 0x45f   : > { %v4315_v26 = vpop.f32.mrf.mxu0 }
 0x467   : > { %v4326_v52 = vpop.f32.mrf.mxu0 }
 0x468   : > { %v4327_v55 = vadd.f32 %v4326_v52, %v4171_v50 }
 0x469   : > { %4338 = vmatmul.bf16.vlgmr.msrb.gmra.mxu1 %v7634_v9 }
 0x46a   : > { %4344 = vst [vmem:[%s7704_s20 + $0x8] sm:$0xff] %v4327_v55 }
 0x46f   : > { %v4328_v56 = vpop.f32.mrf.mxu0 }
 0x4a6   : > { %v4049_v37 = vpop.f32.mrf.mxu1 }
 0x4a7   : > { %v4107_v58 = vpop.f32.mrf.mxu3  ;;  %v4050_v59 = vadd.f32 %v6668_v57, %v4049_v37 }
 0x4ac   : > { %v4078_v60 = vpop.f32.mrf.mxu2 }
 0x4ad   : > { %v4079_v61 = vadd.f32 %v4078_v60, %v4050_v59 }
 0x4ae   : > { %v4051_v48 = vpop.f32.mrf.mxu1 }
 0x4af   : > { %v4108_v62 = vadd.f32 %v4107_v58, %v4079_v61  ;;  %v4109_v24 = vpop.f32.mrf.mxu3  ;;  %v4052_v9 = vadd.f32 %v6668_v57, %v4051_v48 }
 0x4b1   : > { %4127 = vst [vmem:[%s7715_s7] sm:$0xff] %v4108_v62 }
 0x4b4   : > { %v4080_v27 = vpop.f32.mrf.mxu2 }
 0x4b5   : > { %v4081_v54 = vadd.f32 %v4080_v27, %v4052_v9 }
 0x4b6   : > { %v4054_v8 = vpop.f32.mrf.mxu1 }
 0x4b7   : > { %v4110_v63 = vadd.f32 %v4109_v24, %v4081_v54  ;;  %v4112_v0 = vpop.f32.mrf.mxu3  ;;  %v4055_v1 = vadd.f32 %v6668_v57, %v4054_v8 }
 0x4b9   : > { %4128 = vst [vmem:[%s7715_s7 + $0x8] sm:$0xff] %v4110_v63 }
 0x4bc   : > { %v4083_v2 = vpop.f32.mrf.mxu2 }
 0x4bd   : > { %v4084_v3 = vadd.f32 %v4083_v2, %v4055_v1 }
 0x4be   : > { %v4056_v46 = vpop.f32.mrf.mxu1 }
 0x4bf   : > { %v4113_v15 = vadd.f32 %v4112_v0, %v4084_v3  ;;  %v4114_v25 = vpop.f32.mrf.mxu3  ;;  %v4057_v5 = vadd.f32 %v6668_v57, %v4056_v46 }
 0x4c1   : > { %4129 = vst [vmem:[%s7715_s7 + $0x10] sm:$0xff] %v4113_v15 }
 0x4c4   : > { %v4085_v10 = vpop.f32.mrf.mxu2 }
 0x4c5   : > { %v4086_v11 = vadd.f32 %v4085_v10, %v4057_v5 }
 0x4c6   : > { %v4059_v12 = vpop.f32.mrf.mxu1 }
 0x4c7   : > { %v4115_v14 = vadd.f32 %v4114_v25, %v4086_v11  ;;  %v4117_v16 = vpop.f32.mrf.mxu3  ;;  %v4060_v28 = vadd.f32 %v6668_v57, %v4059_v12 }
 0x4c9   : > { %4130 = vst [vmem:[%s7715_s7 + $0x18] sm:$0xff] %v4115_v14 }
 0x4cc   : > { %v4088_v17 = vpop.f32.mrf.mxu2 }
 0x4cd   : > { %v4089_v18 = vadd.f32 %v4088_v17, %v4060_v28 }
 0x4ce   : > { %v4061_v19 = vpop.f32.mrf.mxu1 }
 0x4cf   : > { %v4118_v20 = vadd.f32 %v4117_v16, %v4089_v18  ;;  %v4119_v21 = vpop.f32.mrf.mxu3  ;;  %v4062_v13 = vadd.f32 %v6668_v57, %v4061_v19 }
 0x4d1   : > { %4131 = vst [vmem:[%s7715_s7 + $0x20] sm:$0xff] %v4118_v20 }
 0x4d4   : > { %v4090_v22 = vpop.f32.mrf.mxu2 }
 0x4d5   : > { %v4091_v23 = vadd.f32 %v4090_v22, %v4062_v13 }
 0x4d6   : > { %v4064_v40 = vpop.f32.mrf.mxu1 }
 0x4d7   : > { %v4120_v4 = vadd.f32 %v4119_v21, %v4091_v23  ;;  %v4065_v38 = vadd.f32 %v6668_v57, %v4064_v40  ;;  %v4122_v29 = vpop.f32.mrf.mxu3 }
 0x4d9   : > { %4132 = vst [vmem:[%s7715_s7 + $0x28] sm:$0xff] %v4120_v4 }
 0x4dc   : > { %v4093_v31 = vpop.f32.mrf.mxu2 }
 0x4dd   : > { %v4094_v32 = vadd.f32 %v4093_v31, %v4065_v38 }
 0x4de   : > { %v4066_v33 = vpop.f32.mrf.mxu1 }
 0x4df   : > { %v4123_v35 = vadd.f32 %v4122_v29, %v4094_v32  ;;  %v4067_v36 = vadd.f32 %v6668_v57, %v4066_v33  ;;  %v4124_v43 = vpop.f32.mrf.mxu3 }
 0x4e1   : > { %4133 = vst [vmem:[%s7715_s7 + $0x30] sm:$0xff] %v4123_v35 }
 0x4e4   : > { %v4095_v39 = vpop.f32.mrf.mxu2 }
 0x4e5   : > { %v4096_v41 = vadd.f32 %v4095_v39, %v4067_v36 }
 0x4e6   : > { %v4339_v44 = vpop.f32.mrf.mxu1 }
 0x4e7   : > { %v4125_v45 = vadd.f32 %v4124_v43, %v4096_v41  ;;  %v4340_v6 = vadd.f32 %v4339_v44, %v4172_v7 }
 0x4e9   : > { %4134 = vst [vmem:[%s7715_s7 + $0x38] sm:$0xff] %v4125_v45 }
 0x4ea   : > { %4345 = vst [vmem:[%s7704_s20 + $0x10] sm:$0xff] %v4340_v6 }
 0x4ee   : > { %v4341_v47 = vpop.f32.mrf.mxu1 }
 0x4ef PF: > { %s7777_s9 = sld [smem:[#allocation25_spill]] }
 0x4f5   : > { %s35_s27 = sadd.s32 1, %s7777_s9  }
 0x4f6   : > { %p32_p8 = scmp.ge.s32.totalorder %s35_s27, 4  }
 0x4f8   :  { %34 = sbr.rel (!%p32_p8) target bundleno = 17 (0x11), region = 210 }
 0x4fd   :  { %4448 = vsyncpa [#allocation3], 1 }
 0x4fe   :  { %4450 = vsyncpa [#allocation3 + $0x1], 1 }
 0x4ff   :  { %4451 = vsyncpa [#allocation5], 1 }
 0x500   :  { %4452 = vsyncpa [#allocation8], 1 }
 0x501   :  { %4453 = vsyncpa [#allocation11], 1 }
 0x502   :  { %4454 = vsyncpa [#allocation14], 1 }
 0x503   :  { %4455 = vsyncpa [#allocation17], 1 }

</bundles_post_ra>
